<compile_context>
chip_gen: v6e
topology: v6e:2x2x1
jax: 0.10.0
libtpu: 0.0.40
codegen_flags: <defaults>
</compile_context>

<pallas_src>
import math
import numpy as np

import jax
import jax.numpy as jnp
from jax import lax
from jax.experimental import pallas as pl
from jax.experimental.pallas import tpu as pltpu

# ----------------------------- config ----------------------------------------
IMG_SIZE = 32
PATCH = 4
IN_CHANS = 3
EMBED_DIM = 32
DEPTHS = (2, 2)
NUM_HEADS = (2, 4)
WINDOW = 4
MLP_RATIO = 4
NUM_CLASSES = 31
CPB_HIDDEN = 512
LN_EPS = 1e-5


# ----------------------------- in-kernel helpers ------------------------------
def _ln(x, g, b):
    mu = jnp.mean(x, axis=-1, keepdims=True)
    var = jnp.mean(jnp.square(x - mu), axis=-1, keepdims=True)
    return (x - mu) * lax.rsqrt(var + LN_EPS) * g + b


def _bf16_dot(a, w):
    # bf16 MXU operands, f32 accumulation (review item for v6e/v7x/v5e MXU rate)
    return jnp.dot(a.astype(jnp.bfloat16), w.astype(jnp.bfloat16),
                   preferred_element_type=jnp.float32)


# ----------------------------- fused attention block kernel ------------------
def _make_attn_kernel(nh, N, C, has_mask):
    hd = C // nh

    def kernel(*refs):
        if has_mask:
            (xw_ref, qkvw_ref, qkvb_ref, projw_ref, projb_ref,
             bias_ref, mask_ref, scale_ref, g_ref, b_ref, o_ref) = refs
        else:
            (xw_ref, qkvw_ref, qkvb_ref, projw_ref, projb_ref,
             bias_ref, scale_ref, g_ref, b_ref, o_ref) = refs

        x = xw_ref[0]                                          # (N, C) f32
        qkv = _bf16_dot(x, qkvw_ref[...]) + qkvb_ref[...]      # (N, 3C) f32
        if has_mask:
            mask = mask_ref[0]                                 # (N, N)

        head_outs = []
        for h in range(nh):                                    # nh is 2 or 4
            q = qkv[:, h * hd:(h + 1) * hd]
            k = qkv[:, C + h * hd:C + (h + 1) * hd]
            v = qkv[:, 2 * C + h * hd:2 * C + (h + 1) * hd]
            # SwinV2 cosine attention: L2-normalize q, k along head dim
            qn = q * lax.rsqrt(jnp.sum(q * q, axis=-1, keepdims=True) + 1e-12)
            kn = k * lax.rsqrt(jnp.sum(k * k, axis=-1, keepdims=True) + 1e-12)
            attn = jnp.dot(qn, kn.T, preferred_element_type=jnp.float32)
            attn = attn * scale_ref[h] + bias_ref[h]
            if has_mask:
                attn = attn + mask
            attn = attn - jnp.max(attn, axis=-1, keepdims=True)
            p = jnp.exp(attn)
            p = p * pl.reciprocal(jnp.sum(p, axis=-1, keepdims=True), approx=True)
            head_outs.append(jnp.dot(p, v, preferred_element_type=jnp.float32))

        ao = jnp.concatenate(head_outs, axis=-1)               # (N, C) lane-dense
        proj = _bf16_dot(ao, projw_ref[...]) + projb_ref[...]  # (N, C)
        y = _ln(proj, g_ref[...], b_ref[...])                  # post-norm (norm1)
        o_ref[0] = (x + y).astype(o_ref.dtype)                 # residual

    return kernel


def attn_block_call(xw, qkv_w, qkv_b, proj_w, proj_b, bias, scale, g, b, mask):
    """xw: (B_, N, C) shifted+windowed tokens.  Fused QKV+attn+proj+norm1+residual."""
    B_, N, C = xw.shape
    nh = bias.shape[0]
    has_mask = mask is not None
    kernel = _make_attn_kernel(nh, N, C, has_mask)

    win_spec = pl.BlockSpec((1, N, C), lambda i: (i, 0, 0))

    def const(shp):
        return pl.BlockSpec(shp, lambda i, _s=shp: (0,) * len(_s))

    in_specs = [
        win_spec,
        const((C, 3 * C)),
        const((1, 3 * C)),
        const((C, C)),
        const((1, C)),
        const((nh, N, N)),
    ]
    args = [xw, qkv_w, qkv_b.reshape(1, 3 * C), proj_w, proj_b.reshape(1, C), bias]
    if has_mask:
        nW = mask.shape[0]
        in_specs.append(pl.BlockSpec((1, N, N), lambda i: (i % nW, 0, 0)))
        args.append(mask)
    in_specs += [
        pl.BlockSpec(memory_space=pltpu.MemorySpace.SMEM),     # per-head scale
        const((1, C)),
        const((1, C)),
    ]
    args += [scale, g.reshape(1, C), b.reshape(1, C)]

    return pl.pallas_call(
        kernel,
        out_shape=jax.ShapeDtypeStruct((B_, N, C), jnp.float32),
        grid=(B_,),
        in_specs=in_specs,
        out_specs=win_spec,
        compiler_params=pltpu.CompilerParams(dimension_semantics=("parallel",)),
    )(*args)


# ----------------------------- fused MLP block kernel -------------------------
def _mlp_kernel(x_ref, w1_ref, b1_ref, w2_ref, b2_ref, g_ref, be_ref, o_ref):
    x = x_ref[...]                                             # (M, C)
    h = _bf16_dot(x, w1_ref[...]) + b1_ref[...]
    # TODO(synk): timm uses exact erf-GELU; tanh approximation used in-kernel
    # (EUP-friendly, |delta| ~1e-3).
    h = jax.nn.gelu(h, approximate=True)
    y = _bf16_dot(h, w2_ref[...]) + b2_ref[...]
    o_ref[...] = (x + _ln(y, g_ref[...], be_ref[...])).astype(o_ref.dtype)


def mlp_block_call(x2, w1, b1, w2, b2, g, b):
    M, C = x2.shape
    Hd = w1.shape[1]
    return pl.pallas_call(
        _mlp_kernel,
        out_shape=jax.ShapeDtypeStruct((M, C), jnp.float32),
        grid=(1,),
        in_specs=[
            pl.BlockSpec((M, C), lambda i: (0, 0)),
            pl.BlockSpec((C, Hd), lambda i: (0, 0)),
            pl.BlockSpec((1, Hd), lambda i: (0, 0)),
            pl.BlockSpec((Hd, C), lambda i: (0, 0)),
            pl.BlockSpec((1, C), lambda i: (0, 0)),
            pl.BlockSpec((1, C), lambda i: (0, 0)),
            pl.BlockSpec((1, C), lambda i: (0, 0)),
        ],
        out_specs=pl.BlockSpec((M, C), lambda i: (0, 0)),
    )(x2, w1, b1.reshape(1, Hd), w2, b2.reshape(1, C), g.reshape(1, C), b.reshape(1, C))


# ----------------------------- fused matmul + LayerNorm kernel ----------------
def _matmul_ln_kernel(x_ref, w_ref, b_ref, g_ref, be_ref, o_ref):
    h = _bf16_dot(x_ref[...], w_ref[...]) + b_ref[...]
    o_ref[...] = _ln(h, g_ref[...], be_ref[...]).astype(o_ref.dtype)


def matmul_ln_call(x2, w, b, g, beta):
    """Used for patch embed (conv-as-matmul + LN) and PatchMerging-V2 (reduce + LN)."""
    M, K = x2.shape
    N = w.shape[1]
    return pl.pallas_call(
        _matmul_ln_kernel,
        out_shape=jax.ShapeDtypeStruct((M, N), jnp.float32),
        grid=(1,),
        in_specs=[
            pl.BlockSpec((M, K), lambda i: (0, 0)),
            pl.BlockSpec((K, N), lambda i: (0, 0)),
            pl.BlockSpec((1, N), lambda i: (0, 0)),
            pl.BlockSpec((1, N), lambda i: (0, 0)),
            pl.BlockSpec((1, N), lambda i: (0, 0)),
        ],
        out_specs=pl.BlockSpec((M, N), lambda i: (0, 0)),
    )(x2, w, b.reshape(1, N), g.reshape(1, N), beta.reshape(1, N))


# ----------------------------- fused final norm + pool + head -----------------
def _make_head_kernel(B, HW):
    def kernel(x_ref, g_ref, be_ref, w_ref, b_ref, o_ref):
        xn = _ln(x_ref[...], g_ref[...], be_ref[...])          # (B*HW, C)
        pooled = jnp.concatenate(
            [jnp.mean(xn[i * HW:(i + 1) * HW], axis=0, keepdims=True)
             for i in range(B)], axis=0)                       # (B, C)
        o_ref[...] = (jnp.dot(pooled, w_ref[...], preferred_element_type=jnp.float32)
                      + b_ref[...]).astype(o_ref.dtype)
    return kernel


def head_call(x2, g, b, w, hb, B, HW):
    M, C = x2.shape
    NC = w.shape[1]
    return pl.pallas_call(
        _make_head_kernel(B, HW),
        out_shape=jax.ShapeDtypeStruct((B, NC), jnp.float32),
        grid=(1,),
        in_specs=[
            pl.BlockSpec((M, C), lambda i: (0, 0)),
            pl.BlockSpec((1, C), lambda i: (0, 0)),
            pl.BlockSpec((1, C), lambda i: (0, 0)),
            pl.BlockSpec((C, NC), lambda i: (0, 0)),
            pl.BlockSpec((1, NC), lambda i: (0, 0)),
        ],
        out_specs=pl.BlockSpec((B, NC), lambda i: (0, 0)),
    )(x2, g.reshape(1, C), b.reshape(1, C), w, hb.reshape(1, NC))


# ----------------------------- SwinV2 glue (plain JAX layout ops) --------------
def window_partition(x, ws):
    B, H, W, C = x.shape
    x = x.reshape(B, H // ws, ws, W // ws, ws, C)
    return x.transpose(0, 1, 3, 2, 4, 5).reshape(-1, ws, ws, C)


def window_reverse(wins, ws, H, W):
    C = wins.shape[-1]
    B = wins.shape[0] // ((H // ws) * (W // ws))
    x = wins.reshape(B, H // ws, W // ws, ws, ws, C)
    return x.transpose(0, 1, 3, 2, 4, 5).reshape(B, H, W, C)


def relative_coords_table(ws):
    rh = np.arange(-(ws - 1), ws, dtype=np.float32)
    rw = np.arange(-(ws - 1), ws, dtype=np.float32)
    t = np.stack(np.meshgrid(rh, rw, indexing="ij"), axis=-1)
    t = t / (ws - 1)
    t = t * 8.0
    t = np.sign(t) * np.log2(np.abs(t) + 1.0) / np.log2(8.0)
    return t.reshape(-1, 2)


def relative_position_index(ws):
    coords = np.stack(np.meshgrid(np.arange(ws), np.arange(ws), indexing="ij"))
    cf = coords.reshape(2, -1)
    rel = (cf[:, :, None] - cf[:, None, :]).transpose(1, 2, 0).copy()
    rel[:, :, 0] += ws - 1
    rel[:, :, 1] += ws - 1
    rel[:, :, 0] *= 2 * ws - 1
    return rel.sum(-1)


def compute_attn_mask(H, W, ws, shift):
    if shift == 0:
        return None
    img = np.zeros((1, H, W, 1), np.float32)
    cnt = 0
    for hs in (slice(0, -ws), slice(-ws, -shift), slice(-shift, None)):
        for wslc in (slice(0, -ws), slice(-ws, -shift), slice(-shift, None)):
            img[:, hs, wslc, :] = cnt
            cnt += 1
    mw = img.reshape(1, H // ws, ws, W // ws, ws, 1)
    mw = mw.transpose(0, 1, 3, 2, 4, 5).reshape(-1, ws * ws)
    am = mw[:, None, :] - mw[:, :, None]
    am = np.where(am != 0, -100.0, 0.0).astype(np.float32)
    return jnp.asarray(am)  # (nW, N, N)


def compute_rel_bias(bp, ws, nh):
    # continuous relative position bias MLP (tiny; kept in plain JAX)
    t = jnp.asarray(relative_coords_table(ws))                 # (T, 2)
    h = jax.nn.relu(t @ bp["cpb_w1"] + bp["cpb_b1"])
    tbl = h @ bp["cpb_w2"]                                     # (T, nh)
    N = ws * ws
    idx = relative_position_index(ws).reshape(-1)
    bias = tbl[idx].reshape(N, N, nh).transpose(2, 0, 1)       # (nh, N, N)
    return 16.0 * jax.nn.sigmoid(bias)


def swin_block(x, bp, nh, ws, shift, attn_mask):
    B, H, W, C = x.shape
    N = ws * ws

    # ---- attention half (fused kernel per block, grid over windows) ----
    xs = jnp.roll(x, shift=(-shift, -shift), axis=(1, 2)) if shift > 0 else x
    xw = window_partition(xs, ws).reshape(-1, N, C)            # (B*nW, N, C)

    scale = jnp.exp(jnp.minimum(bp["logit_scale"].reshape(nh), math.log(1.0 / 0.01)))
    bias = compute_rel_bias(bp, ws, nh)                        # (nh, N, N)
    qkv_b = jnp.concatenate([bp["q_bias"], jnp.zeros_like(bp["v_bias"]), bp["v_bias"]])

    yw = attn_block_call(xw, bp["qkv_w"], qkv_b, bp["proj_w"], bp["proj_b"],
                         bias, scale, bp["norm1_g"], bp["norm1_b"], attn_mask)

    y = window_reverse(yw.reshape(-1, ws, ws, C), ws, H, W)
    if shift > 0:
        y = jnp.roll(y, shift=(shift, shift), axis=(1, 2))

    # ---- MLP half (fused fc1+GELU+fc2+norm2+residual, all tokens at once) ----
    xf = y.reshape(B * H * W, C)
    xf = mlp_block_call(xf, bp["fc1_w"], bp["fc1_b"], bp["fc2_w"], bp["fc2_b"],
                        bp["norm2_g"], bp["norm2_b"])
    return xf.reshape(B, H, W, C)


def patch_merging(x, mp):
    B, H, W, C = x.shape
    x0 = x[:, 0::2, 0::2]
    x1 = x[:, 1::2, 0::2]
    x2 = x[:, 0::2, 1::2]
    x3 = x[:, 1::2, 1::2]
    xm = jnp.concatenate([x0, x1, x2, x3], axis=-1).reshape(-1, 4 * C)
    out = matmul_ln_call(xm, mp["red_w"], jnp.zeros((2 * C,), jnp.float32),
                         mp["norm_g"], mp["norm_b"])           # Linear(bias=False)+LN
    return out.reshape(B, H // 2, W // 2, 2 * C)


# ----------------------------- parameters -------------------------------------
def init_params(key):
    kit = iter(jax.random.split(key, 256))

    def w(shape, std=0.02):
        return jax.random.normal(next(kit), shape, jnp.float32) * std

    P = {
        "patch_w": w((IN_CHANS * PATCH * PATCH, EMBED_DIM)),
        "patch_b": jnp.zeros((EMBED_DIM,), jnp.float32),
        "patch_norm_g": jnp.ones((EMBED_DIM,), jnp.float32),
        "patch_norm_b": jnp.zeros((EMBED_DIM,), jnp.float32),
        "stages": [],
    }
    dim = EMBED_DIM
    for si, (depth, nh) in enumerate(zip(DEPTHS, NUM_HEADS)):
        stage = {}
        if si > 0:
            in_dim = dim
            dim = dim * 2
            stage["downsample"] = {
                "red_w": w((4 * in_dim, dim)),
                "norm_g": jnp.ones((dim,), jnp.float32),
                "norm_b": jnp.zeros((dim,), jnp.float32),
            }
        hidden = dim * MLP_RATIO
        blocks = []
        for _ in range(depth):
            blocks.append({
                "qkv_w": w((dim, 3 * dim)),
                "q_bias": jnp.zeros((dim,), jnp.float32),
                "v_bias": jnp.zeros((dim,), jnp.float32),
                "logit_scale": jnp.full((nh, 1, 1), math.log(10.0), jnp.float32),
                "cpb_w1": w((2, CPB_HIDDEN)),
                "cpb_b1": jnp.zeros((CPB_HIDDEN,), jnp.float32),
                "cpb_w2": w((CPB_HIDDEN, nh)),
                "proj_w": w((dim, dim)),
                "proj_b": jnp.zeros((dim,), jnp.float32),
                "norm1_g": jnp.ones((dim,), jnp.float32),
                "norm1_b": jnp.zeros((dim,), jnp.float32),
                "fc1_w": w((dim, hidden)),
                "fc1_b": jnp.zeros((hidden,), jnp.float32),
                "fc2_w": w((hidden, dim)),
                "fc2_b": jnp.zeros((dim,), jnp.float32),
                "norm2_g": jnp.ones((dim,), jnp.float32),
                "norm2_b": jnp.zeros((dim,), jnp.float32),
            })
        stage["blocks"] = blocks
        P["stages"].append(stage)
    P["norm_g"] = jnp.ones((dim,), jnp.float32)
    P["norm_b"] = jnp.zeros((dim,), jnp.float32)
    P["head_w"] = w((dim, NUM_CLASSES))
    P["head_b"] = jnp.zeros((NUM_CLASSES,), jnp.float32)
    return P


# ----------------------------- full forward ------------------------------------
def swinv2_forward(params, x):
    B, Cin, H, W = x.shape
    p = PATCH
    # patch embed: NCHW conv(k=4, s=4) expressed as patch-extract + fused matmul+LN
    xp = x.reshape(B, Cin, H // p, p, W // p, p).transpose(0, 2, 4, 1, 3, 5)
    xp = xp.reshape(B * (H // p) * (W // p), Cin * p * p)
    feat = matmul_ln_call(xp, params["patch_w"], params["patch_b"],
                          params["patch_norm_g"], params["patch_norm_b"])
    res = H // p
    feat = feat.reshape(B, res, res, EMBED_DIM)

    for si, stage in enumerate(params["stages"]):
        nh = NUM_HEADS[si]
        if "downsample" in stage:
            feat = patch_merging(feat, stage["downsample"])
            res = res // 2
        ws = min(WINDOW, res)
        for bi, bp in enumerate(stage["blocks"]):
            shift = 0 if (bi % 2 == 0) else ws // 2
            if res <= ws:  # timm: no shift when resolution <= window
                shift = 0
            attn_mask = compute_attn_mask(res, res, ws, shift)
            feat = swin_block(feat, bp, nh, ws, shift, attn_mask)

    C = feat.shape[-1]
    HW = res * res
    logits = head_call(feat.reshape(B * HW, C), params["norm_g"], params["norm_b"],
                       params["head_w"], params["head_b"], B, HW)
    return logits


if __name__ == "__main__":
    key = jax.random.PRNGKey(0)
    pkey, xkey = jax.random.split(key)
    params = init_params(pkey)
    x = jax.random.normal(xkey, (2, IN_CHANS, IMG_SIZE, IMG_SIZE), jnp.float32)

    fwd = jax.jit(swinv2_forward)
    logits = fwd(params, x)
    jax.block_until_ready(logits)
    assert logits.shape == (2, NUM_CLASSES), logits.shape
    assert bool(jnp.all(jnp.isfinite(logits)))
    print("KERNEL_OK")
</pallas_src>

<mosaic_0001>
module attributes {stable_mosaic.version = 11 : i64} {
  func.func @_matmul_ln_kernel(%arg0: i32, %arg1: memref<128x48xf32, #tpu.memory_space<vmem>>, %arg2: memref<48x32xf32, #tpu.memory_space<vmem>>, %arg3: memref<1x32xf32, #tpu.memory_space<vmem>>, %arg4: memref<1x32xf32, #tpu.memory_space<vmem>>, %arg5: memref<1x32xf32, #tpu.memory_space<vmem>>, %arg6: memref<128x32xf32, #tpu.memory_space<vmem>>) attributes {dimension_semantics = [#tpu.dimension_semantics<arbitrary>], iteration_bounds = array<i64: 1>, scalar_prefetch = 0 : i64, scratch_operands = 0 : i64, tpu.core_type = #tpu.core_type<tc>, window_params = [{pipeline_mode = #tpu.pipeline_mode<synchronous>, transform_indices = @transform_0, window_bounds = array<i64: 128, 48>}, {pipeline_mode = #tpu.pipeline_mode<synchronous>, transform_indices = @transform_1, window_bounds = array<i64: 48, 32>}, {pipeline_mode = #tpu.pipeline_mode<synchronous>, transform_indices = @transform_2, window_bounds = array<i64: 1, 32>}, {pipeline_mode = #tpu.pipeline_mode<synchronous>, transform_indices = @transform_3, window_bounds = array<i64: 1, 32>}, {pipeline_mode = #tpu.pipeline_mode<synchronous>, transform_indices = @transform_4, window_bounds = array<i64: 1, 32>}, {pipeline_mode = #tpu.pipeline_mode<synchronous>, transform_indices = @transform_5, window_bounds = array<i64: 128, 32>}]} {
    %c0 = arith.constant 0 : index
    %c0_0 = arith.constant 0 : index
    %0 = vector.load %arg1[%c0, %c0_0] : memref<128x48xf32, #tpu.memory_space<vmem>>, vector<128x48xf32>
    %c0_1 = arith.constant 0 : index
    %c0_2 = arith.constant 0 : index
    %1 = vector.load %arg2[%c0_1, %c0_2] : memref<48x32xf32, #tpu.memory_space<vmem>>, vector<48x32xf32>
    %2 = arith.truncf %0 : vector<128x48xf32> to vector<128x48xbf16>
    %3 = arith.truncf %1 : vector<48x32xf32> to vector<48x32xbf16>
    %cst = arith.constant dense<0.000000e+00> : vector<128x32xf32>
    %4 = tpu.matmul %2, %3, %cst {dimension_numbers = #tpu.dot_dimension_numbers<[1], [0], [0], [1], [0, 0, 1, 1], [], []>} : vector<128x48xbf16>, vector<48x32xbf16>, vector<128x32xf32> -> vector<128x32xf32>
    %c0_3 = arith.constant 0 : index
    %c0_4 = arith.constant 0 : index
    %5 = vector.load %arg3[%c0_3, %c0_4] : memref<1x32xf32, #tpu.memory_space<vmem>>, vector<1x32xf32>
    %6 = vector.broadcast %5 : vector<1x32xf32> to vector<128x32xf32>
    %7 = arith.addf %4, %6 : vector<128x32xf32>
    %c0_5 = arith.constant 0 : index
    %c0_6 = arith.constant 0 : index
    %8 = vector.load %arg4[%c0_5, %c0_6] : memref<1x32xf32, #tpu.memory_space<vmem>>, vector<1x32xf32>
    %c0_7 = arith.constant 0 : index
    %c0_8 = arith.constant 0 : index
    %9 = vector.load %arg5[%c0_7, %c0_8] : memref<1x32xf32, #tpu.memory_space<vmem>>, vector<1x32xf32>
    %cst_9 = arith.constant dense<0.000000e+00> : vector<128xf32>
    %10 = vector.multi_reduction <add>, %7, %cst_9 [1] : vector<128x32xf32> to vector<128xf32>
    %11 = vector.shape_cast %10 : vector<128xf32> to vector<128x1xf32>
    %cst_10 = arith.constant 3.200000e+01 : f32
    %12 = vector.broadcast %cst_10 : f32 to vector<128x1xf32>
    %13 = arith.divf %11, %12 : vector<128x1xf32>
    %14 = vector.broadcast %13 : vector<128x1xf32> to vector<128x32xf32>
    %15 = arith.subf %7, %14 : vector<128x32xf32>
    %16 = arith.mulf %15, %15 : vector<128x32xf32>
    %cst_11 = arith.constant dense<0.000000e+00> : vector<128xf32>
    %17 = vector.multi_reduction <add>, %16, %cst_11 [1] : vector<128x32xf32> to vector<128xf32>
    %18 = vector.shape_cast %17 : vector<128xf32> to vector<128x1xf32>
    %cst_12 = arith.constant 3.200000e+01 : f32
    %19 = vector.broadcast %cst_12 : f32 to vector<128x1xf32>
    %20 = arith.divf %18, %19 : vector<128x1xf32>
    %21 = vector.broadcast %13 : vector<128x1xf32> to vector<128x32xf32>
    %22 = arith.subf %7, %21 : vector<128x32xf32>
    %cst_13 = arith.constant 9.99999974E-6 : f32
    %23 = vector.broadcast %cst_13 : f32 to vector<128x1xf32>
    %24 = arith.addf %20, %23 : vector<128x1xf32>
    %25 = math.rsqrt %24 : vector<128x1xf32>
    %26 = vector.broadcast %25 : vector<128x1xf32> to vector<128x32xf32>
    %27 = arith.mulf %22, %26 : vector<128x32xf32>
    %28 = vector.broadcast %8 : vector<1x32xf32> to vector<128x32xf32>
    %29 = arith.mulf %27, %28 : vector<128x32xf32>
    %30 = vector.broadcast %9 : vector<1x32xf32> to vector<128x32xf32>
    %31 = arith.addf %29, %30 : vector<128x32xf32>
    %c0_14 = arith.constant 0 : index
    %c0_15 = arith.constant 0 : index
    %32 = vector.load %arg6[%c0_14, %c0_15] : memref<128x32xf32, #tpu.memory_space<vmem>>, vector<128x32xf32>
    tpu.vector_store %arg6[%c0_14, %c0_15], %31 {strides = array<i32>} : memref<128x32xf32, #tpu.memory_space<vmem>>, vector<128x32xf32>,
    return
  }
  func.func @transform_0(%arg0: i32) -> (i32, i32) {
    %c0_i32 = arith.constant 0 : i32
    %c0_i32_0 = arith.constant 0 : i32
    %c0_i32_1 = arith.constant 0 : i32
    return %c0_i32, %c0_i32_0 : i32, i32
  }
  func.func @transform_1(%arg0: i32) -> (i32, i32) {
    %c0_i32 = arith.constant 0 : i32
    %c0_i32_0 = arith.constant 0 : i32
    %c0_i32_1 = arith.constant 0 : i32
    return %c0_i32, %c0_i32_0 : i32, i32
  }
  func.func @transform_2(%arg0: i32) -> (i32, i32) {
    %c0_i32 = arith.constant 0 : i32
    %c0_i32_0 = arith.constant 0 : i32
    %c0_i32_1 = arith.constant 0 : i32
    return %c0_i32, %c0_i32_0 : i32, i32
  }
  func.func @transform_3(%arg0: i32) -> (i32, i32) {
    %c0_i32 = arith.constant 0 : i32
    %c0_i32_0 = arith.constant 0 : i32
    %c0_i32_1 = arith.constant 0 : i32
    return %c0_i32, %c0_i32_0 : i32, i32
  }
  func.func @transform_4(%arg0: i32) -> (i32, i32) {
    %c0_i32 = arith.constant 0 : i32
    %c0_i32_0 = arith.constant 0 : i32
    %c0_i32_1 = arith.constant 0 : i32
    return %c0_i32, %c0_i32_0 : i32, i32
  }
  func.func @transform_5(%arg0: i32) -> (i32, i32) {
    %c0_i32 = arith.constant 0 : i32
    %c0_i32_0 = arith.constant 0 : i32
    %c0_i32_1 = arith.constant 0 : i32
    return %c0_i32, %c0_i32_0 : i32, i32
  }
}

module attributes {stable_mosaic.version = 11 : i64} {
  func.func @_mlp_kernel(%arg0: i32, %arg1: memref<128x32xf32, #tpu.memory_space<vmem>>, %arg2: memref<32x128xf32, #tpu.memory_space<vmem>>, %arg3: memref<1x128xf32, #tpu.memory_space<vmem>>, %arg4: memref<128x32xf32, #tpu.memory_space<vmem>>, %arg5: memref<1x32xf32, #tpu.memory_space<vmem>>, %arg6: memref<1x32xf32, #tpu.memory_space<vmem>>, %arg7: memref<1x32xf32, #tpu.memory_space<vmem>>, %arg8: memref<128x32xf32, #tpu.memory_space<vmem>>) attributes {dimension_semantics = [#tpu.dimension_semantics<arbitrary>], iteration_bounds = array<i64: 1>, scalar_prefetch = 0 : i64, scratch_operands = 0 : i64, tpu.core_type = #tpu.core_type<tc>, window_params = [{pipeline_mode = #tpu.pipeline_mode<synchronous>, transform_indices = @transform_0, window_bounds = array<i64: 128, 32>}, {pipeline_mode = #tpu.pipeline_mode<synchronous>, transform_indices = @transform_1, window_bounds = array<i64: 32, 128>}, {pipeline_mode = #tpu.pipeline_mode<synchronous>, transform_indices = @transform_2, window_bounds = array<i64: 1, 128>}, {pipeline_mode = #tpu.pipeline_mode<synchronous>, transform_indices = @transform_3, window_bounds = array<i64: 128, 32>}, {pipeline_mode = #tpu.pipeline_mode<synchronous>, transform_indices = @transform_4, window_bounds = array<i64: 1, 32>}, {pipeline_mode = #tpu.pipeline_mode<synchronous>, transform_indices = @transform_5, window_bounds = array<i64: 1, 32>}, {pipeline_mode = #tpu.pipeline_mode<synchronous>, transform_indices = @transform_6, window_bounds = array<i64: 1, 32>}, {pipeline_mode = #tpu.pipeline_mode<synchronous>, transform_indices = @transform_7, window_bounds = array<i64: 128, 32>}]} {
    %c0 = arith.constant 0 : index
    %c0_0 = arith.constant 0 : index
    %0 = vector.load %arg1[%c0, %c0_0] : memref<128x32xf32, #tpu.memory_space<vmem>>, vector<128x32xf32>
    %c0_1 = arith.constant 0 : index
    %c0_2 = arith.constant 0 : index
    %1 = vector.load %arg2[%c0_1, %c0_2] : memref<32x128xf32, #tpu.memory_space<vmem>>, vector<32x128xf32>
    %2 = arith.truncf %0 : vector<128x32xf32> to vector<128x32xbf16>
    %3 = arith.truncf %1 : vector<32x128xf32> to vector<32x128xbf16>
    %cst = arith.constant dense<0.000000e+00> : vector<128x128xf32>
    %4 = tpu.matmul %2, %3, %cst {dimension_numbers = #tpu.dot_dimension_numbers<[1], [0], [0], [1], [0, 0, 1, 1], [], []>} : vector<128x32xbf16>, vector<32x128xbf16>, vector<128x128xf32> -> vector<128x128xf32>
    %c0_3 = arith.constant 0 : index
    %c0_4 = arith.constant 0 : index
    %5 = vector.load %arg3[%c0_3, %c0_4] : memref<1x128xf32, #tpu.memory_space<vmem>>, vector<1x128xf32>
    %6 = vector.broadcast %5 : vector<1x128xf32> to vector<128x128xf32>
    %7 = arith.addf %4, %6 : vector<128x128xf32>
    %8 = arith.mulf %7, %7 : vector<128x128xf32>
    %9 = arith.mulf %7, %8 : vector<128x128xf32>
    %cst_5 = arith.constant 4.471500e-02 : f32
    %10 = vector.broadcast %cst_5 : f32 to vector<128x128xf32>
    %11 = arith.mulf %10, %9 : vector<128x128xf32>
    %12 = arith.addf %7, %11 : vector<128x128xf32>
    %cst_6 = arith.constant 0.797884583 : f32
    %13 = vector.broadcast %cst_6 : f32 to vector<128x128xf32>
    %14 = arith.mulf %13, %12 : vector<128x128xf32>
    %15 = math.tanh %14 : vector<128x128xf32>
    %cst_7 = arith.constant 1.000000e+00 : f32
    %16 = vector.broadcast %cst_7 : f32 to vector<128x128xf32>
    %17 = arith.addf %16, %15 : vector<128x128xf32>
    %cst_8 = arith.constant 5.000000e-01 : f32
    %18 = vector.broadcast %cst_8 : f32 to vector<128x128xf32>
    %19 = arith.mulf %18, %17 : vector<128x128xf32>
    %20 = arith.mulf %7, %19 : vector<128x128xf32>
    %c0_9 = arith.constant 0 : index
    %c0_10 = arith.constant 0 : index
    %21 = vector.load %arg4[%c0_9, %c0_10] : memref<128x32xf32, #tpu.memory_space<vmem>>, vector<128x32xf32>
    %22 = arith.truncf %20 : vector<128x128xf32> to vector<128x128xbf16>
    %23 = arith.truncf %21 : vector<128x32xf32> to vector<128x32xbf16>
    %cst_11 = arith.constant dense<0.000000e+00> : vector<128x32xf32>
    %24 = tpu.matmul %22, %23, %cst_11 {dimension_numbers = #tpu.dot_dimension_numbers<[1], [0], [0], [1], [0, 0, 1, 1], [], []>} : vector<128x128xbf16>, vector<128x32xbf16>, vector<128x32xf32> -> vector<128x32xf32>
    %c0_12 = arith.constant 0 : index
    %c0_13 = arith.constant 0 : index
    %25 = vector.load %arg5[%c0_12, %c0_13] : memref<1x32xf32, #tpu.memory_space<vmem>>, vector<1x32xf32>
    %26 = vector.broadcast %25 : vector<1x32xf32> to vector<128x32xf32>
    %27 = arith.addf %24, %26 : vector<128x32xf32>
    %c0_14 = arith.constant 0 : index
    %c0_15 = arith.constant 0 : index
    %28 = vector.load %arg6[%c0_14, %c0_15] : memref<1x32xf32, #tpu.memory_space<vmem>>, vector<1x32xf32>
    %c0_16 = arith.constant 0 : index
    %c0_17 = arith.constant 0 : index
    %29 = vector.load %arg7[%c0_16, %c0_17] : memref<1x32xf32, #tpu.memory_space<vmem>>, vector<1x32xf32>
    %cst_18 = arith.constant dense<0.000000e+00> : vector<128xf32>
    %30 = vector.multi_reduction <add>, %27, %cst_18 [1] : vector<128x32xf32> to vector<128xf32>
    %31 = vector.shape_cast %30 : vector<128xf32> to vector<128x1xf32>
    %cst_19 = arith.constant 3.200000e+01 : f32
    %32 = vector.broadcast %cst_19 : f32 to vector<128x1xf32>
    %33 = arith.divf %31, %32 : vector<128x1xf32>
    %34 = vector.broadcast %33 : vector<128x1xf32> to vector<128x32xf32>
    %35 = arith.subf %27, %34 : vector<128x32xf32>
    %36 = arith.mulf %35, %35 : vector<128x32xf32>
    %cst_20 = arith.constant dense<0.000000e+00> : vector<128xf32>
    %37 = vector.multi_reduction <add>, %36, %cst_20 [1] : vector<128x32xf32> to vector<128xf32>
    %38 = vector.shape_cast %37 : vector<128xf32> to vector<128x1xf32>
    %cst_21 = arith.constant 3.200000e+01 : f32
    %39 = vector.broadcast %cst_21 : f32 to vector<128x1xf32>
    %40 = arith.divf %38, %39 : vector<128x1xf32>
    %41 = vector.broadcast %33 : vector<128x1xf32> to vector<128x32xf32>
    %42 = arith.subf %27, %41 : vector<128x32xf32>
    %cst_22 = arith.constant 9.99999974E-6 : f32
    %43 = vector.broadcast %cst_22 : f32 to vector<128x1xf32>
    %44 = arith.addf %40, %43 : vector<128x1xf32>
    %45 = math.rsqrt %44 : vector<128x1xf32>
    %46 = vector.broadcast %45 : vector<128x1xf32> to vector<128x32xf32>
    %47 = arith.mulf %42, %46 : vector<128x32xf32>
    %48 = vector.broadcast %28 : vector<1x32xf32> to vector<128x32xf32>
    %49 = arith.mulf %47, %48 : vector<128x32xf32>
    %50 = vector.broadcast %29 : vector<1x32xf32> to vector<128x32xf32>
    %51 = arith.addf %49, %50 : vector<128x32xf32>
    %52 = arith.addf %0, %51 : vector<128x32xf32>
    %c0_23 = arith.constant 0 : index
    %c0_24 = arith.constant 0 : index
    %53 = vector.load %arg8[%c0_23, %c0_24] : memref<128x32xf32, #tpu.memory_space<vmem>>, vector<128x32xf32>
    tpu.vector_store %arg8[%c0_23, %c0_24], %52 {strides = array<i32>} : memref<128x32xf32, #tpu.memory_space<vmem>>, vector<128x32xf32>,
    return
  }
  func.func @transform_0(%arg0: i32) -> (i32, i32) {
    %c0_i32 = arith.constant 0 : i32
    %c0_i32_0 = arith.constant 0 : i32
    %c0_i32_1 = arith.constant 0 : i32
    return %c0_i32, %c0_i32_0 : i32, i32
  }
  func.func @transform_1(%arg0: i32) -> (i32, i32) {
    %c0_i32 = arith.constant 0 : i32
    %c0_i32_0 = arith.constant 0 : i32
    %c0_i32_1 = arith.constant 0 : i32
    return %c0_i32, %c0_i32_0 : i32, i32
  }
  func.func @transform_2(%arg0: i32) -> (i32, i32) {
    %c0_i32 = arith.constant 0 : i32
    %c0_i32_0 = arith.constant 0 : i32
    %c0_i32_1 = arith.constant 0 : i32
    return %c0_i32, %c0_i32_0 : i32, i32
  }
  func.func @transform_3(%arg0: i32) -> (i32, i32) {
    %c0_i32 = arith.constant 0 : i32
    %c0_i32_0 = arith.constant 0 : i32
    %c0_i32_1 = arith.constant 0 : i32
    return %c0_i32, %c0_i32_0 : i32, i32
  }
  func.func @transform_4(%arg0: i32) -> (i32, i32) {
    %c0_i32 = arith.constant 0 : i32
    %c0_i32_0 = arith.constant 0 : i32
    %c0_i32_1 = arith.constant 0 : i32
    return %c0_i32, %c0_i32_0 : i32, i32
  }
  func.func @transform_5(%arg0: i32) -> (i32, i32) {
    %c0_i32 = arith.constant 0 : i32
    %c0_i32_0 = arith.constant 0 : i32
    %c0_i32_1 = arith.constant 0 : i32
    return %c0_i32, %c0_i32_0 : i32, i32
  }
  func.func @transform_6(%arg0: i32) -> (i32, i32) {
    %c0_i32 = arith.constant 0 : i32
    %c0_i32_0 = arith.constant 0 : i32
    %c0_i32_1 = arith.constant 0 : i32
    return %c0_i32, %c0_i32_0 : i32, i32
  }
  func.func @transform_7(%arg0: i32) -> (i32, i32) {
    %c0_i32 = arith.constant 0 : i32
    %c0_i32_0 = arith.constant 0 : i32
    %c0_i32_1 = arith.constant 0 : i32
    return %c0_i32, %c0_i32_0 : i32, i32
  }
}

module attributes {stable_mosaic.version = 11 : i64} {
  func.func @kernel(%arg0: i32, %arg1: memref<1x16x32xf32, #tpu.memory_space<vmem>>, %arg2: memref<32x96xf32, #tpu.memory_space<vmem>>, %arg3: memref<1x96xf32, #tpu.memory_space<vmem>>, %arg4: memref<32x32xf32, #tpu.memory_space<vmem>>, %arg5: memref<1x32xf32, #tpu.memory_space<vmem>>, %arg6: memref<2x16x16xf32, #tpu.memory_space<vmem>>, %arg7: memref<2xf32, #tpu.memory_space<smem>>, %arg8: memref<1x32xf32, #tpu.memory_space<vmem>>, %arg9: memref<1x32xf32, #tpu.memory_space<vmem>>, %arg10: memref<1x16x32xf32, #tpu.memory_space<vmem>>) attributes {dimension_semantics = [#tpu.dimension_semantics<parallel>], iteration_bounds = array<i64: 8>, scalar_prefetch = 0 : i64, scratch_operands = 0 : i64, tpu.core_type = #tpu.core_type<tc>, window_params = [{transform_indices = @transform_0, window_bounds = array<i64: 1, 16, 32>}, {pipeline_mode = #tpu.pipeline_mode<synchronous>, transform_indices = @transform_1, window_bounds = array<i64: 32, 96>}, {pipeline_mode = #tpu.pipeline_mode<synchronous>, transform_indices = @transform_2, window_bounds = array<i64: 1, 96>}, {pipeline_mode = #tpu.pipeline_mode<synchronous>, transform_indices = @transform_3, window_bounds = array<i64: 32, 32>}, {pipeline_mode = #tpu.pipeline_mode<synchronous>, transform_indices = @transform_4, window_bounds = array<i64: 1, 32>}, {pipeline_mode = #tpu.pipeline_mode<synchronous>, transform_indices = @transform_5, window_bounds = array<i64: 2, 16, 16>}, {transform_indices = @transform_6, window_bounds = array<i64: 2>}, {pipeline_mode = #tpu.pipeline_mode<synchronous>, transform_indices = @transform_7, window_bounds = array<i64: 1, 32>}, {pipeline_mode = #tpu.pipeline_mode<synchronous>, transform_indices = @transform_8, window_bounds = array<i64: 1, 32>}, {transform_indices = @transform_9, window_bounds = array<i64: 1, 16, 32>}]} {
    %c0 = arith.constant 0 : index
    %c0_0 = arith.constant 0 : index
    %c0_1 = arith.constant 0 : index
    %0 = vector.load %arg1[%c0, %c0_0, %c0_1] : memref<1x16x32xf32, #tpu.memory_space<vmem>>, vector<1x16x32xf32>
    %1 = vector.shape_cast %0 : vector<1x16x32xf32> to vector<16x32xf32>
    %c0_2 = arith.constant 0 : index
    %c0_3 = arith.constant 0 : index
    %2 = vector.load %arg2[%c0_2, %c0_3] : memref<32x96xf32, #tpu.memory_space<vmem>>, vector<32x96xf32>
    %3 = arith.truncf %1 : vector<16x32xf32> to vector<16x32xbf16>
    %4 = arith.truncf %2 : vector<32x96xf32> to vector<32x96xbf16>
    %cst = arith.constant dense<0.000000e+00> : vector<16x96xf32>
    %5 = tpu.matmul %3, %4, %cst {dimension_numbers = #tpu.dot_dimension_numbers<[1], [0], [0], [1], [0, 0, 1, 1], [], []>} : vector<16x32xbf16>, vector<32x96xbf16>, vector<16x96xf32> -> vector<16x96xf32>
    %c0_4 = arith.constant 0 : index
    %c0_5 = arith.constant 0 : index
    %6 = vector.load %arg3[%c0_4, %c0_5] : memref<1x96xf32, #tpu.memory_space<vmem>>, vector<1x96xf32>
    %7 = vector.broadcast %6 : vector<1x96xf32> to vector<16x96xf32>
    %8 = arith.addf %5, %7 : vector<16x96xf32>
    %9 = vector.extract_strided_slice %8 {offsets = [0, 0], sizes = [16, 16], strides = [1, 1]} : vector<16x96xf32> to vector<16x16xf32>
    %10 = vector.extract_strided_slice %8 {offsets = [0, 32], sizes = [16, 16], strides = [1, 1]} : vector<16x96xf32> to vector<16x16xf32>
    %11 = vector.extract_strided_slice %8 {offsets = [0, 64], sizes = [16, 16], strides = [1, 1]} : vector<16x96xf32> to vector<16x16xf32>
    %12 = arith.mulf %9, %9 : vector<16x16xf32>
    %cst_6 = arith.constant dense<0.000000e+00> : vector<16xf32>
    %13 = vector.multi_reduction <add>, %12, %cst_6 [1] : vector<16x16xf32> to vector<16xf32>
    %14 = vector.shape_cast %13 : vector<16xf32> to vector<16x1xf32>
    %cst_7 = arith.constant 9.99999996E-13 : f32
    %15 = vector.broadcast %cst_7 : f32 to vector<16x1xf32>
    %16 = arith.addf %14, %15 : vector<16x1xf32>
    %17 = math.rsqrt %16 : vector<16x1xf32>
    %18 = vector.broadcast %17 : vector<16x1xf32> to vector<16x16xf32>
    %19 = arith.mulf %9, %18 : vector<16x16xf32>
    %20 = arith.mulf %10, %10 : vector<16x16xf32>
    %cst_8 = arith.constant dense<0.000000e+00> : vector<16xf32>
    %21 = vector.multi_reduction <add>, %20, %cst_8 [1] : vector<16x16xf32> to vector<16xf32>
    %22 = vector.shape_cast %21 : vector<16xf32> to vector<16x1xf32>
    %cst_9 = arith.constant 9.99999996E-13 : f32
    %23 = vector.broadcast %cst_9 : f32 to vector<16x1xf32>
    %24 = arith.addf %22, %23 : vector<16x1xf32>
    %25 = math.rsqrt %24 : vector<16x1xf32>
    %26 = vector.broadcast %25 : vector<16x1xf32> to vector<16x16xf32>
    %27 = arith.mulf %10, %26 : vector<16x16xf32>
    %28 = tpu.transpose %27, [1, 0] : vector<16x16xf32> -> vector<16x16xf32>
    %cst_10 = arith.constant dense<0.000000e+00> : vector<16x16xf32>
    %29 = tpu.matmul %19, %28, %cst_10 {dimension_numbers = #tpu.dot_dimension_numbers<[1], [0], [0], [1], [0, 0, 1, 1], [], []>} : vector<16x16xf32>, vector<16x16xf32>, vector<16x16xf32> -> vector<16x16xf32>
    %c0_11 = arith.constant 0 : index
    %30 = memref.load %arg7[%c0_11] : memref<2xf32, #tpu.memory_space<smem>>
    %31 = vector.broadcast %30 : f32 to vector<16x16xf32>
    %32 = arith.mulf %29, %31 : vector<16x16xf32>
    %c0_12 = arith.constant 0 : index
    %c0_13 = arith.constant 0 : index
    %c0_14 = arith.constant 0 : index
    %33 = vector.load %arg6[%c0_12, %c0_13, %c0_14] : memref<2x16x16xf32, #tpu.memory_space<vmem>>, vector<1x16x16xf32>
    %34 = vector.shape_cast %33 : vector<1x16x16xf32> to vector<16x16xf32>
    %35 = arith.addf %32, %34 : vector<16x16xf32>
    %cst_15 = arith.constant dense<0xFF800000> : vector<16xf32>
    %36 = vector.multi_reduction <maximumf>, %35, %cst_15 [1] : vector<16x16xf32> to vector<16xf32>
    %37 = vector.shape_cast %36 : vector<16xf32> to vector<16x1xf32>
    %38 = vector.broadcast %37 : vector<16x1xf32> to vector<16x16xf32>
    %39 = arith.subf %35, %38 : vector<16x16xf32>
    %40 = math.exp %39 : vector<16x16xf32>
    %cst_16 = arith.constant dense<0.000000e+00> : vector<16xf32>
    %41 = vector.multi_reduction <add>, %40, %cst_16 [1] : vector<16x16xf32> to vector<16xf32>
    %42 = vector.shape_cast %41 : vector<16xf32> to vector<16x1xf32>
    %43 = tpu.reciprocal %42 {approx = true} : vector<16x1xf32> -> vector<16x1xf32>
    %44 = vector.broadcast %43 : vector<16x1xf32> to vector<16x16xf32>
    %45 = arith.mulf %40, %44 : vector<16x16xf32>
    %cst_17 = arith.constant dense<0.000000e+00> : vector<16x16xf32>
    %46 = tpu.matmul %45, %11, %cst_17 {dimension_numbers = #tpu.dot_dimension_numbers<[1], [0], [0], [1], [0, 0, 1, 1], [], []>} : vector<16x16xf32>, vector<16x16xf32>, vector<16x16xf32> -> vector<16x16xf32>
    %47 = vector.extract_strided_slice %8 {offsets = [0, 16], sizes = [16, 16], strides = [1, 1]} : vector<16x96xf32> to vector<16x16xf32>
    %48 = vector.extract_strided_slice %8 {offsets = [0, 48], sizes = [16, 16], strides = [1, 1]} : vector<16x96xf32> to vector<16x16xf32>
    %49 = vector.extract_strided_slice %8 {offsets = [0, 80], sizes = [16, 16], strides = [1, 1]} : vector<16x96xf32> to vector<16x16xf32>
    %50 = arith.mulf %47, %47 : vector<16x16xf32>
    %cst_18 = arith.constant dense<0.000000e+00> : vector<16xf32>
    %51 = vector.multi_reduction <add>, %50, %cst_18 [1] : vector<16x16xf32> to vector<16xf32>
    %52 = vector.shape_cast %51 : vector<16xf32> to vector<16x1xf32>
    %cst_19 = arith.constant 9.99999996E-13 : f32
    %53 = vector.broadcast %cst_19 : f32 to vector<16x1xf32>
    %54 = arith.addf %52, %53 : vector<16x1xf32>
    %55 = math.rsqrt %54 : vector<16x1xf32>
    %56 = vector.broadcast %55 : vector<16x1xf32> to vector<16x16xf32>
    %57 = arith.mulf %47, %56 : vector<16x16xf32>
    %58 = arith.mulf %48, %48 : vector<16x16xf32>
    %cst_20 = arith.constant dense<0.000000e+00> : vector<16xf32>
    %59 = vector.multi_reduction <add>, %58, %cst_20 [1] : vector<16x16xf32> to vector<16xf32>
    %60 = vector.shape_cast %59 : vector<16xf32> to vector<16x1xf32>
    %cst_21 = arith.constant 9.99999996E-13 : f32
    %61 = vector.broadcast %cst_21 : f32 to vector<16x1xf32>
    %62 = arith.addf %60, %61 : vector<16x1xf32>
    %63 = math.rsqrt %62 : vector<16x1xf32>
    %64 = vector.broadcast %63 : vector<16x1xf32> to vector<16x16xf32>
    %65 = arith.mulf %48, %64 : vector<16x16xf32>
    %66 = tpu.transpose %65, [1, 0] : vector<16x16xf32> -> vector<16x16xf32>
    %cst_22 = arith.constant dense<0.000000e+00> : vector<16x16xf32>
    %67 = tpu.matmul %57, %66, %cst_22 {dimension_numbers = #tpu.dot_dimension_numbers<[1], [0], [0], [1], [0, 0, 1, 1], [], []>} : vector<16x16xf32>, vector<16x16xf32>, vector<16x16xf32> -> vector<16x16xf32>
    %c1 = arith.constant 1 : index
    %68 = memref.load %arg7[%c1] : memref<2xf32, #tpu.memory_space<smem>>
    %69 = vector.broadcast %68 : f32 to vector<16x16xf32>
    %70 = arith.mulf %67, %69 : vector<16x16xf32>
    %c1_23 = arith.constant 1 : index
    %c0_24 = arith.constant 0 : index
    %c0_25 = arith.constant 0 : index
    %71 = vector.load %arg6[%c1_23, %c0_24, %c0_25] : memref<2x16x16xf32, #tpu.memory_space<vmem>>, vector<1x16x16xf32>
    %72 = vector.shape_cast %71 : vector<1x16x16xf32> to vector<16x16xf32>
    %73 = arith.addf %70, %72 : vector<16x16xf32>
    %cst_26 = arith.constant dense<0xFF800000> : vector<16xf32>
    %74 = vector.multi_reduction <maximumf>, %73, %cst_26 [1] : vector<16x16xf32> to vector<16xf32>
    %75 = vector.shape_cast %74 : vector<16xf32> to vector<16x1xf32>
    %76 = vector.broadcast %75 : vector<16x1xf32> to vector<16x16xf32>
    %77 = arith.subf %73, %76 : vector<16x16xf32>
    %78 = math.exp %77 : vector<16x16xf32>
    %cst_27 = arith.constant dense<0.000000e+00> : vector<16xf32>
    %79 = vector.multi_reduction <add>, %78, %cst_27 [1] : vector<16x16xf32> to vector<16xf32>
    %80 = vector.shape_cast %79 : vector<16xf32> to vector<16x1xf32>
    %81 = tpu.reciprocal %80 {approx = true} : vector<16x1xf32> -> vector<16x1xf32>
    %82 = vector.broadcast %81 : vector<16x1xf32> to vector<16x16xf32>
    %83 = arith.mulf %78, %82 : vector<16x16xf32>
    %cst_28 = arith.constant dense<0.000000e+00> : vector<16x16xf32>
    %84 = tpu.matmul %83, %49, %cst_28 {dimension_numbers = #tpu.dot_dimension_numbers<[1], [0], [0], [1], [0, 0, 1, 1], [], []>} : vector<16x16xf32>, vector<16x16xf32>, vector<16x16xf32> -> vector<16x16xf32>
    %85 = tpu.concatenate %46, %84 in 1 : vector<16x16xf32>, vector<16x16xf32> -> vector<16x32xf32>
    %c0_29 = arith.constant 0 : index
    %c0_30 = arith.constant 0 : index
    %86 = vector.load %arg4[%c0_29, %c0_30] : memref<32x32xf32, #tpu.memory_space<vmem>>, vector<32x32xf32>
    %87 = arith.truncf %85 : vector<16x32xf32> to vector<16x32xbf16>
    %88 = arith.truncf %86 : vector<32x32xf32> to vector<32x32xbf16>
    %cst_31 = arith.constant dense<0.000000e+00> : vector<16x32xf32>
    %89 = tpu.matmul %87, %88, %cst_31 {dimension_numbers = #tpu.dot_dimension_numbers<[1], [0], [0], [1], [0, 0, 1, 1], [], []>} : vector<16x32xbf16>, vector<32x32xbf16>, vector<16x32xf32> -> vector<16x32xf32>
    %c0_32 = arith.constant 0 : index
    %c0_33 = arith.constant 0 : index
    %90 = vector.load %arg5[%c0_32, %c0_33] : memref<1x32xf32, #tpu.memory_space<vmem>>, vector<1x32xf32>
    %91 = vector.broadcast %90 : vector<1x32xf32> to vector<16x32xf32>
    %92 = arith.addf %89, %91 : vector<16x32xf32>
    %c0_34 = arith.constant 0 : index
    %c0_35 = arith.constant 0 : index
    %93 = vector.load %arg8[%c0_34, %c0_35] : memref<1x32xf32, #tpu.memory_space<vmem>>, vector<1x32xf32>
    %c0_36 = arith.constant 0 : index
    %c0_37 = arith.constant 0 : index
    %94 = vector.load %arg9[%c0_36, %c0_37] : memref<1x32xf32, #tpu.memory_space<vmem>>, vector<1x32xf32>
    %cst_38 = arith.constant dense<0.000000e+00> : vector<16xf32>
    %95 = vector.multi_reduction <add>, %92, %cst_38 [1] : vector<16x32xf32> to vector<16xf32>
    %96 = vector.shape_cast %95 : vector<16xf32> to vector<16x1xf32>
    %cst_39 = arith.constant 3.200000e+01 : f32
    %97 = vector.broadcast %cst_39 : f32 to vector<16x1xf32>
    %98 = arith.divf %96, %97 : vector<16x1xf32>
    %99 = vector.broadcast %98 : vector<16x1xf32> to vector<16x32xf32>
    %100 = arith.subf %92, %99 : vector<16x32xf32>
    %101 = arith.mulf %100, %100 : vector<16x32xf32>
    %cst_40 = arith.constant dense<0.000000e+00> : vector<16xf32>
    %102 = vector.multi_reduction <add>, %101, %cst_40 [1] : vector<16x32xf32> to vector<16xf32>
    %103 = vector.shape_cast %102 : vector<16xf32> to vector<16x1xf32>
    %cst_41 = arith.constant 3.200000e+01 : f32
    %104 = vector.broadcast %cst_41 : f32 to vector<16x1xf32>
    %105 = arith.divf %103, %104 : vector<16x1xf32>
    %106 = vector.broadcast %98 : vector<16x1xf32> to vector<16x32xf32>
    %107 = arith.subf %92, %106 : vector<16x32xf32>
    %cst_42 = arith.constant 9.99999974E-6 : f32
    %108 = vector.broadcast %cst_42 : f32 to vector<16x1xf32>
    %109 = arith.addf %105, %108 : vector<16x1xf32>
    %110 = math.rsqrt %109 : vector<16x1xf32>
    %111 = vector.broadcast %110 : vector<16x1xf32> to vector<16x32xf32>
    %112 = arith.mulf %107, %111 : vector<16x32xf32>
    %113 = vector.broadcast %93 : vector<1x32xf32> to vector<16x32xf32>
    %114 = arith.mulf %112, %113 : vector<16x32xf32>
    %115 = vector.broadcast %94 : vector<1x32xf32> to vector<16x32xf32>
    %116 = arith.addf %114, %115 : vector<16x32xf32>
    %117 = arith.addf %1, %116 : vector<16x32xf32>
    %c0_43 = arith.constant 0 : index
    %c0_44 = arith.constant 0 : index
    %c0_45 = arith.constant 0 : index
    %118 = vector.load %arg10[%c0_43, %c0_44, %c0_45] : memref<1x16x32xf32, #tpu.memory_space<vmem>>, vector<1x16x32xf32>
    %119 = vector.shape_cast %118 : vector<1x16x32xf32> to vector<16x32xf32>
    %120 = vector.shape_cast %117 : vector<16x32xf32> to vector<1x16x32xf32>
    tpu.vector_store %arg10[%c0_43, %c0_44, %c0_45], %120 {strides = array<i32>} : memref<1x16x32xf32, #tpu.memory_space<vmem>>, vector<1x16x32xf32>,
    return
  }
  func.func @transform_0(%arg0: i32) -> (i32, i32, i32) {
    %c0_i32 = arith.constant 0 : i32
    %c0_i32_0 = arith.constant 0 : i32
    %c0_i32_1 = arith.constant 0 : i32
    return %arg0, %c0_i32, %c0_i32_0 : i32, i32, i32
  }
  func.func @transform_1(%arg0: i32) -> (i32, i32) {
    %c0_i32 = arith.constant 0 : i32
    %c0_i32_0 = arith.constant 0 : i32
    %c0_i32_1 = arith.constant 0 : i32
    return %c0_i32, %c0_i32_0 : i32, i32
  }
  func.func @transform_2(%arg0: i32) -> (i32, i32) {
    %c0_i32 = arith.constant 0 : i32
    %c0_i32_0 = arith.constant 0 : i32
    %c0_i32_1 = arith.constant 0 : i32
    return %c0_i32, %c0_i32_0 : i32, i32
  }
  func.func @transform_3(%arg0: i32) -> (i32, i32) {
    %c0_i32 = arith.constant 0 : i32
    %c0_i32_0 = arith.constant 0 : i32
    %c0_i32_1 = arith.constant 0 : i32
    return %c0_i32, %c0_i32_0 : i32, i32
  }
  func.func @transform_4(%arg0: i32) -> (i32, i32) {
    %c0_i32 = arith.constant 0 : i32
    %c0_i32_0 = arith.constant 0 : i32
    %c0_i32_1 = arith.constant 0 : i32
    return %c0_i32, %c0_i32_0 : i32, i32
  }
  func.func @transform_5(%arg0: i32) -> (i32, i32, i32) {
    %c0_i32 = arith.constant 0 : i32
    %c0_i32_0 = arith.constant 0 : i32
    %c0_i32_1 = arith.constant 0 : i32
    %c0_i32_2 = arith.constant 0 : i32
    return %c0_i32, %c0_i32_0, %c0_i32_1 : i32, i32, i32
  }
  func.func @transform_6(%arg0: i32) -> i32 {
    %c0_i32 = arith.constant 0 : i32
    %c0_i32_0 = arith.constant 0 : i32
    return %c0_i32 : i32
  }
  func.func @transform_7(%arg0: i32) -> (i32, i32) {
    %c0_i32 = arith.constant 0 : i32
    %c0_i32_0 = arith.constant 0 : i32
    %c0_i32_1 = arith.constant 0 : i32
    return %c0_i32, %c0_i32_0 : i32, i32
  }
  func.func @transform_8(%arg0: i32) -> (i32, i32) {
    %c0_i32 = arith.constant 0 : i32
    %c0_i32_0 = arith.constant 0 : i32
    %c0_i32_1 = arith.constant 0 : i32
    return %c0_i32, %c0_i32_0 : i32, i32
  }
  func.func @transform_9(%arg0: i32) -> (i32, i32, i32) {
    %c0_i32 = arith.constant 0 : i32
    %c0_i32_0 = arith.constant 0 : i32
    %c0_i32_1 = arith.constant 0 : i32
    return %arg0, %c0_i32, %c0_i32_0 : i32, i32, i32
  }
}

module attributes {stable_mosaic.version = 11 : i64} {
  func.func @kernel(%arg0: i32, %arg1: memref<1x16x32xf32, #tpu.memory_space<vmem>>, %arg2: memref<32x96xf32, #tpu.memory_space<vmem>>, %arg3: memref<1x96xf32, #tpu.memory_space<vmem>>, %arg4: memref<32x32xf32, #tpu.memory_space<vmem>>, %arg5: memref<1x32xf32, #tpu.memory_space<vmem>>, %arg6: memref<2x16x16xf32, #tpu.memory_space<vmem>>, %arg7: memref<1x16x16xf32, #tpu.memory_space<vmem>>, %arg8: memref<2xf32, #tpu.memory_space<smem>>, %arg9: memref<1x32xf32, #tpu.memory_space<vmem>>, %arg10: memref<1x32xf32, #tpu.memory_space<vmem>>, %arg11: memref<1x16x32xf32, #tpu.memory_space<vmem>>) attributes {dimension_semantics = [#tpu.dimension_semantics<parallel>], iteration_bounds = array<i64: 8>, scalar_prefetch = 0 : i64, scratch_operands = 0 : i64, tpu.core_type = #tpu.core_type<tc>, window_params = [{transform_indices = @transform_0, window_bounds = array<i64: 1, 16, 32>}, {pipeline_mode = #tpu.pipeline_mode<synchronous>, transform_indices = @transform_1, window_bounds = array<i64: 32, 96>}, {pipeline_mode = #tpu.pipeline_mode<synchronous>, transform_indices = @transform_2, window_bounds = array<i64: 1, 96>}, {pipeline_mode = #tpu.pipeline_mode<synchronous>, transform_indices = @transform_3, window_bounds = array<i64: 32, 32>}, {pipeline_mode = #tpu.pipeline_mode<synchronous>, transform_indices = @transform_4, window_bounds = array<i64: 1, 32>}, {pipeline_mode = #tpu.pipeline_mode<synchronous>, transform_indices = @transform_5, window_bounds = array<i64: 2, 16, 16>}, {transform_indices = @transform_6, window_bounds = array<i64: 1, 16, 16>}, {transform_indices = @transform_7, window_bounds = array<i64: 2>}, {pipeline_mode = #tpu.pipeline_mode<synchronous>, transform_indices = @transform_8, window_bounds = array<i64: 1, 32>}, {pipeline_mode = #tpu.pipeline_mode<synchronous>, transform_indices = @transform_9, window_bounds = array<i64: 1, 32>}, {transform_indices = @transform_10, window_bounds = array<i64: 1, 16, 32>}]} {
    %c0 = arith.constant 0 : index
    %c0_0 = arith.constant 0 : index
    %c0_1 = arith.constant 0 : index
    %0 = vector.load %arg1[%c0, %c0_0, %c0_1] : memref<1x16x32xf32, #tpu.memory_space<vmem>>, vector<1x16x32xf32>
    %1 = vector.shape_cast %0 : vector<1x16x32xf32> to vector<16x32xf32>
    %c0_2 = arith.constant 0 : index
    %c0_3 = arith.constant 0 : index
    %2 = vector.load %arg2[%c0_2, %c0_3] : memref<32x96xf32, #tpu.memory_space<vmem>>, vector<32x96xf32>
    %3 = arith.truncf %1 : vector<16x32xf32> to vector<16x32xbf16>
    %4 = arith.truncf %2 : vector<32x96xf32> to vector<32x96xbf16>
    %cst = arith.constant dense<0.000000e+00> : vector<16x96xf32>
    %5 = tpu.matmul %3, %4, %cst {dimension_numbers = #tpu.dot_dimension_numbers<[1], [0], [0], [1], [0, 0, 1, 1], [], []>} : vector<16x32xbf16>, vector<32x96xbf16>, vector<16x96xf32> -> vector<16x96xf32>
    %c0_4 = arith.constant 0 : index
    %c0_5 = arith.constant 0 : index
    %6 = vector.load %arg3[%c0_4, %c0_5] : memref<1x96xf32, #tpu.memory_space<vmem>>, vector<1x96xf32>
    %7 = vector.broadcast %6 : vector<1x96xf32> to vector<16x96xf32>
    %8 = arith.addf %5, %7 : vector<16x96xf32>
    %c0_6 = arith.constant 0 : index
    %c0_7 = arith.constant 0 : index
    %c0_8 = arith.constant 0 : index
    %9 = vector.load %arg7[%c0_6, %c0_7, %c0_8] : memref<1x16x16xf32, #tpu.memory_space<vmem>>, vector<1x16x16xf32>
    %10 = vector.shape_cast %9 : vector<1x16x16xf32> to vector<16x16xf32>
    %11 = vector.extract_strided_slice %8 {offsets = [0, 0], sizes = [16, 16], strides = [1, 1]} : vector<16x96xf32> to vector<16x16xf32>
    %12 = vector.extract_strided_slice %8 {offsets = [0, 32], sizes = [16, 16], strides = [1, 1]} : vector<16x96xf32> to vector<16x16xf32>
    %13 = vector.extract_strided_slice %8 {offsets = [0, 64], sizes = [16, 16], strides = [1, 1]} : vector<16x96xf32> to vector<16x16xf32>
    %14 = arith.mulf %11, %11 : vector<16x16xf32>
    %cst_9 = arith.constant dense<0.000000e+00> : vector<16xf32>
    %15 = vector.multi_reduction <add>, %14, %cst_9 [1] : vector<16x16xf32> to vector<16xf32>
    %16 = vector.shape_cast %15 : vector<16xf32> to vector<16x1xf32>
    %cst_10 = arith.constant 9.99999996E-13 : f32
    %17 = vector.broadcast %cst_10 : f32 to vector<16x1xf32>
    %18 = arith.addf %16, %17 : vector<16x1xf32>
    %19 = math.rsqrt %18 : vector<16x1xf32>
    %20 = vector.broadcast %19 : vector<16x1xf32> to vector<16x16xf32>
    %21 = arith.mulf %11, %20 : vector<16x16xf32>
    %22 = arith.mulf %12, %12 : vector<16x16xf32>
    %cst_11 = arith.constant dense<0.000000e+00> : vector<16xf32>
    %23 = vector.multi_reduction <add>, %22, %cst_11 [1] : vector<16x16xf32> to vector<16xf32>
    %24 = vector.shape_cast %23 : vector<16xf32> to vector<16x1xf32>
    %cst_12 = arith.constant 9.99999996E-13 : f32
    %25 = vector.broadcast %cst_12 : f32 to vector<16x1xf32>
    %26 = arith.addf %24, %25 : vector<16x1xf32>
    %27 = math.rsqrt %26 : vector<16x1xf32>
    %28 = vector.broadcast %27 : vector<16x1xf32> to vector<16x16xf32>
    %29 = arith.mulf %12, %28 : vector<16x16xf32>
    %30 = tpu.transpose %29, [1, 0] : vector<16x16xf32> -> vector<16x16xf32>
    %cst_13 = arith.constant dense<0.000000e+00> : vector<16x16xf32>
    %31 = tpu.matmul %21, %30, %cst_13 {dimension_numbers = #tpu.dot_dimension_numbers<[1], [0], [0], [1], [0, 0, 1, 1], [], []>} : vector<16x16xf32>, vector<16x16xf32>, vector<16x16xf32> -> vector<16x16xf32>
    %c0_14 = arith.constant 0 : index
    %32 = memref.load %arg8[%c0_14] : memref<2xf32, #tpu.memory_space<smem>>
    %33 = vector.broadcast %32 : f32 to vector<16x16xf32>
    %34 = arith.mulf %31, %33 : vector<16x16xf32>
    %c0_15 = arith.constant 0 : index
    %c0_16 = arith.constant 0 : index
    %c0_17 = arith.constant 0 : index
    %35 = vector.load %arg6[%c0_15, %c0_16, %c0_17] : memref<2x16x16xf32, #tpu.memory_space<vmem>>, vector<1x16x16xf32>
    %36 = vector.shape_cast %35 : vector<1x16x16xf32> to vector<16x16xf32>
    %37 = arith.addf %34, %36 : vector<16x16xf32>
    %38 = arith.addf %37, %10 : vector<16x16xf32>
    %cst_18 = arith.constant dense<0xFF800000> : vector<16xf32>
    %39 = vector.multi_reduction <maximumf>, %38, %cst_18 [1] : vector<16x16xf32> to vector<16xf32>
    %40 = vector.shape_cast %39 : vector<16xf32> to vector<16x1xf32>
    %41 = vector.broadcast %40 : vector<16x1xf32> to vector<16x16xf32>
    %42 = arith.subf %38, %41 : vector<16x16xf32>
    %43 = math.exp %42 : vector<16x16xf32>
    %cst_19 = arith.constant dense<0.000000e+00> : vector<16xf32>
    %44 = vector.multi_reduction <add>, %43, %cst_19 [1] : vector<16x16xf32> to vector<16xf32>
    %45 = vector.shape_cast %44 : vector<16xf32> to vector<16x1xf32>
    %46 = tpu.reciprocal %45 {approx = true} : vector<16x1xf32> -> vector<16x1xf32>
    %47 = vector.broadcast %46 : vector<16x1xf32> to vector<16x16xf32>
    %48 = arith.mulf %43, %47 : vector<16x16xf32>
    %cst_20 = arith.constant dense<0.000000e+00> : vector<16x16xf32>
    %49 = tpu.matmul %48, %13, %cst_20 {dimension_numbers = #tpu.dot_dimension_numbers<[1], [0], [0], [1], [0, 0, 1, 1], [], []>} : vector<16x16xf32>, vector<16x16xf32>, vector<16x16xf32> -> vector<16x16xf32>
    %50 = vector.extract_strided_slice %8 {offsets = [0, 16], sizes = [16, 16], strides = [1, 1]} : vector<16x96xf32> to vector<16x16xf32>
    %51 = vector.extract_strided_slice %8 {offsets = [0, 48], sizes = [16, 16], strides = [1, 1]} : vector<16x96xf32> to vector<16x16xf32>
    %52 = vector.extract_strided_slice %8 {offsets = [0, 80], sizes = [16, 16], strides = [1, 1]} : vector<16x96xf32> to vector<16x16xf32>
    %53 = arith.mulf %50, %50 : vector<16x16xf32>
    %cst_21 = arith.constant dense<0.000000e+00> : vector<16xf32>
    %54 = vector.multi_reduction <add>, %53, %cst_21 [1] : vector<16x16xf32> to vector<16xf32>
    %55 = vector.shape_cast %54 : vector<16xf32> to vector<16x1xf32>
    %cst_22 = arith.constant 9.99999996E-13 : f32
    %56 = vector.broadcast %cst_22 : f32 to vector<16x1xf32>
    %57 = arith.addf %55, %56 : vector<16x1xf32>
    %58 = math.rsqrt %57 : vector<16x1xf32>
    %59 = vector.broadcast %58 : vector<16x1xf32> to vector<16x16xf32>
    %60 = arith.mulf %50, %59 : vector<16x16xf32>
    %61 = arith.mulf %51, %51 : vector<16x16xf32>
    %cst_23 = arith.constant dense<0.000000e+00> : vector<16xf32>
    %62 = vector.multi_reduction <add>, %61, %cst_23 [1] : vector<16x16xf32> to vector<16xf32>
    %63 = vector.shape_cast %62 : vector<16xf32> to vector<16x1xf32>
    %cst_24 = arith.constant 9.99999996E-13 : f32
    %64 = vector.broadcast %cst_24 : f32 to vector<16x1xf32>
    %65 = arith.addf %63, %64 : vector<16x1xf32>
    %66 = math.rsqrt %65 : vector<16x1xf32>
    %67 = vector.broadcast %66 : vector<16x1xf32> to vector<16x16xf32>
    %68 = arith.mulf %51, %67 : vector<16x16xf32>
    %69 = tpu.transpose %68, [1, 0] : vector<16x16xf32> -> vector<16x16xf32>
    %cst_25 = arith.constant dense<0.000000e+00> : vector<16x16xf32>
    %70 = tpu.matmul %60, %69, %cst_25 {dimension_numbers = #tpu.dot_dimension_numbers<[1], [0], [0], [1], [0, 0, 1, 1], [], []>} : vector<16x16xf32>, vector<16x16xf32>, vector<16x16xf32> -> vector<16x16xf32>
    %c1 = arith.constant 1 : index
    %71 = memref.load %arg8[%c1] : memref<2xf32, #tpu.memory_space<smem>>
    %72 = vector.broadcast %71 : f32 to vector<16x16xf32>
    %73 = arith.mulf %70, %72 : vector<16x16xf32>
    %c1_26 = arith.constant 1 : index
    %c0_27 = arith.constant 0 : index
    %c0_28 = arith.constant 0 : index
    %74 = vector.load %arg6[%c1_26, %c0_27, %c0_28] : memref<2x16x16xf32, #tpu.memory_space<vmem>>, vector<1x16x16xf32>
    %75 = vector.shape_cast %74 : vector<1x16x16xf32> to vector<16x16xf32>
    %76 = arith.addf %73, %75 : vector<16x16xf32>
    %77 = arith.addf %76, %10 : vector<16x16xf32>
    %cst_29 = arith.constant dense<0xFF800000> : vector<16xf32>
    %78 = vector.multi_reduction <maximumf>, %77, %cst_29 [1] : vector<16x16xf32> to vector<16xf32>
    %79 = vector.shape_cast %78 : vector<16xf32> to vector<16x1xf32>
    %80 = vector.broadcast %79 : vector<16x1xf32> to vector<16x16xf32>
    %81 = arith.subf %77, %80 : vector<16x16xf32>
    %82 = math.exp %81 : vector<16x16xf32>
    %cst_30 = arith.constant dense<0.000000e+00> : vector<16xf32>
    %83 = vector.multi_reduction <add>, %82, %cst_30 [1] : vector<16x16xf32> to vector<16xf32>
    %84 = vector.shape_cast %83 : vector<16xf32> to vector<16x1xf32>
    %85 = tpu.reciprocal %84 {approx = true} : vector<16x1xf32> -> vector<16x1xf32>
    %86 = vector.broadcast %85 : vector<16x1xf32> to vector<16x16xf32>
    %87 = arith.mulf %82, %86 : vector<16x16xf32>
    %cst_31 = arith.constant dense<0.000000e+00> : vector<16x16xf32>
    %88 = tpu.matmul %87, %52, %cst_31 {dimension_numbers = #tpu.dot_dimension_numbers<[1], [0], [0], [1], [0, 0, 1, 1], [], []>} : vector<16x16xf32>, vector<16x16xf32>, vector<16x16xf32> -> vector<16x16xf32>
    %89 = tpu.concatenate %49, %88 in 1 : vector<16x16xf32>, vector<16x16xf32> -> vector<16x32xf32>
    %c0_32 = arith.constant 0 : index
    %c0_33 = arith.constant 0 : index
    %90 = vector.load %arg4[%c0_32, %c0_33] : memref<32x32xf32, #tpu.memory_space<vmem>>, vector<32x32xf32>
    %91 = arith.truncf %89 : vector<16x32xf32> to vector<16x32xbf16>
    %92 = arith.truncf %90 : vector<32x32xf32> to vector<32x32xbf16>
    %cst_34 = arith.constant dense<0.000000e+00> : vector<16x32xf32>
    %93 = tpu.matmul %91, %92, %cst_34 {dimension_numbers = #tpu.dot_dimension_numbers<[1], [0], [0], [1], [0, 0, 1, 1], [], []>} : vector<16x32xbf16>, vector<32x32xbf16>, vector<16x32xf32> -> vector<16x32xf32>
    %c0_35 = arith.constant 0 : index
    %c0_36 = arith.constant 0 : index
    %94 = vector.load %arg5[%c0_35, %c0_36] : memref<1x32xf32, #tpu.memory_space<vmem>>, vector<1x32xf32>
    %95 = vector.broadcast %94 : vector<1x32xf32> to vector<16x32xf32>
    %96 = arith.addf %93, %95 : vector<16x32xf32>
    %c0_37 = arith.constant 0 : index
    %c0_38 = arith.constant 0 : index
    %97 = vector.load %arg9[%c0_37, %c0_38] : memref<1x32xf32, #tpu.memory_space<vmem>>, vector<1x32xf32>
    %c0_39 = arith.constant 0 : index
    %c0_40 = arith.constant 0 : index
    %98 = vector.load %arg10[%c0_39, %c0_40] : memref<1x32xf32, #tpu.memory_space<vmem>>, vector<1x32xf32>
    %cst_41 = arith.constant dense<0.000000e+00> : vector<16xf32>
    %99 = vector.multi_reduction <add>, %96, %cst_41 [1] : vector<16x32xf32> to vector<16xf32>
    %100 = vector.shape_cast %99 : vector<16xf32> to vector<16x1xf32>
    %cst_42 = arith.constant 3.200000e+01 : f32
    %101 = vector.broadcast %cst_42 : f32 to vector<16x1xf32>
    %102 = arith.divf %100, %101 : vector<16x1xf32>
    %103 = vector.broadcast %102 : vector<16x1xf32> to vector<16x32xf32>
    %104 = arith.subf %96, %103 : vector<16x32xf32>
    %105 = arith.mulf %104, %104 : vector<16x32xf32>
    %cst_43 = arith.constant dense<0.000000e+00> : vector<16xf32>
    %106 = vector.multi_reduction <add>, %105, %cst_43 [1] : vector<16x32xf32> to vector<16xf32>
    %107 = vector.shape_cast %106 : vector<16xf32> to vector<16x1xf32>
    %cst_44 = arith.constant 3.200000e+01 : f32
    %108 = vector.broadcast %cst_44 : f32 to vector<16x1xf32>
    %109 = arith.divf %107, %108 : vector<16x1xf32>
    %110 = vector.broadcast %102 : vector<16x1xf32> to vector<16x32xf32>
    %111 = arith.subf %96, %110 : vector<16x32xf32>
    %cst_45 = arith.constant 9.99999974E-6 : f32
    %112 = vector.broadcast %cst_45 : f32 to vector<16x1xf32>
    %113 = arith.addf %109, %112 : vector<16x1xf32>
    %114 = math.rsqrt %113 : vector<16x1xf32>
    %115 = vector.broadcast %114 : vector<16x1xf32> to vector<16x32xf32>
    %116 = arith.mulf %111, %115 : vector<16x32xf32>
    %117 = vector.broadcast %97 : vector<1x32xf32> to vector<16x32xf32>
    %118 = arith.mulf %116, %117 : vector<16x32xf32>
    %119 = vector.broadcast %98 : vector<1x32xf32> to vector<16x32xf32>
    %120 = arith.addf %118, %119 : vector<16x32xf32>
    %121 = arith.addf %1, %120 : vector<16x32xf32>
    %c0_46 = arith.constant 0 : index
    %c0_47 = arith.constant 0 : index
    %c0_48 = arith.constant 0 : index
    %122 = vector.load %arg11[%c0_46, %c0_47, %c0_48] : memref<1x16x32xf32, #tpu.memory_space<vmem>>, vector<1x16x32xf32>
    %123 = vector.shape_cast %122 : vector<1x16x32xf32> to vector<16x32xf32>
    %124 = vector.shape_cast %121 : vector<16x32xf32> to vector<1x16x32xf32>
    tpu.vector_store %arg11[%c0_46, %c0_47, %c0_48], %124 {strides = array<i32>} : memref<1x16x32xf32, #tpu.memory_space<vmem>>, vector<1x16x32xf32>,
    return
  }
  func.func @transform_0(%arg0: i32) -> (i32, i32, i32) {
    %c0_i32 = arith.constant 0 : i32
    %c0_i32_0 = arith.constant 0 : i32
    %c0_i32_1 = arith.constant 0 : i32
    return %arg0, %c0_i32, %c0_i32_0 : i32, i32, i32
  }
  func.func @transform_1(%arg0: i32) -> (i32, i32) {
    %c0_i32 = arith.constant 0 : i32
    %c0_i32_0 = arith.constant 0 : i32
    %c0_i32_1 = arith.constant 0 : i32
    return %c0_i32, %c0_i32_0 : i32, i32
  }
  func.func @transform_2(%arg0: i32) -> (i32, i32) {
    %c0_i32 = arith.constant 0 : i32
    %c0_i32_0 = arith.constant 0 : i32
    %c0_i32_1 = arith.constant 0 : i32
    return %c0_i32, %c0_i32_0 : i32, i32
  }
  func.func @transform_3(%arg0: i32) -> (i32, i32) {
    %c0_i32 = arith.constant 0 : i32
    %c0_i32_0 = arith.constant 0 : i32
    %c0_i32_1 = arith.constant 0 : i32
    return %c0_i32, %c0_i32_0 : i32, i32
  }
  func.func @transform_4(%arg0: i32) -> (i32, i32) {
    %c0_i32 = arith.constant 0 : i32
    %c0_i32_0 = arith.constant 0 : i32
    %c0_i32_1 = arith.constant 0 : i32
    return %c0_i32, %c0_i32_0 : i32, i32
  }
  func.func @transform_5(%arg0: i32) -> (i32, i32, i32) {
    %c0_i32 = arith.constant 0 : i32
    %c0_i32_0 = arith.constant 0 : i32
    %c0_i32_1 = arith.constant 0 : i32
    %c0_i32_2 = arith.constant 0 : i32
    return %c0_i32, %c0_i32_0, %c0_i32_1 : i32, i32, i32
  }
  func.func @transform_6(%arg0: i32) -> (i32, i32, i32) {
    %c4_i32 = arith.constant 4 : i32
    %c0_i32 = arith.constant 0 : i32
    %0 = arith.cmpi eq, %c4_i32, %c0_i32 : i32
    %c1_i32 = arith.constant 1 : i32
    %1 = arith.select %0, %c1_i32, %c4_i32 : i32
    %2 = arith.remsi %arg0, %1 : i32
    %c0_i32_0 = arith.constant 0 : i32
    %3 = arith.cmpi ne, %2, %c0_i32_0 : i32
    %c0_i32_1 = arith.constant 0 : i32
    %4 = arith.cmpi slt, %2, %c0_i32_1 : i32
    %c0_i32_2 = arith.constant 0 : i32
    %5 = arith.cmpi slt, %1, %c0_i32_2 : i32
    %6 = arith.xori %4, %5 : i1
    %7 = arith.andi %6, %3 : i1
    %8 = arith.addi %2, %1 : i32
    %9 = arith.select %7, %8, %2 : i32
    %c0_i32_3 = arith.constant 0 : i32
    %c0_i32_4 = arith.constant 0 : i32
    %c0_i32_5 = arith.constant 0 : i32
    return %9, %c0_i32_3, %c0_i32_4 : i32, i32, i32
  }
  func.func @transform_7(%arg0: i32) -> i32 {
    %c0_i32 = arith.constant 0 : i32
    %c0_i32_0 = arith.constant 0 : i32
    return %c0_i32 : i32
  }
  func.func @transform_8(%arg0: i32) -> (i32, i32) {
    %c0_i32 = arith.constant 0 : i32
    %c0_i32_0 = arith.constant 0 : i32
    %c0_i32_1 = arith.constant 0 : i32
    return %c0_i32, %c0_i32_0 : i32, i32
  }
  func.func @transform_9(%arg0: i32) -> (i32, i32) {
    %c0_i32 = arith.constant 0 : i32
    %c0_i32_0 = arith.constant 0 : i32
    %c0_i32_1 = arith.constant 0 : i32
    return %c0_i32, %c0_i32_0 : i32, i32
  }
  func.func @transform_10(%arg0: i32) -> (i32, i32, i32) {
    %c0_i32 = arith.constant 0 : i32
    %c0_i32_0 = arith.constant 0 : i32
    %c0_i32_1 = arith.constant 0 : i32
    return %arg0, %c0_i32, %c0_i32_0 : i32, i32, i32
  }
}

module attributes {stable_mosaic.version = 11 : i64} {
  func.func @_matmul_ln_kernel(%arg0: i32, %arg1: memref<32x128xf32, #tpu.memory_space<vmem>>, %arg2: memref<128x64xf32, #tpu.memory_space<vmem>>, %arg3: memref<1x64xf32, #tpu.memory_space<vmem>>, %arg4: memref<1x64xf32, #tpu.memory_space<vmem>>, %arg5: memref<1x64xf32, #tpu.memory_space<vmem>>, %arg6: memref<32x64xf32, #tpu.memory_space<vmem>>) attributes {dimension_semantics = [#tpu.dimension_semantics<arbitrary>], iteration_bounds = array<i64: 1>, scalar_prefetch = 0 : i64, scratch_operands = 0 : i64, tpu.core_type = #tpu.core_type<tc>, window_params = [{pipeline_mode = #tpu.pipeline_mode<synchronous>, transform_indices = @transform_0, window_bounds = array<i64: 32, 128>}, {pipeline_mode = #tpu.pipeline_mode<synchronous>, transform_indices = @transform_1, window_bounds = array<i64: 128, 64>}, {pipeline_mode = #tpu.pipeline_mode<synchronous>, transform_indices = @transform_2, window_bounds = array<i64: 1, 64>}, {pipeline_mode = #tpu.pipeline_mode<synchronous>, transform_indices = @transform_3, window_bounds = array<i64: 1, 64>}, {pipeline_mode = #tpu.pipeline_mode<synchronous>, transform_indices = @transform_4, window_bounds = array<i64: 1, 64>}, {pipeline_mode = #tpu.pipeline_mode<synchronous>, transform_indices = @transform_5, window_bounds = array<i64: 32, 64>}]} {
    %c0 = arith.constant 0 : index
    %c0_0 = arith.constant 0 : index
    %0 = vector.load %arg1[%c0, %c0_0] : memref<32x128xf32, #tpu.memory_space<vmem>>, vector<32x128xf32>
    %c0_1 = arith.constant 0 : index
    %c0_2 = arith.constant 0 : index
    %1 = vector.load %arg2[%c0_1, %c0_2] : memref<128x64xf32, #tpu.memory_space<vmem>>, vector<128x64xf32>
    %2 = arith.truncf %0 : vector<32x128xf32> to vector<32x128xbf16>
    %3 = arith.truncf %1 : vector<128x64xf32> to vector<128x64xbf16>
    %cst = arith.constant dense<0.000000e+00> : vector<32x64xf32>
    %4 = tpu.matmul %2, %3, %cst {dimension_numbers = #tpu.dot_dimension_numbers<[1], [0], [0], [1], [0, 0, 1, 1], [], []>} : vector<32x128xbf16>, vector<128x64xbf16>, vector<32x64xf32> -> vector<32x64xf32>
    %c0_3 = arith.constant 0 : index
    %c0_4 = arith.constant 0 : index
    %5 = vector.load %arg3[%c0_3, %c0_4] : memref<1x64xf32, #tpu.memory_space<vmem>>, vector<1x64xf32>
    %6 = vector.broadcast %5 : vector<1x64xf32> to vector<32x64xf32>
    %7 = arith.addf %4, %6 : vector<32x64xf32>
    %c0_5 = arith.constant 0 : index
    %c0_6 = arith.constant 0 : index
    %8 = vector.load %arg4[%c0_5, %c0_6] : memref<1x64xf32, #tpu.memory_space<vmem>>, vector<1x64xf32>
    %c0_7 = arith.constant 0 : index
    %c0_8 = arith.constant 0 : index
    %9 = vector.load %arg5[%c0_7, %c0_8] : memref<1x64xf32, #tpu.memory_space<vmem>>, vector<1x64xf32>
    %cst_9 = arith.constant dense<0.000000e+00> : vector<32xf32>
    %10 = vector.multi_reduction <add>, %7, %cst_9 [1] : vector<32x64xf32> to vector<32xf32>
    %11 = vector.shape_cast %10 : vector<32xf32> to vector<32x1xf32>
    %cst_10 = arith.constant 6.400000e+01 : f32
    %12 = vector.broadcast %cst_10 : f32 to vector<32x1xf32>
    %13 = arith.divf %11, %12 : vector<32x1xf32>
    %14 = vector.broadcast %13 : vector<32x1xf32> to vector<32x64xf32>
    %15 = arith.subf %7, %14 : vector<32x64xf32>
    %16 = arith.mulf %15, %15 : vector<32x64xf32>
    %cst_11 = arith.constant dense<0.000000e+00> : vector<32xf32>
    %17 = vector.multi_reduction <add>, %16, %cst_11 [1] : vector<32x64xf32> to vector<32xf32>
    %18 = vector.shape_cast %17 : vector<32xf32> to vector<32x1xf32>
    %cst_12 = arith.constant 6.400000e+01 : f32
    %19 = vector.broadcast %cst_12 : f32 to vector<32x1xf32>
    %20 = arith.divf %18, %19 : vector<32x1xf32>
    %21 = vector.broadcast %13 : vector<32x1xf32> to vector<32x64xf32>
    %22 = arith.subf %7, %21 : vector<32x64xf32>
    %cst_13 = arith.constant 9.99999974E-6 : f32
    %23 = vector.broadcast %cst_13 : f32 to vector<32x1xf32>
    %24 = arith.addf %20, %23 : vector<32x1xf32>
    %25 = math.rsqrt %24 : vector<32x1xf32>
    %26 = vector.broadcast %25 : vector<32x1xf32> to vector<32x64xf32>
    %27 = arith.mulf %22, %26 : vector<32x64xf32>
    %28 = vector.broadcast %8 : vector<1x64xf32> to vector<32x64xf32>
    %29 = arith.mulf %27, %28 : vector<32x64xf32>
    %30 = vector.broadcast %9 : vector<1x64xf32> to vector<32x64xf32>
    %31 = arith.addf %29, %30 : vector<32x64xf32>
    %c0_14 = arith.constant 0 : index
    %c0_15 = arith.constant 0 : index
    %32 = vector.load %arg6[%c0_14, %c0_15] : memref<32x64xf32, #tpu.memory_space<vmem>>, vector<32x64xf32>
    tpu.vector_store %arg6[%c0_14, %c0_15], %31 {strides = array<i32>} : memref<32x64xf32, #tpu.memory_space<vmem>>, vector<32x64xf32>,
    return
  }
  func.func @transform_0(%arg0: i32) -> (i32, i32) {
    %c0_i32 = arith.constant 0 : i32
    %c0_i32_0 = arith.constant 0 : i32
    %c0_i32_1 = arith.constant 0 : i32
    return %c0_i32, %c0_i32_0 : i32, i32
  }
  func.func @transform_1(%arg0: i32) -> (i32, i32) {
    %c0_i32 = arith.constant 0 : i32
    %c0_i32_0 = arith.constant 0 : i32
    %c0_i32_1 = arith.constant 0 : i32
    return %c0_i32, %c0_i32_0 : i32, i32
  }
  func.func @transform_2(%arg0: i32) -> (i32, i32) {
    %c0_i32 = arith.constant 0 : i32
    %c0_i32_0 = arith.constant 0 : i32
    %c0_i32_1 = arith.constant 0 : i32
    return %c0_i32, %c0_i32_0 : i32, i32
  }
  func.func @transform_3(%arg0: i32) -> (i32, i32) {
    %c0_i32 = arith.constant 0 : i32
    %c0_i32_0 = arith.constant 0 : i32
    %c0_i32_1 = arith.constant 0 : i32
    return %c0_i32, %c0_i32_0 : i32, i32
  }
  func.func @transform_4(%arg0: i32) -> (i32, i32) {
    %c0_i32 = arith.constant 0 : i32
    %c0_i32_0 = arith.constant 0 : i32
    %c0_i32_1 = arith.constant 0 : i32
    return %c0_i32, %c0_i32_0 : i32, i32
  }
  func.func @transform_5(%arg0: i32) -> (i32, i32) {
    %c0_i32 = arith.constant 0 : i32
    %c0_i32_0 = arith.constant 0 : i32
    %c0_i32_1 = arith.constant 0 : i32
    return %c0_i32, %c0_i32_0 : i32, i32
  }
}

module attributes {stable_mosaic.version = 11 : i64} {
  func.func @_mlp_kernel(%arg0: i32, %arg1: memref<32x64xf32, #tpu.memory_space<vmem>>, %arg2: memref<64x256xf32, #tpu.memory_space<vmem>>, %arg3: memref<1x256xf32, #tpu.memory_space<vmem>>, %arg4: memref<256x64xf32, #tpu.memory_space<vmem>>, %arg5: memref<1x64xf32, #tpu.memory_space<vmem>>, %arg6: memref<1x64xf32, #tpu.memory_space<vmem>>, %arg7: memref<1x64xf32, #tpu.memory_space<vmem>>, %arg8: memref<32x64xf32, #tpu.memory_space<vmem>>) attributes {dimension_semantics = [#tpu.dimension_semantics<arbitrary>], iteration_bounds = array<i64: 1>, scalar_prefetch = 0 : i64, scratch_operands = 0 : i64, tpu.core_type = #tpu.core_type<tc>, window_params = [{pipeline_mode = #tpu.pipeline_mode<synchronous>, transform_indices = @transform_0, window_bounds = array<i64: 32, 64>}, {pipeline_mode = #tpu.pipeline_mode<synchronous>, transform_indices = @transform_1, window_bounds = array<i64: 64, 256>}, {pipeline_mode = #tpu.pipeline_mode<synchronous>, transform_indices = @transform_2, window_bounds = array<i64: 1, 256>}, {pipeline_mode = #tpu.pipeline_mode<synchronous>, transform_indices = @transform_3, window_bounds = array<i64: 256, 64>}, {pipeline_mode = #tpu.pipeline_mode<synchronous>, transform_indices = @transform_4, window_bounds = array<i64: 1, 64>}, {pipeline_mode = #tpu.pipeline_mode<synchronous>, transform_indices = @transform_5, window_bounds = array<i64: 1, 64>}, {pipeline_mode = #tpu.pipeline_mode<synchronous>, transform_indices = @transform_6, window_bounds = array<i64: 1, 64>}, {pipeline_mode = #tpu.pipeline_mode<synchronous>, transform_indices = @transform_7, window_bounds = array<i64: 32, 64>}]} {
    %c0 = arith.constant 0 : index
    %c0_0 = arith.constant 0 : index
    %0 = vector.load %arg1[%c0, %c0_0] : memref<32x64xf32, #tpu.memory_space<vmem>>, vector<32x64xf32>
    %c0_1 = arith.constant 0 : index
    %c0_2 = arith.constant 0 : index
    %1 = vector.load %arg2[%c0_1, %c0_2] : memref<64x256xf32, #tpu.memory_space<vmem>>, vector<64x256xf32>
    %2 = arith.truncf %0 : vector<32x64xf32> to vector<32x64xbf16>
    %3 = arith.truncf %1 : vector<64x256xf32> to vector<64x256xbf16>
    %cst = arith.constant dense<0.000000e+00> : vector<32x256xf32>
    %4 = tpu.matmul %2, %3, %cst {dimension_numbers = #tpu.dot_dimension_numbers<[1], [0], [0], [1], [0, 0, 1, 1], [], []>} : vector<32x64xbf16>, vector<64x256xbf16>, vector<32x256xf32> -> vector<32x256xf32>
    %c0_3 = arith.constant 0 : index
    %c0_4 = arith.constant 0 : index
    %5 = vector.load %arg3[%c0_3, %c0_4] : memref<1x256xf32, #tpu.memory_space<vmem>>, vector<1x256xf32>
    %6 = vector.broadcast %5 : vector<1x256xf32> to vector<32x256xf32>
    %7 = arith.addf %4, %6 : vector<32x256xf32>
    %8 = arith.mulf %7, %7 : vector<32x256xf32>
    %9 = arith.mulf %7, %8 : vector<32x256xf32>
    %cst_5 = arith.constant 4.471500e-02 : f32
    %10 = vector.broadcast %cst_5 : f32 to vector<32x256xf32>
    %11 = arith.mulf %10, %9 : vector<32x256xf32>
    %12 = arith.addf %7, %11 : vector<32x256xf32>
    %cst_6 = arith.constant 0.797884583 : f32
    %13 = vector.broadcast %cst_6 : f32 to vector<32x256xf32>
    %14 = arith.mulf %13, %12 : vector<32x256xf32>
    %15 = math.tanh %14 : vector<32x256xf32>
    %cst_7 = arith.constant 1.000000e+00 : f32
    %16 = vector.broadcast %cst_7 : f32 to vector<32x256xf32>
    %17 = arith.addf %16, %15 : vector<32x256xf32>
    %cst_8 = arith.constant 5.000000e-01 : f32
    %18 = vector.broadcast %cst_8 : f32 to vector<32x256xf32>
    %19 = arith.mulf %18, %17 : vector<32x256xf32>
    %20 = arith.mulf %7, %19 : vector<32x256xf32>
    %c0_9 = arith.constant 0 : index
    %c0_10 = arith.constant 0 : index
    %21 = vector.load %arg4[%c0_9, %c0_10] : memref<256x64xf32, #tpu.memory_space<vmem>>, vector<256x64xf32>
    %22 = arith.truncf %20 : vector<32x256xf32> to vector<32x256xbf16>
    %23 = arith.truncf %21 : vector<256x64xf32> to vector<256x64xbf16>
    %cst_11 = arith.constant dense<0.000000e+00> : vector<32x64xf32>
    %24 = tpu.matmul %22, %23, %cst_11 {dimension_numbers = #tpu.dot_dimension_numbers<[1], [0], [0], [1], [0, 0, 1, 1], [], []>} : vector<32x256xbf16>, vector<256x64xbf16>, vector<32x64xf32> -> vector<32x64xf32>
    %c0_12 = arith.constant 0 : index
    %c0_13 = arith.constant 0 : index
    %25 = vector.load %arg5[%c0_12, %c0_13] : memref<1x64xf32, #tpu.memory_space<vmem>>, vector<1x64xf32>
    %26 = vector.broadcast %25 : vector<1x64xf32> to vector<32x64xf32>
    %27 = arith.addf %24, %26 : vector<32x64xf32>
    %c0_14 = arith.constant 0 : index
    %c0_15 = arith.constant 0 : index
    %28 = vector.load %arg6[%c0_14, %c0_15] : memref<1x64xf32, #tpu.memory_space<vmem>>, vector<1x64xf32>
    %c0_16 = arith.constant 0 : index
    %c0_17 = arith.constant 0 : index
    %29 = vector.load %arg7[%c0_16, %c0_17] : memref<1x64xf32, #tpu.memory_space<vmem>>, vector<1x64xf32>
    %cst_18 = arith.constant dense<0.000000e+00> : vector<32xf32>
    %30 = vector.multi_reduction <add>, %27, %cst_18 [1] : vector<32x64xf32> to vector<32xf32>
    %31 = vector.shape_cast %30 : vector<32xf32> to vector<32x1xf32>
    %cst_19 = arith.constant 6.400000e+01 : f32
    %32 = vector.broadcast %cst_19 : f32 to vector<32x1xf32>
    %33 = arith.divf %31, %32 : vector<32x1xf32>
    %34 = vector.broadcast %33 : vector<32x1xf32> to vector<32x64xf32>
    %35 = arith.subf %27, %34 : vector<32x64xf32>
    %36 = arith.mulf %35, %35 : vector<32x64xf32>
    %cst_20 = arith.constant dense<0.000000e+00> : vector<32xf32>
    %37 = vector.multi_reduction <add>, %36, %cst_20 [1] : vector<32x64xf32> to vector<32xf32>
    %38 = vector.shape_cast %37 : vector<32xf32> to vector<32x1xf32>
    %cst_21 = arith.constant 6.400000e+01 : f32
    %39 = vector.broadcast %cst_21 : f32 to vector<32x1xf32>
    %40 = arith.divf %38, %39 : vector<32x1xf32>
    %41 = vector.broadcast %33 : vector<32x1xf32> to vector<32x64xf32>
    %42 = arith.subf %27, %41 : vector<32x64xf32>
    %cst_22 = arith.constant 9.99999974E-6 : f32
    %43 = vector.broadcast %cst_22 : f32 to vector<32x1xf32>
    %44 = arith.addf %40, %43 : vector<32x1xf32>
    %45 = math.rsqrt %44 : vector<32x1xf32>
    %46 = vector.broadcast %45 : vector<32x1xf32> to vector<32x64xf32>
    %47 = arith.mulf %42, %46 : vector<32x64xf32>
    %48 = vector.broadcast %28 : vector<1x64xf32> to vector<32x64xf32>
    %49 = arith.mulf %47, %48 : vector<32x64xf32>
    %50 = vector.broadcast %29 : vector<1x64xf32> to vector<32x64xf32>
    %51 = arith.addf %49, %50 : vector<32x64xf32>
    %52 = arith.addf %0, %51 : vector<32x64xf32>
    %c0_23 = arith.constant 0 : index
    %c0_24 = arith.constant 0 : index
    %53 = vector.load %arg8[%c0_23, %c0_24] : memref<32x64xf32, #tpu.memory_space<vmem>>, vector<32x64xf32>
    tpu.vector_store %arg8[%c0_23, %c0_24], %52 {strides = array<i32>} : memref<32x64xf32, #tpu.memory_space<vmem>>, vector<32x64xf32>,
    return
  }
  func.func @transform_0(%arg0: i32) -> (i32, i32) {
    %c0_i32 = arith.constant 0 : i32
    %c0_i32_0 = arith.constant 0 : i32
    %c0_i32_1 = arith.constant 0 : i32
    return %c0_i32, %c0_i32_0 : i32, i32
  }
  func.func @transform_1(%arg0: i32) -> (i32, i32) {
    %c0_i32 = arith.constant 0 : i32
    %c0_i32_0 = arith.constant 0 : i32
    %c0_i32_1 = arith.constant 0 : i32
    return %c0_i32, %c0_i32_0 : i32, i32
  }
  func.func @transform_2(%arg0: i32) -> (i32, i32) {
    %c0_i32 = arith.constant 0 : i32
    %c0_i32_0 = arith.constant 0 : i32
    %c0_i32_1 = arith.constant 0 : i32
    return %c0_i32, %c0_i32_0 : i32, i32
  }
  func.func @transform_3(%arg0: i32) -> (i32, i32) {
    %c0_i32 = arith.constant 0 : i32
    %c0_i32_0 = arith.constant 0 : i32
    %c0_i32_1 = arith.constant 0 : i32
    return %c0_i32, %c0_i32_0 : i32, i32
  }
  func.func @transform_4(%arg0: i32) -> (i32, i32) {
    %c0_i32 = arith.constant 0 : i32
    %c0_i32_0 = arith.constant 0 : i32
    %c0_i32_1 = arith.constant 0 : i32
    return %c0_i32, %c0_i32_0 : i32, i32
  }
  func.func @transform_5(%arg0: i32) -> (i32, i32) {
    %c0_i32 = arith.constant 0 : i32
    %c0_i32_0 = arith.constant 0 : i32
    %c0_i32_1 = arith.constant 0 : i32
    return %c0_i32, %c0_i32_0 : i32, i32
  }
  func.func @transform_6(%arg0: i32) -> (i32, i32) {
    %c0_i32 = arith.constant 0 : i32
    %c0_i32_0 = arith.constant 0 : i32
    %c0_i32_1 = arith.constant 0 : i32
    return %c0_i32, %c0_i32_0 : i32, i32
  }
  func.func @transform_7(%arg0: i32) -> (i32, i32) {
    %c0_i32 = arith.constant 0 : i32
    %c0_i32_0 = arith.constant 0 : i32
    %c0_i32_1 = arith.constant 0 : i32
    return %c0_i32, %c0_i32_0 : i32, i32
  }
}

module attributes {stable_mosaic.version = 11 : i64} {
  func.func @kernel(%arg0: i32, %arg1: memref<1x16x64xf32, #tpu.memory_space<vmem>>, %arg2: memref<64x192xf32, #tpu.memory_space<vmem>>, %arg3: memref<1x192xf32, #tpu.memory_space<vmem>>, %arg4: memref<64x64xf32, #tpu.memory_space<vmem>>, %arg5: memref<1x64xf32, #tpu.memory_space<vmem>>, %arg6: memref<4x16x16xf32, #tpu.memory_space<vmem>>, %arg7: memref<4xf32, #tpu.memory_space<smem>>, %arg8: memref<1x64xf32, #tpu.memory_space<vmem>>, %arg9: memref<1x64xf32, #tpu.memory_space<vmem>>, %arg10: memref<1x16x64xf32, #tpu.memory_space<vmem>>) attributes {dimension_semantics = [#tpu.dimension_semantics<parallel>], iteration_bounds = array<i64: 2>, scalar_prefetch = 0 : i64, scratch_operands = 0 : i64, tpu.core_type = #tpu.core_type<tc>, window_params = [{transform_indices = @transform_0, window_bounds = array<i64: 1, 16, 64>}, {pipeline_mode = #tpu.pipeline_mode<synchronous>, transform_indices = @transform_1, window_bounds = array<i64: 64, 192>}, {pipeline_mode = #tpu.pipeline_mode<synchronous>, transform_indices = @transform_2, window_bounds = array<i64: 1, 192>}, {pipeline_mode = #tpu.pipeline_mode<synchronous>, transform_indices = @transform_3, window_bounds = array<i64: 64, 64>}, {pipeline_mode = #tpu.pipeline_mode<synchronous>, transform_indices = @transform_4, window_bounds = array<i64: 1, 64>}, {pipeline_mode = #tpu.pipeline_mode<synchronous>, transform_indices = @transform_5, window_bounds = array<i64: 4, 16, 16>}, {transform_indices = @transform_6, window_bounds = array<i64: 4>}, {pipeline_mode = #tpu.pipeline_mode<synchronous>, transform_indices = @transform_7, window_bounds = array<i64: 1, 64>}, {pipeline_mode = #tpu.pipeline_mode<synchronous>, transform_indices = @transform_8, window_bounds = array<i64: 1, 64>}, {transform_indices = @transform_9, window_bounds = array<i64: 1, 16, 64>}]} {
    %c0 = arith.constant 0 : index
    %c0_0 = arith.constant 0 : index
    %c0_1 = arith.constant 0 : index
    %0 = vector.load %arg1[%c0, %c0_0, %c0_1] : memref<1x16x64xf32, #tpu.memory_space<vmem>>, vector<1x16x64xf32>
    %1 = vector.shape_cast %0 : vector<1x16x64xf32> to vector<16x64xf32>
    %c0_2 = arith.constant 0 : index
    %c0_3 = arith.constant 0 : index
    %2 = vector.load %arg2[%c0_2, %c0_3] : memref<64x192xf32, #tpu.memory_space<vmem>>, vector<64x192xf32>
    %3 = arith.truncf %1 : vector<16x64xf32> to vector<16x64xbf16>
    %4 = arith.truncf %2 : vector<64x192xf32> to vector<64x192xbf16>
    %cst = arith.constant dense<0.000000e+00> : vector<16x192xf32>
    %5 = tpu.matmul %3, %4, %cst {dimension_numbers = #tpu.dot_dimension_numbers<[1], [0], [0], [1], [0, 0, 1, 1], [], []>} : vector<16x64xbf16>, vector<64x192xbf16>, vector<16x192xf32> -> vector<16x192xf32>
    %c0_4 = arith.constant 0 : index
    %c0_5 = arith.constant 0 : index
    %6 = vector.load %arg3[%c0_4, %c0_5] : memref<1x192xf32, #tpu.memory_space<vmem>>, vector<1x192xf32>
    %7 = vector.broadcast %6 : vector<1x192xf32> to vector<16x192xf32>
    %8 = arith.addf %5, %7 : vector<16x192xf32>
    %9 = vector.extract_strided_slice %8 {offsets = [0, 0], sizes = [16, 16], strides = [1, 1]} : vector<16x192xf32> to vector<16x16xf32>
    %10 = vector.extract_strided_slice %8 {offsets = [0, 64], sizes = [16, 16], strides = [1, 1]} : vector<16x192xf32> to vector<16x16xf32>
    %11 = vector.extract_strided_slice %8 {offsets = [0, 128], sizes = [16, 16], strides = [1, 1]} : vector<16x192xf32> to vector<16x16xf32>
    %12 = arith.mulf %9, %9 : vector<16x16xf32>
    %cst_6 = arith.constant dense<0.000000e+00> : vector<16xf32>
    %13 = vector.multi_reduction <add>, %12, %cst_6 [1] : vector<16x16xf32> to vector<16xf32>
    %14 = vector.shape_cast %13 : vector<16xf32> to vector<16x1xf32>
    %cst_7 = arith.constant 9.99999996E-13 : f32
    %15 = vector.broadcast %cst_7 : f32 to vector<16x1xf32>
    %16 = arith.addf %14, %15 : vector<16x1xf32>
    %17 = math.rsqrt %16 : vector<16x1xf32>
    %18 = vector.broadcast %17 : vector<16x1xf32> to vector<16x16xf32>
    %19 = arith.mulf %9, %18 : vector<16x16xf32>
    %20 = arith.mulf %10, %10 : vector<16x16xf32>
    %cst_8 = arith.constant dense<0.000000e+00> : vector<16xf32>
    %21 = vector.multi_reduction <add>, %20, %cst_8 [1] : vector<16x16xf32> to vector<16xf32>
    %22 = vector.shape_cast %21 : vector<16xf32> to vector<16x1xf32>
    %cst_9 = arith.constant 9.99999996E-13 : f32
    %23 = vector.broadcast %cst_9 : f32 to vector<16x1xf32>
    %24 = arith.addf %22, %23 : vector<16x1xf32>
    %25 = math.rsqrt %24 : vector<16x1xf32>
    %26 = vector.broadcast %25 : vector<16x1xf32> to vector<16x16xf32>
    %27 = arith.mulf %10, %26 : vector<16x16xf32>
    %28 = tpu.transpose %27, [1, 0] : vector<16x16xf32> -> vector<16x16xf32>
    %cst_10 = arith.constant dense<0.000000e+00> : vector<16x16xf32>
    %29 = tpu.matmul %19, %28, %cst_10 {dimension_numbers = #tpu.dot_dimension_numbers<[1], [0], [0], [1], [0, 0, 1, 1], [], []>} : vector<16x16xf32>, vector<16x16xf32>, vector<16x16xf32> -> vector<16x16xf32>
    %c0_11 = arith.constant 0 : index
    %30 = memref.load %arg7[%c0_11] : memref<4xf32, #tpu.memory_space<smem>>
    %31 = vector.broadcast %30 : f32 to vector<16x16xf32>
    %32 = arith.mulf %29, %31 : vector<16x16xf32>
    %c0_12 = arith.constant 0 : index
    %c0_13 = arith.constant 0 : index
    %c0_14 = arith.constant 0 : index
    %33 = vector.load %arg6[%c0_12, %c0_13, %c0_14] : memref<4x16x16xf32, #tpu.memory_space<vmem>>, vector<1x16x16xf32>
    %34 = vector.shape_cast %33 : vector<1x16x16xf32> to vector<16x16xf32>
    %35 = arith.addf %32, %34 : vector<16x16xf32>
    %cst_15 = arith.constant dense<0xFF800000> : vector<16xf32>
    %36 = vector.multi_reduction <maximumf>, %35, %cst_15 [1] : vector<16x16xf32> to vector<16xf32>
    %37 = vector.shape_cast %36 : vector<16xf32> to vector<16x1xf32>
    %38 = vector.broadcast %37 : vector<16x1xf32> to vector<16x16xf32>
    %39 = arith.subf %35, %38 : vector<16x16xf32>
    %40 = math.exp %39 : vector<16x16xf32>
    %cst_16 = arith.constant dense<0.000000e+00> : vector<16xf32>
    %41 = vector.multi_reduction <add>, %40, %cst_16 [1] : vector<16x16xf32> to vector<16xf32>
    %42 = vector.shape_cast %41 : vector<16xf32> to vector<16x1xf32>
    %43 = tpu.reciprocal %42 {approx = true} : vector<16x1xf32> -> vector<16x1xf32>
    %44 = vector.broadcast %43 : vector<16x1xf32> to vector<16x16xf32>
    %45 = arith.mulf %40, %44 : vector<16x16xf32>
    %cst_17 = arith.constant dense<0.000000e+00> : vector<16x16xf32>
    %46 = tpu.matmul %45, %11, %cst_17 {dimension_numbers = #tpu.dot_dimension_numbers<[1], [0], [0], [1], [0, 0, 1, 1], [], []>} : vector<16x16xf32>, vector<16x16xf32>, vector<16x16xf32> -> vector<16x16xf32>
    %47 = vector.extract_strided_slice %8 {offsets = [0, 16], sizes = [16, 16], strides = [1, 1]} : vector<16x192xf32> to vector<16x16xf32>
    %48 = vector.extract_strided_slice %8 {offsets = [0, 80], sizes = [16, 16], strides = [1, 1]} : vector<16x192xf32> to vector<16x16xf32>
    %49 = vector.extract_strided_slice %8 {offsets = [0, 144], sizes = [16, 16], strides = [1, 1]} : vector<16x192xf32> to vector<16x16xf32>
    %50 = arith.mulf %47, %47 : vector<16x16xf32>
    %cst_18 = arith.constant dense<0.000000e+00> : vector<16xf32>
    %51 = vector.multi_reduction <add>, %50, %cst_18 [1] : vector<16x16xf32> to vector<16xf32>
    %52 = vector.shape_cast %51 : vector<16xf32> to vector<16x1xf32>
    %cst_19 = arith.constant 9.99999996E-13 : f32
    %53 = vector.broadcast %cst_19 : f32 to vector<16x1xf32>
    %54 = arith.addf %52, %53 : vector<16x1xf32>
    %55 = math.rsqrt %54 : vector<16x1xf32>
    %56 = vector.broadcast %55 : vector<16x1xf32> to vector<16x16xf32>
    %57 = arith.mulf %47, %56 : vector<16x16xf32>
    %58 = arith.mulf %48, %48 : vector<16x16xf32>
    %cst_20 = arith.constant dense<0.000000e+00> : vector<16xf32>
    %59 = vector.multi_reduction <add>, %58, %cst_20 [1] : vector<16x16xf32> to vector<16xf32>
    %60 = vector.shape_cast %59 : vector<16xf32> to vector<16x1xf32>
    %cst_21 = arith.constant 9.99999996E-13 : f32
    %61 = vector.broadcast %cst_21 : f32 to vector<16x1xf32>
    %62 = arith.addf %60, %61 : vector<16x1xf32>
    %63 = math.rsqrt %62 : vector<16x1xf32>
    %64 = vector.broadcast %63 : vector<16x1xf32> to vector<16x16xf32>
    %65 = arith.mulf %48, %64 : vector<16x16xf32>
    %66 = tpu.transpose %65, [1, 0] : vector<16x16xf32> -> vector<16x16xf32>
    %cst_22 = arith.constant dense<0.000000e+00> : vector<16x16xf32>
    %67 = tpu.matmul %57, %66, %cst_22 {dimension_numbers = #tpu.dot_dimension_numbers<[1], [0], [0], [1], [0, 0, 1, 1], [], []>} : vector<16x16xf32>, vector<16x16xf32>, vector<16x16xf32> -> vector<16x16xf32>
    %c1 = arith.constant 1 : index
    %68 = memref.load %arg7[%c1] : memref<4xf32, #tpu.memory_space<smem>>
    %69 = vector.broadcast %68 : f32 to vector<16x16xf32>
    %70 = arith.mulf %67, %69 : vector<16x16xf32>
    %c1_23 = arith.constant 1 : index
    %c0_24 = arith.constant 0 : index
    %c0_25 = arith.constant 0 : index
    %71 = vector.load %arg6[%c1_23, %c0_24, %c0_25] : memref<4x16x16xf32, #tpu.memory_space<vmem>>, vector<1x16x16xf32>
    %72 = vector.shape_cast %71 : vector<1x16x16xf32> to vector<16x16xf32>
    %73 = arith.addf %70, %72 : vector<16x16xf32>
    %cst_26 = arith.constant dense<0xFF800000> : vector<16xf32>
    %74 = vector.multi_reduction <maximumf>, %73, %cst_26 [1] : vector<16x16xf32> to vector<16xf32>
    %75 = vector.shape_cast %74 : vector<16xf32> to vector<16x1xf32>
    %76 = vector.broadcast %75 : vector<16x1xf32> to vector<16x16xf32>
    %77 = arith.subf %73, %76 : vector<16x16xf32>
    %78 = math.exp %77 : vector<16x16xf32>
    %cst_27 = arith.constant dense<0.000000e+00> : vector<16xf32>
    %79 = vector.multi_reduction <add>, %78, %cst_27 [1] : vector<16x16xf32> to vector<16xf32>
    %80 = vector.shape_cast %79 : vector<16xf32> to vector<16x1xf32>
    %81 = tpu.reciprocal %80 {approx = true} : vector<16x1xf32> -> vector<16x1xf32>
    %82 = vector.broadcast %81 : vector<16x1xf32> to vector<16x16xf32>
    %83 = arith.mulf %78, %82 : vector<16x16xf32>
    %cst_28 = arith.constant dense<0.000000e+00> : vector<16x16xf32>
    %84 = tpu.matmul %83, %49, %cst_28 {dimension_numbers = #tpu.dot_dimension_numbers<[1], [0], [0], [1], [0, 0, 1, 1], [], []>} : vector<16x16xf32>, vector<16x16xf32>, vector<16x16xf32> -> vector<16x16xf32>
    %85 = vector.extract_strided_slice %8 {offsets = [0, 32], sizes = [16, 16], strides = [1, 1]} : vector<16x192xf32> to vector<16x16xf32>
    %86 = vector.extract_strided_slice %8 {offsets = [0, 96], sizes = [16, 16], strides = [1, 1]} : vector<16x192xf32> to vector<16x16xf32>
    %87 = vector.extract_strided_slice %8 {offsets = [0, 160], sizes = [16, 16], strides = [1, 1]} : vector<16x192xf32> to vector<16x16xf32>
    %88 = arith.mulf %85, %85 : vector<16x16xf32>
    %cst_29 = arith.constant dense<0.000000e+00> : vector<16xf32>
    %89 = vector.multi_reduction <add>, %88, %cst_29 [1] : vector<16x16xf32> to vector<16xf32>
    %90 = vector.shape_cast %89 : vector<16xf32> to vector<16x1xf32>
    %cst_30 = arith.constant 9.99999996E-13 : f32
    %91 = vector.broadcast %cst_30 : f32 to vector<16x1xf32>
    %92 = arith.addf %90, %91 : vector<16x1xf32>
    %93 = math.rsqrt %92 : vector<16x1xf32>
    %94 = vector.broadcast %93 : vector<16x1xf32> to vector<16x16xf32>
    %95 = arith.mulf %85, %94 : vector<16x16xf32>
    %96 = arith.mulf %86, %86 : vector<16x16xf32>
    %cst_31 = arith.constant dense<0.000000e+00> : vector<16xf32>
    %97 = vector.multi_reduction <add>, %96, %cst_31 [1] : vector<16x16xf32> to vector<16xf32>
    %98 = vector.shape_cast %97 : vector<16xf32> to vector<16x1xf32>
    %cst_32 = arith.constant 9.99999996E-13 : f32
    %99 = vector.broadcast %cst_32 : f32 to vector<16x1xf32>
    %100 = arith.addf %98, %99 : vector<16x1xf32>
    %101 = math.rsqrt %100 : vector<16x1xf32>
    %102 = vector.broadcast %101 : vector<16x1xf32> to vector<16x16xf32>
    %103 = arith.mulf %86, %102 : vector<16x16xf32>
    %104 = tpu.transpose %103, [1, 0] : vector<16x16xf32> -> vector<16x16xf32>
    %cst_33 = arith.constant dense<0.000000e+00> : vector<16x16xf32>
    %105 = tpu.matmul %95, %104, %cst_33 {dimension_numbers = #tpu.dot_dimension_numbers<[1], [0], [0], [1], [0, 0, 1, 1], [], []>} : vector<16x16xf32>, vector<16x16xf32>, vector<16x16xf32> -> vector<16x16xf32>
    %c2 = arith.constant 2 : index
    %106 = memref.load %arg7[%c2] : memref<4xf32, #tpu.memory_space<smem>>
    %107 = vector.broadcast %106 : f32 to vector<16x16xf32>
    %108 = arith.mulf %105, %107 : vector<16x16xf32>
    %c2_34 = arith.constant 2 : index
    %c0_35 = arith.constant 0 : index
    %c0_36 = arith.constant 0 : index
    %109 = vector.load %arg6[%c2_34, %c0_35, %c0_36] : memref<4x16x16xf32, #tpu.memory_space<vmem>>, vector<1x16x16xf32>
    %110 = vector.shape_cast %109 : vector<1x16x16xf32> to vector<16x16xf32>
    %111 = arith.addf %108, %110 : vector<16x16xf32>
    %cst_37 = arith.constant dense<0xFF800000> : vector<16xf32>
    %112 = vector.multi_reduction <maximumf>, %111, %cst_37 [1] : vector<16x16xf32> to vector<16xf32>
    %113 = vector.shape_cast %112 : vector<16xf32> to vector<16x1xf32>
    %114 = vector.broadcast %113 : vector<16x1xf32> to vector<16x16xf32>
    %115 = arith.subf %111, %114 : vector<16x16xf32>
    %116 = math.exp %115 : vector<16x16xf32>
    %cst_38 = arith.constant dense<0.000000e+00> : vector<16xf32>
    %117 = vector.multi_reduction <add>, %116, %cst_38 [1] : vector<16x16xf32> to vector<16xf32>
    %118 = vector.shape_cast %117 : vector<16xf32> to vector<16x1xf32>
    %119 = tpu.reciprocal %118 {approx = true} : vector<16x1xf32> -> vector<16x1xf32>
    %120 = vector.broadcast %119 : vector<16x1xf32> to vector<16x16xf32>
    %121 = arith.mulf %116, %120 : vector<16x16xf32>
    %cst_39 = arith.constant dense<0.000000e+00> : vector<16x16xf32>
    %122 = tpu.matmul %121, %87, %cst_39 {dimension_numbers = #tpu.dot_dimension_numbers<[1], [0], [0], [1], [0, 0, 1, 1], [], []>} : vector<16x16xf32>, vector<16x16xf32>, vector<16x16xf32> -> vector<16x16xf32>
    %123 = vector.extract_strided_slice %8 {offsets = [0, 48], sizes = [16, 16], strides = [1, 1]} : vector<16x192xf32> to vector<16x16xf32>
    %124 = vector.extract_strided_slice %8 {offsets = [0, 112], sizes = [16, 16], strides = [1, 1]} : vector<16x192xf32> to vector<16x16xf32>
    %125 = vector.extract_strided_slice %8 {offsets = [0, 176], sizes = [16, 16], strides = [1, 1]} : vector<16x192xf32> to vector<16x16xf32>
    %126 = arith.mulf %123, %123 : vector<16x16xf32>
    %cst_40 = arith.constant dense<0.000000e+00> : vector<16xf32>
    %127 = vector.multi_reduction <add>, %126, %cst_40 [1] : vector<16x16xf32> to vector<16xf32>
    %128 = vector.shape_cast %127 : vector<16xf32> to vector<16x1xf32>
    %cst_41 = arith.constant 9.99999996E-13 : f32
    %129 = vector.broadcast %cst_41 : f32 to vector<16x1xf32>
    %130 = arith.addf %128, %129 : vector<16x1xf32>
    %131 = math.rsqrt %130 : vector<16x1xf32>
    %132 = vector.broadcast %131 : vector<16x1xf32> to vector<16x16xf32>
    %133 = arith.mulf %123, %132 : vector<16x16xf32>
    %134 = arith.mulf %124, %124 : vector<16x16xf32>
    %cst_42 = arith.constant dense<0.000000e+00> : vector<16xf32>
    %135 = vector.multi_reduction <add>, %134, %cst_42 [1] : vector<16x16xf32> to vector<16xf32>
    %136 = vector.shape_cast %135 : vector<16xf32> to vector<16x1xf32>
    %cst_43 = arith.constant 9.99999996E-13 : f32
    %137 = vector.broadcast %cst_43 : f32 to vector<16x1xf32>
    %138 = arith.addf %136, %137 : vector<16x1xf32>
    %139 = math.rsqrt %138 : vector<16x1xf32>
    %140 = vector.broadcast %139 : vector<16x1xf32> to vector<16x16xf32>
    %141 = arith.mulf %124, %140 : vector<16x16xf32>
    %142 = tpu.transpose %141, [1, 0] : vector<16x16xf32> -> vector<16x16xf32>
    %cst_44 = arith.constant dense<0.000000e+00> : vector<16x16xf32>
    %143 = tpu.matmul %133, %142, %cst_44 {dimension_numbers = #tpu.dot_dimension_numbers<[1], [0], [0], [1], [0, 0, 1, 1], [], []>} : vector<16x16xf32>, vector<16x16xf32>, vector<16x16xf32> -> vector<16x16xf32>
    %c3 = arith.constant 3 : index
    %144 = memref.load %arg7[%c3] : memref<4xf32, #tpu.memory_space<smem>>
    %145 = vector.broadcast %144 : f32 to vector<16x16xf32>
    %146 = arith.mulf %143, %145 : vector<16x16xf32>
    %c3_45 = arith.constant 3 : index
    %c0_46 = arith.constant 0 : index
    %c0_47 = arith.constant 0 : index
    %147 = vector.load %arg6[%c3_45, %c0_46, %c0_47] : memref<4x16x16xf32, #tpu.memory_space<vmem>>, vector<1x16x16xf32>
    %148 = vector.shape_cast %147 : vector<1x16x16xf32> to vector<16x16xf32>
    %149 = arith.addf %146, %148 : vector<16x16xf32>
    %cst_48 = arith.constant dense<0xFF800000> : vector<16xf32>
    %150 = vector.multi_reduction <maximumf>, %149, %cst_48 [1] : vector<16x16xf32> to vector<16xf32>
    %151 = vector.shape_cast %150 : vector<16xf32> to vector<16x1xf32>
    %152 = vector.broadcast %151 : vector<16x1xf32> to vector<16x16xf32>
    %153 = arith.subf %149, %152 : vector<16x16xf32>
    %154 = math.exp %153 : vector<16x16xf32>
    %cst_49 = arith.constant dense<0.000000e+00> : vector<16xf32>
    %155 = vector.multi_reduction <add>, %154, %cst_49 [1] : vector<16x16xf32> to vector<16xf32>
    %156 = vector.shape_cast %155 : vector<16xf32> to vector<16x1xf32>
    %157 = tpu.reciprocal %156 {approx = true} : vector<16x1xf32> -> vector<16x1xf32>
    %158 = vector.broadcast %157 : vector<16x1xf32> to vector<16x16xf32>
    %159 = arith.mulf %154, %158 : vector<16x16xf32>
    %cst_50 = arith.constant dense<0.000000e+00> : vector<16x16xf32>
    %160 = tpu.matmul %159, %125, %cst_50 {dimension_numbers = #tpu.dot_dimension_numbers<[1], [0], [0], [1], [0, 0, 1, 1], [], []>} : vector<16x16xf32>, vector<16x16xf32>, vector<16x16xf32> -> vector<16x16xf32>
    %161 = tpu.concatenate %46, %84, %122, %160 in 1 : vector<16x16xf32>, vector<16x16xf32>, vector<16x16xf32>, vector<16x16xf32> -> vector<16x64xf32>
    %c0_51 = arith.constant 0 : index
    %c0_52 = arith.constant 0 : index
    %162 = vector.load %arg4[%c0_51, %c0_52] : memref<64x64xf32, #tpu.memory_space<vmem>>, vector<64x64xf32>
    %163 = arith.truncf %161 : vector<16x64xf32> to vector<16x64xbf16>
    %164 = arith.truncf %162 : vector<64x64xf32> to vector<64x64xbf16>
    %cst_53 = arith.constant dense<0.000000e+00> : vector<16x64xf32>
    %165 = tpu.matmul %163, %164, %cst_53 {dimension_numbers = #tpu.dot_dimension_numbers<[1], [0], [0], [1], [0, 0, 1, 1], [], []>} : vector<16x64xbf16>, vector<64x64xbf16>, vector<16x64xf32> -> vector<16x64xf32>
    %c0_54 = arith.constant 0 : index
    %c0_55 = arith.constant 0 : index
    %166 = vector.load %arg5[%c0_54, %c0_55] : memref<1x64xf32, #tpu.memory_space<vmem>>, vector<1x64xf32>
    %167 = vector.broadcast %166 : vector<1x64xf32> to vector<16x64xf32>
    %168 = arith.addf %165, %167 : vector<16x64xf32>
    %c0_56 = arith.constant 0 : index
    %c0_57 = arith.constant 0 : index
    %169 = vector.load %arg8[%c0_56, %c0_57] : memref<1x64xf32, #tpu.memory_space<vmem>>, vector<1x64xf32>
    %c0_58 = arith.constant 0 : index
    %c0_59 = arith.constant 0 : index
    %170 = vector.load %arg9[%c0_58, %c0_59] : memref<1x64xf32, #tpu.memory_space<vmem>>, vector<1x64xf32>
    %cst_60 = arith.constant dense<0.000000e+00> : vector<16xf32>
    %171 = vector.multi_reduction <add>, %168, %cst_60 [1] : vector<16x64xf32> to vector<16xf32>
    %172 = vector.shape_cast %171 : vector<16xf32> to vector<16x1xf32>
    %cst_61 = arith.constant 6.400000e+01 : f32
    %173 = vector.broadcast %cst_61 : f32 to vector<16x1xf32>
    %174 = arith.divf %172, %173 : vector<16x1xf32>
    %175 = vector.broadcast %174 : vector<16x1xf32> to vector<16x64xf32>
    %176 = arith.subf %168, %175 : vector<16x64xf32>
    %177 = arith.mulf %176, %176 : vector<16x64xf32>
    %cst_62 = arith.constant dense<0.000000e+00> : vector<16xf32>
    %178 = vector.multi_reduction <add>, %177, %cst_62 [1] : vector<16x64xf32> to vector<16xf32>
    %179 = vector.shape_cast %178 : vector<16xf32> to vector<16x1xf32>
    %cst_63 = arith.constant 6.400000e+01 : f32
    %180 = vector.broadcast %cst_63 : f32 to vector<16x1xf32>
    %181 = arith.divf %179, %180 : vector<16x1xf32>
    %182 = vector.broadcast %174 : vector<16x1xf32> to vector<16x64xf32>
    %183 = arith.subf %168, %182 : vector<16x64xf32>
    %cst_64 = arith.constant 9.99999974E-6 : f32
    %184 = vector.broadcast %cst_64 : f32 to vector<16x1xf32>
    %185 = arith.addf %181, %184 : vector<16x1xf32>
    %186 = math.rsqrt %185 : vector<16x1xf32>
    %187 = vector.broadcast %186 : vector<16x1xf32> to vector<16x64xf32>
    %188 = arith.mulf %183, %187 : vector<16x64xf32>
    %189 = vector.broadcast %169 : vector<1x64xf32> to vector<16x64xf32>
    %190 = arith.mulf %188, %189 : vector<16x64xf32>
    %191 = vector.broadcast %170 : vector<1x64xf32> to vector<16x64xf32>
    %192 = arith.addf %190, %191 : vector<16x64xf32>
    %193 = arith.addf %1, %192 : vector<16x64xf32>
    %c0_65 = arith.constant 0 : index
    %c0_66 = arith.constant 0 : index
    %c0_67 = arith.constant 0 : index
    %194 = vector.load %arg10[%c0_65, %c0_66, %c0_67] : memref<1x16x64xf32, #tpu.memory_space<vmem>>, vector<1x16x64xf32>
    %195 = vector.shape_cast %194 : vector<1x16x64xf32> to vector<16x64xf32>
    %196 = vector.shape_cast %193 : vector<16x64xf32> to vector<1x16x64xf32>
    tpu.vector_store %arg10[%c0_65, %c0_66, %c0_67], %196 {strides = array<i32>} : memref<1x16x64xf32, #tpu.memory_space<vmem>>, vector<1x16x64xf32>,
    return
  }
  func.func @transform_0(%arg0: i32) -> (i32, i32, i32) {
    %c0_i32 = arith.constant 0 : i32
    %c0_i32_0 = arith.constant 0 : i32
    %c0_i32_1 = arith.constant 0 : i32
    return %arg0, %c0_i32, %c0_i32_0 : i32, i32, i32
  }
  func.func @transform_1(%arg0: i32) -> (i32, i32) {
    %c0_i32 = arith.constant 0 : i32
    %c0_i32_0 = arith.constant 0 : i32
    %c0_i32_1 = arith.constant 0 : i32
    return %c0_i32, %c0_i32_0 : i32, i32
  }
  func.func @transform_2(%arg0: i32) -> (i32, i32) {
    %c0_i32 = arith.constant 0 : i32
    %c0_i32_0 = arith.constant 0 : i32
    %c0_i32_1 = arith.constant 0 : i32
    return %c0_i32, %c0_i32_0 : i32, i32
  }
  func.func @transform_3(%arg0: i32) -> (i32, i32) {
    %c0_i32 = arith.constant 0 : i32
    %c0_i32_0 = arith.constant 0 : i32
    %c0_i32_1 = arith.constant 0 : i32
    return %c0_i32, %c0_i32_0 : i32, i32
  }
  func.func @transform_4(%arg0: i32) -> (i32, i32) {
    %c0_i32 = arith.constant 0 : i32
    %c0_i32_0 = arith.constant 0 : i32
    %c0_i32_1 = arith.constant 0 : i32
    return %c0_i32, %c0_i32_0 : i32, i32
  }
  func.func @transform_5(%arg0: i32) -> (i32, i32, i32) {
    %c0_i32 = arith.constant 0 : i32
    %c0_i32_0 = arith.constant 0 : i32
    %c0_i32_1 = arith.constant 0 : i32
    %c0_i32_2 = arith.constant 0 : i32
    return %c0_i32, %c0_i32_0, %c0_i32_1 : i32, i32, i32
  }
  func.func @transform_6(%arg0: i32) -> i32 {
    %c0_i32 = arith.constant 0 : i32
    %c0_i32_0 = arith.constant 0 : i32
    return %c0_i32 : i32
  }
  func.func @transform_7(%arg0: i32) -> (i32, i32) {
    %c0_i32 = arith.constant 0 : i32
    %c0_i32_0 = arith.constant 0 : i32
    %c0_i32_1 = arith.constant 0 : i32
    return %c0_i32, %c0_i32_0 : i32, i32
  }
  func.func @transform_8(%arg0: i32) -> (i32, i32) {
    %c0_i32 = arith.constant 0 : i32
    %c0_i32_0 = arith.constant 0 : i32
    %c0_i32_1 = arith.constant 0 : i32
    return %c0_i32, %c0_i32_0 : i32, i32
  }
  func.func @transform_9(%arg0: i32) -> (i32, i32, i32) {
    %c0_i32 = arith.constant 0 : i32
    %c0_i32_0 = arith.constant 0 : i32
    %c0_i32_1 = arith.constant 0 : i32
    return %arg0, %c0_i32, %c0_i32_0 : i32, i32, i32
  }
}

module attributes {stable_mosaic.version = 11 : i64} {
  func.func @kernel(%arg0: i32, %arg1: memref<32x64xf32, #tpu.memory_space<vmem>>, %arg2: memref<1x64xf32, #tpu.memory_space<vmem>>, %arg3: memref<1x64xf32, #tpu.memory_space<vmem>>, %arg4: memref<64x31xf32, #tpu.memory_space<vmem>>, %arg5: memref<1x31xf32, #tpu.memory_space<vmem>>, %arg6: memref<2x31xf32, #tpu.memory_space<vmem>>) attributes {dimension_semantics = [#tpu.dimension_semantics<arbitrary>], iteration_bounds = array<i64: 1>, scalar_prefetch = 0 : i64, scratch_operands = 0 : i64, tpu.core_type = #tpu.core_type<tc>, window_params = [{pipeline_mode = #tpu.pipeline_mode<synchronous>, transform_indices = @transform_0, window_bounds = array<i64: 32, 64>}, {pipeline_mode = #tpu.pipeline_mode<synchronous>, transform_indices = @transform_1, window_bounds = array<i64: 1, 64>}, {pipeline_mode = #tpu.pipeline_mode<synchronous>, transform_indices = @transform_2, window_bounds = array<i64: 1, 64>}, {pipeline_mode = #tpu.pipeline_mode<synchronous>, transform_indices = @transform_3, window_bounds = array<i64: 64, 31>}, {pipeline_mode = #tpu.pipeline_mode<synchronous>, transform_indices = @transform_4, window_bounds = array<i64: 1, 31>}, {pipeline_mode = #tpu.pipeline_mode<synchronous>, transform_indices = @transform_5, window_bounds = array<i64: 2, 31>}]} {
    %c0 = arith.constant 0 : index
    %c0_0 = arith.constant 0 : index
    %0 = vector.load %arg1[%c0, %c0_0] : memref<32x64xf32, #tpu.memory_space<vmem>>, vector<32x64xf32>
    %c0_1 = arith.constant 0 : index
    %c0_2 = arith.constant 0 : index
    %1 = vector.load %arg2[%c0_1, %c0_2] : memref<1x64xf32, #tpu.memory_space<vmem>>, vector<1x64xf32>
    %c0_3 = arith.constant 0 : index
    %c0_4 = arith.constant 0 : index
    %2 = vector.load %arg3[%c0_3, %c0_4] : memref<1x64xf32, #tpu.memory_space<vmem>>, vector<1x64xf32>
    %cst = arith.constant dense<0.000000e+00> : vector<32xf32>
    %3 = vector.multi_reduction <add>, %0, %cst [1] : vector<32x64xf32> to vector<32xf32>
    %4 = vector.shape_cast %3 : vector<32xf32> to vector<32x1xf32>
    %cst_5 = arith.constant 6.400000e+01 : f32
    %5 = vector.broadcast %cst_5 : f32 to vector<32x1xf32>
    %6 = arith.divf %4, %5 : vector<32x1xf32>
    %7 = vector.broadcast %6 : vector<32x1xf32> to vector<32x64xf32>
    %8 = arith.subf %0, %7 : vector<32x64xf32>
    %9 = arith.mulf %8, %8 : vector<32x64xf32>
    %cst_6 = arith.constant dense<0.000000e+00> : vector<32xf32>
    %10 = vector.multi_reduction <add>, %9, %cst_6 [1] : vector<32x64xf32> to vector<32xf32>
    %11 = vector.shape_cast %10 : vector<32xf32> to vector<32x1xf32>
    %cst_7 = arith.constant 6.400000e+01 : f32
    %12 = vector.broadcast %cst_7 : f32 to vector<32x1xf32>
    %13 = arith.divf %11, %12 : vector<32x1xf32>
    %14 = vector.broadcast %6 : vector<32x1xf32> to vector<32x64xf32>
    %15 = arith.subf %0, %14 : vector<32x64xf32>
    %cst_8 = arith.constant 9.99999974E-6 : f32
    %16 = vector.broadcast %cst_8 : f32 to vector<32x1xf32>
    %17 = arith.addf %13, %16 : vector<32x1xf32>
    %18 = math.rsqrt %17 : vector<32x1xf32>
    %19 = vector.broadcast %18 : vector<32x1xf32> to vector<32x64xf32>
    %20 = arith.mulf %15, %19 : vector<32x64xf32>
    %21 = vector.broadcast %1 : vector<1x64xf32> to vector<32x64xf32>
    %22 = arith.mulf %20, %21 : vector<32x64xf32>
    %23 = vector.broadcast %2 : vector<1x64xf32> to vector<32x64xf32>
    %24 = arith.addf %22, %23 : vector<32x64xf32>
    %25 = vector.extract_strided_slice %24 {offsets = [0, 0], sizes = [16, 64], strides = [1, 1]} : vector<32x64xf32> to vector<16x64xf32>
    %cst_9 = arith.constant dense<0.000000e+00> : vector<64xf32>
    %26 = vector.multi_reduction <add>, %25, %cst_9 [0] : vector<16x64xf32> to vector<64xf32>
    %27 = vector.shape_cast %26 : vector<64xf32> to vector<1x64xf32>
    %cst_10 = arith.constant 1.600000e+01 : f32
    %28 = vector.broadcast %cst_10 : f32 to vector<1x64xf32>
    %29 = arith.divf %27, %28 : vector<1x64xf32>
    %30 = vector.extract_strided_slice %24 {offsets = [16, 0], sizes = [16, 64], strides = [1, 1]} : vector<32x64xf32> to vector<16x64xf32>
    %cst_11 = arith.constant dense<0.000000e+00> : vector<64xf32>
    %31 = vector.multi_reduction <add>, %30, %cst_11 [0] : vector<16x64xf32> to vector<64xf32>
    %32 = vector.shape_cast %31 : vector<64xf32> to vector<1x64xf32>
    %cst_12 = arith.constant 1.600000e+01 : f32
    %33 = vector.broadcast %cst_12 : f32 to vector<1x64xf32>
    %34 = arith.divf %32, %33 : vector<1x64xf32>
    %35 = tpu.concatenate %29, %34 in 0 : vector<1x64xf32>, vector<1x64xf32> -> vector<2x64xf32>
    %c0_13 = arith.constant 0 : index
    %c0_14 = arith.constant 0 : index
    %36 = vector.load %arg4[%c0_13, %c0_14] : memref<64x31xf32, #tpu.memory_space<vmem>>, vector<64x31xf32>
    %cst_15 = arith.constant dense<0.000000e+00> : vector<2x31xf32>
    %37 = tpu.matmul %35, %36, %cst_15 {dimension_numbers = #tpu.dot_dimension_numbers<[1], [0], [0], [1], [0, 0, 1, 1], [], []>} : vector<2x64xf32>, vector<64x31xf32>, vector<2x31xf32> -> vector<2x31xf32>
    %c0_16 = arith.constant 0 : index
    %c0_17 = arith.constant 0 : index
    %38 = vector.load %arg5[%c0_16, %c0_17] : memref<1x31xf32, #tpu.memory_space<vmem>>, vector<1x31xf32>
    %39 = vector.broadcast %38 : vector<1x31xf32> to vector<2x31xf32>
    %40 = arith.addf %37, %39 : vector<2x31xf32>
    %c0_18 = arith.constant 0 : index
    %c0_19 = arith.constant 0 : index
    %41 = vector.load %arg6[%c0_18, %c0_19] : memref<2x31xf32, #tpu.memory_space<vmem>>, vector<2x31xf32>
    tpu.vector_store %arg6[%c0_18, %c0_19], %40 {strides = array<i32>} : memref<2x31xf32, #tpu.memory_space<vmem>>, vector<2x31xf32>,
    return
  }
  func.func @transform_0(%arg0: i32) -> (i32, i32) {
    %c0_i32 = arith.constant 0 : i32
    %c0_i32_0 = arith.constant 0 : i32
    %c0_i32_1 = arith.constant 0 : i32
    return %c0_i32, %c0_i32_0 : i32, i32
  }
  func.func @transform_1(%arg0: i32) -> (i32, i32) {
    %c0_i32 = arith.constant 0 : i32
    %c0_i32_0 = arith.constant 0 : i32
    %c0_i32_1 = arith.constant 0 : i32
    return %c0_i32, %c0_i32_0 : i32, i32
  }
  func.func @transform_2(%arg0: i32) -> (i32, i32) {
    %c0_i32 = arith.constant 0 : i32
    %c0_i32_0 = arith.constant 0 : i32
    %c0_i32_1 = arith.constant 0 : i32
    return %c0_i32, %c0_i32_0 : i32, i32
  }
  func.func @transform_3(%arg0: i32) -> (i32, i32) {
    %c0_i32 = arith.constant 0 : i32
    %c0_i32_0 = arith.constant 0 : i32
    %c0_i32_1 = arith.constant 0 : i32
    return %c0_i32, %c0_i32_0 : i32, i32
  }
  func.func @transform_4(%arg0: i32) -> (i32, i32) {
    %c0_i32 = arith.constant 0 : i32
    %c0_i32_0 = arith.constant 0 : i32
    %c0_i32_1 = arith.constant 0 : i32
    return %c0_i32, %c0_i32_0 : i32, i32
  }
  func.func @transform_5(%arg0: i32) -> (i32, i32) {
    %c0_i32 = arith.constant 0 : i32
    %c0_i32_0 = arith.constant 0 : i32
    %c0_i32_1 = arith.constant 0 : i32
    return %c0_i32, %c0_i32_0 : i32, i32
  }
}

</mosaic_0001>

<bundles_post_ra>
// kernel: swinv2_forward.11
= control target key start
LH: loop header
LB: loop body
LE: loop exit
PB: predicated region body
PF: predicated region fallthrough
CT: control target
= control target key end

     0   :  { %vm61_vm0 = vcmask 392192   ;;  %vm185_vm1 = vcmask 261120   ;;  %s926_s1 = inlined_call_operand.vmem [shape: f32[48,32], index: 1, kind: input, shape index: {}]   ;;  %s927_s0 = inlined_call_operand.vmem [shape: f32[128,48], index: 0, kind: input, shape index: {}]   ;;  %s928_s2 = inlined_call_operand.vmem [shape: f32[1,32], index: 2, kind: input, shape index: {}]   ;;  %s929_s3 = inlined_call_operand.vmem [shape: f32[1,32], index: 3, kind: input, shape index: {}]   ;;  %s930_s4 = inlined_call_operand.vmem [shape: f32[1,32], index: 4, kind: input, shape index: {}]   ;;  %s931_s5 = inlined_call_operand.vmem [shape: f32[128,32], index: 5, kind: output, shape index: {}]  }
   0x1   :  { %v41_v0 = vld [vmem:[%s926_s1 + $0x20] sm:$0xff]  ;;  %v42_v1 = vld [vmem:[%s926_s1 + $0x28] sm:$0xff]  ;;  %v39_v2 = vld [vmem:[%s926_s1 + $0x10] sm:$0xff] }
   0x2   :  { %v53_v3 = vpack.c.bf16 %v42_v1, %v41_v0  ;;  %v40_v4 = vld [vmem:[%s926_s1 + $0x18] sm:$0xff]  ;;  %v37_v5 = vld [vmem:[%s926_s1] sm:$0xff]  ;;  %v38_v6 = vld [vmem:[%s926_s1 + $0x8] sm:$0xff] }
   0x3   :  { %v52_v7 = vpack.c.bf16 %v40_v4, %v39_v2  ;;  %v21_v8 = vld [vmem:[%s927_s0] sm:$0xff]  ;;  %v22_v9 = vld [vmem:[%s927_s0 + $0x8] sm:$0xff]  ;;  %v51_v14 = vpack.c.bf16 %v38_v6, %v37_v5  ;;  %v23_v15 = vld [vmem:[%s927_s0 + $0x10] sm:$0xff] }
   0x4   :  { %v29_v10 = vld [vmem:[%s927_s0 + $0x40] sm:$0xff]  ;;  %481 = vmatprep.subr.bf16.mxu0 %v53_v3  ;;  %503 = vmatprep.subr.bf16.mxu1 %v53_v3  ;;  %v43_v11 = vpack.c.bf16 %v22_v9, %v21_v8  ;;  %v30_v12 = vld [vmem:[%s927_s0 + $0x48] sm:$0xff]  ;;  %v24_v16 = vld [vmem:[%s927_s0 + $0x18] sm:$0xff] }
   0x5   :  { %482 = vmatpush3.bf16.msra.mxu0 %v53_v3  ;;  %506 = vmatpush3.bf16.msra.mxu1 %v53_v3  ;;  %v47_v13 = vpack.c.bf16 %v30_v12, %v29_v10  ;;  %v31_v17 = vld [vmem:[%s927_s0 + $0x50] sm:$0xff]  ;;  %v32_v18 = vld [vmem:[%s927_s0 + $0x58] sm:$0xff]  ;;  %v25_v19 = vld [vmem:[%s927_s0 + $0x20] sm:$0xff]  ;;  %v44_v23 = vpack.c.bf16 %v24_v16, %v23_v15 }
   0x6   :  { %483 = vmatprep.subr.bf16.mxu0 %v52_v7  ;;  %504 = vmatprep.subr.bf16.mxu1 %v52_v7  ;;  %v26_v20 = vld [vmem:[%s927_s0 + $0x28] sm:$0xff]  ;;  %v33_v21 = vld [vmem:[%s927_s0 + $0x60] sm:$0xff]  ;;  %v48_v24 = vpack.c.bf16 %v32_v18, %v31_v17  ;;  %v27_v27 = vld [vmem:[%s927_s0 + $0x30] sm:$0xff] }
   0x7   :  { %487 = vmatprep.mubr.msk.bf16.mxu0 %vm61_vm0, %v43_v11  ;;  %495 = vmatprep.mubr.msk.bf16.mxu1 %vm61_vm0, %v47_v13  ;;  %v34_v22 = vld [vmem:[%s927_s0 + $0x68] sm:$0xff]  ;;  %v45_v25 = vpack.c.bf16 %v26_v20, %v25_v19  ;;  %v28_v28 = vld [vmem:[%s927_s0 + $0x38] sm:$0xff]  ;;  %v35_v29 = vld [vmem:[%s927_s0 + $0x70] sm:$0xff] }
   0x8   :  { %v49_v26 = vpack.c.bf16 %v34_v22, %v33_v21  ;;  %v36_v30 = vld [vmem:[%s927_s0 + $0x78] sm:$0xff]  ;;  %v46_v31 = vpack.c.bf16 %v28_v28, %v27_v27  ;;  %v459_v33 = vld [vmem:[%s928_s2] ss:$0 sm:$0xff] }
   0x9   :  { %484 = vmatpush3.bf16.msra.mxu0 %v52_v7  ;;  %507 = vmatpush3.bf16.msra.mxu1 %v52_v7  ;;  %v50_v32 = vpack.c.bf16 %v36_v30, %v35_v29 }
   0xa   :  { %485 = vmatprep.subr.bf16.mxu0 %v51_v14  ;;  %505 = vmatprep.subr.bf16.mxu1 %v51_v14 }
   0xd   :  { %486 = vmatpush3.bf16.msra.mxu0 %v51_v14  ;;  %508 = vmatpush3.bf16.msra.mxu1 %v51_v14 }
  0x10   :  { %488 = vmatmul.mubr.msk.bf16.vlgmr.msra.gmra.mxu0 %vm61_vm0, %v44_v23  ;;  %496 = vmatmul.mubr.msk.bf16.vlgmr.msra.gmra.mxu1 %vm61_vm0, %v48_v24 }
  0x11   :  { %491 = vmatprep.mubr.msk.bf16.mxu0 %vm61_vm0, %v45_v25  ;;  %499 = vmatprep.mubr.msk.bf16.mxu1 %vm61_vm0, %v49_v26 }
  0x18   :  { %492 = vmatmul.mubr.msk.bf16.gmra.mxu0 %vm61_vm0, %v46_v31  ;;  %500 = vmatmul.mubr.msk.bf16.gmra.mxu1 %vm61_vm0, %v50_v32 }
  0xd0   :  { %v489_v34 = vpop.f32.mrf.mxu0  ;;  %v497_v35 = vpop.f32.mrf.mxu1 }
  0xd1   :  { %v648_v36 = vadd.f32 %v489_v34, %v459_v33  ;;  %v650_v37 = vadd.f32 %v497_v35, %v459_v33 }
  0xd2   :  { %v120_v38 = vpop.f32.mrf.mxu0  ;;  %v152_v39 = vpop.f32.mrf.mxu1 }
  0xd3   :  { %v652_v40 = vadd.f32 %v459_v33, %v120_v38  ;;  %v216_v41 = vsel %vm185_vm1, %v650_v37, 0.0  ;;  %v192_v42 = vsel %vm185_vm1, %v648_v36, 0.0  ;;  %v658_v48 = vadd.f32 %v459_v33, %v152_v39 }
  0xd4   :  { %217 = vadd.xlane.f32.xlu0 %v216_v41  ;;  %v498_v43 = vpop.f32.mrf.mxu1  ;;  %193 = vadd.xlane.f32.xlu1 %v192_v42  ;;  %v490_v44 = vpop.f32.mrf.mxu0 }
  0xd5   :  { %v132_v45 = vadd.f32 %v490_v44, %v459_v33  ;;  %v660_v49 = vadd.f32 %v498_v43, %v459_v33  ;;  %v186_v51 = vsel %vm185_vm1, %v652_v40, 0.0  ;;  %v210_v58 = vsel %vm185_vm1, %v658_v48, 0.0 }
  0xd6   :  { %v123_v46 = vpop.f32.mrf.mxu0  ;;  %v155_v47 = vpop.f32.mrf.mxu1 }
  0xd7   :  { %v195_v50 = vsel %vm185_vm1, %v132_v45, 0.0  ;;  %v665_v55 = vadd.f32 %v459_v33, %v123_v46  ;;  %v667_v56 = vadd.f32 %v459_v33, %v155_v47  ;;  %v219_v57 = vsel %vm185_vm1, %v660_v49, 0.0 }
  0xd8   :  { %196 = vadd.xlane.f32.xlu1 %v195_v50  ;;  %187 = vadd.xlane.f32.xlu0 %v186_v51  ;;  %v493_v52 = vpop.f32.mrf.mxu0  ;;  %v501_v53 = vpop.f32.mrf.mxu1 }
  0xd9   :  { %v673_v61 = vadd.f32 %v493_v52, %v459_v33  ;;  %v213_v63 = vsel %vm185_vm1, %v667_v56, 0.0  ;;  %v189_v0 = vsel %vm185_vm1, %v665_v55, 0.0  ;;  %v697_v12 = vadd.f32 %v501_v53, %v459_v33 }
  0xda   :  { %v136_v54 = vpop.f32.mrf.mxu0  ;;  %v168_v60 = vpop.f32.mrf.mxu1 }
  0xdb   :  { %v204_v4 = vsel %vm185_vm1, %v673_v61, 0.0  ;;  %v685_v5 = vadd.f32 %v459_v33, %v136_v54  ;;  %v689_v8 = vadd.f32 %v459_v33, %v168_v60  ;;  %v228_v17 = vsel %vm185_vm1, %v697_v12, 0.0 }
  0xdc   :  { %220 = vadd.xlane.f32.xlu1 %v219_v57  ;;  %211 = vadd.xlane.f32.xlu0 %v210_v58  ;;  %v494_v59 = vpop.f32.mrf.mxu0  ;;  %v502_v2 = vpop.f32.mrf.mxu1 }
  0xdd   :  { %v675_v62 = vadd.f32 %v494_v59, %v459_v33  ;;  %v198_v11 = vsel %vm185_vm1, %v685_v5, 0.0  ;;  %v699_v13 = vadd.f32 %v502_v2, %v459_v33  ;;  %v222_v15 = vsel %vm185_vm1, %v689_v8, 0.0 }
  0xde   :  { %v139_v1 = vpop.f32.mrf.mxu0  ;;  %v171_v7 = vpop.f32.mrf.mxu1 }
  0xdf   :  { %v207_v3 = vsel %vm185_vm1, %v675_v62, 0.0  ;;  %v687_v6 = vadd.f32 %v459_v33, %v139_v1  ;;  %v691_v9 = vadd.f32 %v459_v33, %v171_v7  ;;  %v231_v16 = vsel %vm185_vm1, %v699_v13, 0.0 }
  0xe0   :  { %214 = vadd.xlane.f32.xlu1 %v213_v63  ;;  %190 = vadd.xlane.f32.xlu0 %v189_v0 }
  0xe1   :  { %v201_v10 = vsel %vm185_vm1, %v687_v6, 0.0  ;;  %v225_v14 = vsel %vm185_vm1, %v691_v9, 0.0 }
  0xe4   :  { %208 = vadd.xlane.f32.xlu1 %v207_v3  ;;  %205 = vadd.xlane.f32.xlu0 %v204_v4 }
  0xe8   :  { %202 = vadd.xlane.f32.xlu1 %v201_v10  ;;  %199 = vadd.xlane.f32.xlu0 %v198_v11 }
  0xec   :  { %226 = vadd.xlane.f32.xlu1 %v225_v14  ;;  %223 = vadd.xlane.f32.xlu0 %v222_v15 }
  0xf0   :  { %232 = vadd.xlane.f32.xlu1 %v231_v16  ;;  %229 = vadd.xlane.f32.xlu0 %v228_v17 }
 0x15d   :  { %v218_v18 = vpop.xlane.xlu0 %217  ;;  %v194_v19 = vpop.xlane.xlu1 %193 }
 0x15e   :  { %v245_v20 = vmul.f32 0.03125, %v218_v18  ;;  %v237_v21 = vmul.f32 0.03125, %v194_v19 }
 0x160   :  { %v710_v22 = vsub.f32 %v650_v37, %v245_v20  ;;  %v713_v23 = vsub.f32 %v648_v36, %v237_v21 }
 0x161   :  { %v197_v24 = vpop.xlane.xlu1 %196  ;;  %v188_v25 = vpop.xlane.xlu0 %187 }
 0x162   :  { %v238_v26 = vmul.f32 0.03125, %v197_v24  ;;  %v235_v27 = vmul.f32 0.03125, %v188_v25  ;;  %v269_v28 = vmul.f32 %v713_v23, %v713_v23  ;;  %v277_v32 = vmul.f32 %v710_v22, %v710_v22 }
 0x164   :  { %v717_v29 = vsub.f32 %v132_v45, %v238_v26  ;;  %v720_v30 = vsub.f32 %v652_v40, %v235_v27  ;;  %v289_v31 = vsel %vm185_vm1, %v269_v28, 0.0  ;;  %v313_v42 = vsel %vm185_vm1, %v277_v32, 0.0 }
 0x165   :  { %v221_v33 = vpop.xlane.xlu1 %220  ;;  %290 = vadd.xlane.f32.xlu0 %v289_v31  ;;  %v212_v34 = vpop.xlane.xlu0 %211 }
 0x166   :  { %v246_v35 = vmul.f32 0.03125, %v221_v33  ;;  %v243_v36 = vmul.f32 0.03125, %v212_v34  ;;  %v270_v37 = vmul.f32 %v717_v29, %v717_v29  ;;  %v267_v38 = vmul.f32 %v720_v30, %v720_v30 }
 0x168   :  { %v730_v39 = vsub.f32 %v660_v49, %v246_v35  ;;  %v733_v40 = vsub.f32 %v658_v48, %v243_v36  ;;  %v292_v41 = vsel %vm185_vm1, %v270_v37, 0.0  ;;  %v283_v50 = vsel %vm185_vm1, %v267_v38, 0.0 }
 0x169   :  { %v215_v43 = vpop.xlane.xlu1 %214  ;;  %293 = vadd.xlane.f32.xlu1 %v292_v41  ;;  %314 = vadd.xlane.f32.xlu0 %v313_v42  ;;  %v191_v44 = vpop.xlane.xlu0 %190 }
 0x16a   :  { %v244_v45 = vmul.f32 0.03125, %v215_v43  ;;  %v236_v46 = vmul.f32 0.03125, %v191_v44  ;;  %v278_v47 = vmul.f32 %v730_v39, %v730_v39  ;;  %v275_v52 = vmul.f32 %v733_v40, %v733_v40 }
 0x16c   :  { %v741_v49 = vsub.f32 %v667_v56, %v244_v45  ;;  %v744_v48 = vsub.f32 %v665_v55, %v236_v46  ;;  %v316_v51 = vsel %vm185_vm1, %v278_v47, 0.0  ;;  %v307_v63 = vsel %vm185_vm1, %v275_v52, 0.0 }
 0x16d   :  { %v209_v53 = vpop.xlane.xlu1 %208  ;;  %317 = vadd.xlane.f32.xlu1 %v316_v51  ;;  %284 = vadd.xlane.f32.xlu0 %v283_v50  ;;  %v206_v54 = vpop.xlane.xlu0 %205 }
 0x16e   :  { %v242_v57 = vmul.f32 0.03125, %v209_v53  ;;  %v241_v58 = vmul.f32 0.03125, %v206_v54  ;;  %v268_v59 = vmul.f32 %v744_v48, %v744_v48  ;;  %v276_v56 = vmul.f32 %v741_v49, %v741_v49 }
 0x170   :  { %v754_v55 = vsub.f32 %v675_v62, %v242_v57  ;;  %v757_v60 = vsub.f32 %v673_v61, %v241_v58  ;;  %v286_v0 = vsel %vm185_vm1, %v268_v59, 0.0  ;;  %v310_v10 = vsel %vm185_vm1, %v276_v56, 0.0 }
 0x171   :  { %v203_v1 = vpop.xlane.xlu1 %202  ;;  %308 = vadd.xlane.f32.xlu0 %v307_v63  ;;  %287 = vadd.xlane.f32.xlu1 %v286_v0  ;;  %v200_v2 = vpop.xlane.xlu0 %199 }
 0x172   :  { %v240_v3 = vmul.f32 0.03125, %v203_v1  ;;  %v239_v4 = vmul.f32 0.03125, %v200_v2  ;;  %v273_v7 = vmul.f32 %v757_v60, %v757_v60  ;;  %v274_v14 = vmul.f32 %v754_v55, %v754_v55 }
 0x174   :  { %v765_v62 = vsub.f32 %v687_v6, %v240_v3  ;;  %v768_v61 = vsub.f32 %v685_v5, %v239_v4  ;;  %v301_v11 = vsel %vm185_vm1, %v273_v7, 0.0  ;;  %v304_v21 = vsel %vm185_vm1, %v274_v14, 0.0  ;;  %v807_v14 = vld [vmem:[%s929_s3] ss:$0 sm:$0xff] }
 0x175   :  { %v227_v15 = vpop.xlane.xlu1 %226  ;;  %311 = vadd.xlane.f32.xlu1 %v310_v10  ;;  %302 = vadd.xlane.f32.xlu0 %v301_v11  ;;  %v224_v16 = vpop.xlane.xlu0 %223 }
 0x176   :  { %v248_v17 = vmul.f32 0.03125, %v227_v15  ;;  %v247_v18 = vmul.f32 0.03125, %v224_v16  ;;  %v271_v19 = vmul.f32 %v768_v61, %v768_v61  ;;  %v272_v6 = vmul.f32 %v765_v62, %v765_v62 }
 0x178   :  { %v778_v5 = vsub.f32 %v691_v9, %v248_v17  ;;  %v781_v20 = vsub.f32 %v689_v8, %v247_v18  ;;  %v295_v24 = vsel %vm185_vm1, %v271_v19, 0.0  ;;  %v298_v32 = vsel %vm185_vm1, %v272_v6, 0.0  ;;  %v813_v18 = vld [vmem:[%s930_s4] ss:$0 sm:$0xff] }
 0x179   :  { %v233_v25 = vpop.xlane.xlu1 %232  ;;  %305 = vadd.xlane.f32.xlu1 %v304_v21  ;;  %296 = vadd.xlane.f32.xlu0 %v295_v24  ;;  %v230_v26 = vpop.xlane.xlu0 %229 }
 0x17a   :  { %v250_v27 = vmul.f32 0.03125, %v233_v25  ;;  %v249_v28 = vmul.f32 0.03125, %v230_v26  ;;  %v279_v31 = vmul.f32 %v781_v20, %v781_v20  ;;  %v280_v34 = vmul.f32 %v778_v5, %v778_v5 }
 0x17c   :  { %v789_v9 = vsub.f32 %v699_v13, %v250_v27  ;;  %v792_v8 = vsub.f32 %v697_v12, %v249_v28  ;;  %v319_v33 = vsel %vm185_vm1, %v279_v31, 0.0  ;;  %v322_v36 = vsel %vm185_vm1, %v280_v34, 0.0 }
 0x17d   :  { %299 = vadd.xlane.f32.xlu1 %v298_v32  ;;  %320 = vadd.xlane.f32.xlu0 %v319_v33 }
 0x17e   :  { %v281_v35 = vmul.f32 %v792_v8, %v792_v8  ;;  %v282_v13 = vmul.f32 %v789_v9, %v789_v9 }
 0x180   :  { %v325_v37 = vsel %vm185_vm1, %v281_v35, 0.0  ;;  %v328_v12 = vsel %vm185_vm1, %v282_v13, 0.0 }
 0x181   :  { %323 = vadd.xlane.f32.xlu1 %v322_v36  ;;  %326 = vadd.xlane.f32.xlu0 %v325_v37 }
 0x185   :  { %329 = vadd.xlane.f32.xlu1 %v328_v12 }
 0x1ee   :  { %v291_v38 = vpop.xlane.xlu0 %290 }
 0x1ef   :  { %v333_v41 = vmul.f32 0.03125, %v291_v38 }
 0x1f1   :  { %v349_v42 = vadd.f32 1e-05, %v333_v41 }
 0x1f2   :  { %v294_v43 = vpop.xlane.xlu1 %293  ;;  %v315_v44 = vpop.xlane.xlu0 %314 }
 0x1f3   :  { %509 = vrsqrt.f32 %v349_v42  ;;  %v334_v45 = vmul.f32 0.03125, %v294_v43  ;;  %v341_v46 = vmul.f32 0.03125, %v315_v44 }
 0x1f5   :  { %v350_v47 = vadd.f32 1e-05, %v334_v45  ;;  %v357_v50 = vadd.f32 1e-05, %v341_v46 }
 0x1f6   :  { %v318_v51 = vpop.xlane.xlu1 %317  ;;  %v285_v52 = vpop.xlane.xlu0 %284 }
 0x1f7   :  { %511 = vrsqrt.f32 %v350_v47  ;;  %v342_v53 = vmul.f32 0.03125, %v318_v51  ;;  %v331_v54 = vmul.f32 0.03125, %v285_v52 }
 0x1f8   :  { %513 = vrsqrt.f32 %v357_v50 }
 0x1f9   :  { %v358_v57 = vadd.f32 1e-05, %v342_v53  ;;  %v347_v58 = vadd.f32 1e-05, %v331_v54 }
 0x1fa   :  { %v288_v59 = vpop.xlane.xlu1 %287  ;;  %v309_v56 = vpop.xlane.xlu0 %308 }
 0x1fb   :  { %515 = vrsqrt.f32 %v358_v57  ;;  %v332_v63 = vmul.f32 0.03125, %v288_v59  ;;  %v339_v0 = vmul.f32 0.03125, %v309_v56 }
 0x1fc   :  { %517 = vrsqrt.f32 %v347_v58 }
 0x1fd   :  { %v348_v1 = vadd.f32 1e-05, %v332_v63  ;;  %v355_v2 = vadd.f32 1e-05, %v339_v0 }
 0x1fe   :  { %v312_v3 = vpop.xlane.xlu1 %311  ;;  %v303_v4 = vpop.xlane.xlu0 %302 }
 0x1ff   :  { %519 = vrsqrt.f32 %v348_v1  ;;  %v340_v7 = vmul.f32 0.03125, %v312_v3  ;;  %v337_v10 = vmul.f32 0.03125, %v303_v4 }
 0x200   :  { %v510_v11 = vpop.eup %509  ;;  %521 = vrsqrt.f32 %v355_v2 }
 0x201   :  { %v381_v15 = vmul.f32 %v510_v11, %v713_v23  ;;  %v356_v16 = vadd.f32 1e-05, %v340_v7  ;;  %v353_v17 = vadd.f32 1e-05, %v337_v10 }
 0x202   :  { %v306_v19 = vpop.xlane.xlu1 %305  ;;  %v297_v6 = vpop.xlane.xlu0 %296 }
 0x203   :  { %v403_v21 = vmul.f32 %v807_v14, %v381_v15  ;;  %523 = vrsqrt.f32 %v356_v16  ;;  %v338_v24 = vmul.f32 0.03125, %v306_v19  ;;  %v335_v25 = vmul.f32 0.03125, %v297_v6 }
 0x204   :  { %v512_v26 = vpop.eup %511  ;;  %525 = vrsqrt.f32 %v353_v17 }
 0x205   :  { %v514_v27 = vpop.eup %513  ;;  %v425_v28 = vadd.f32 %v813_v18, %v403_v21  ;;  %v382_v23 = vmul.f32 %v512_v26, %v717_v29  ;;  %v354_v31 = vadd.f32 1e-05, %v338_v24  ;;  %v351_v32 = vadd.f32 1e-05, %v335_v25 }
 0x206   :  { %v389_v33 = vmul.f32 %v514_v27, %v710_v22  ;;  %v300_v34 = vpop.xlane.xlu1 %299  ;;  %v321_v35 = vpop.xlane.xlu0 %320 }
 0x207   :  { %441 = vst.msk [vmem:[%s931_s5 + $0x10] sm:$0xff] %vm185_vm1, %v425_v28  ;;  %v404_v36 = vmul.f32 %v807_v14, %v382_v23  ;;  %527 = vrsqrt.f32 %v354_v31  ;;  %v336_v37 = vmul.f32 0.03125, %v300_v34  ;;  %v343_v13 = vmul.f32 0.03125, %v321_v35 }
 0x208   :  { %v516_v12 = vpop.eup %515  ;;  %v411_v38 = vmul.f32 %v807_v14, %v389_v33  ;;  %529 = vrsqrt.f32 %v351_v32 }
 0x209   :  { %v518_v29 = vpop.eup %517  ;;  %v426_v41 = vadd.f32 %v813_v18, %v404_v36  ;;  %v390_v22 = vmul.f32 %v516_v12, %v730_v39  ;;  %v352_v42 = vadd.f32 1e-05, %v336_v37  ;;  %v359_v43 = vadd.f32 1e-05, %v343_v13 }
 0x20a   :  { %v433_v44 = vadd.f32 %v813_v18, %v411_v38  ;;  %v379_v45 = vmul.f32 %v518_v29, %v720_v30  ;;  %v324_v46 = vpop.xlane.xlu1 %323  ;;  %v327_v47 = vpop.xlane.xlu0 %326 }
 0x20b   :  { %442 = vst.msk [vmem:[%s931_s5 + $0x18] sm:$0xff] %vm185_vm1, %v426_v41  ;;  %v412_v50 = vmul.f32 %v807_v14, %v390_v22  ;;  %531 = vrsqrt.f32 %v352_v42  ;;  %v344_v51 = vmul.f32 0.03125, %v324_v46  ;;  %v345_v52 = vmul.f32 0.03125, %v327_v47 }
 0x20c   :  { %v520_v53 = vpop.eup %519  ;;  %449 = vst.msk [vmem:[%s931_s5 + $0x50] sm:$0xff] %vm185_vm1, %v433_v44  ;;  %v401_v30 = vmul.f32 %v807_v14, %v379_v45  ;;  %533 = vrsqrt.f32 %v359_v43 }
 0x20d   :  { %v522_v39 = vpop.eup %521  ;;  %v434_v54 = vadd.f32 %v813_v18, %v412_v50  ;;  %v380_v57 = vmul.f32 %v520_v53, %v744_v48  ;;  %v360_v58 = vadd.f32 1e-05, %v344_v51  ;;  %v361_v59 = vadd.f32 1e-05, %v345_v52 }
 0x20e   :  { %v423_v56 = vadd.f32 %v813_v18, %v401_v30  ;;  %v387_v63 = vmul.f32 %v522_v39, %v733_v40  ;;  %v330_v0 = vpop.xlane.xlu1 %329 }
 0x20f   :  { %450 = vst.msk [vmem:[%s931_s5 + $0x58] sm:$0xff] %vm185_vm1, %v434_v54  ;;  %v402_v1 = vmul.f32 %v807_v14, %v380_v57  ;;  %535 = vrsqrt.f32 %v360_v58  ;;  %v346_v2 = vmul.f32 0.03125, %v330_v0 }
 0x210   :  { %v524_v3 = vpop.eup %523  ;;  %439 = vst.msk [vmem:[%s931_s5] sm:$0xff] %vm185_vm1, %v423_v56  ;;  %v409_v48 = vmul.f32 %v807_v14, %v387_v63  ;;  %537 = vrsqrt.f32 %v361_v59 }
 0x211   :  { %v526_v40 = vpop.eup %525  ;;  %v424_v4 = vadd.f32 %v813_v18, %v402_v1  ;;  %v388_v7 = vmul.f32 %v524_v3, %v741_v49  ;;  %v362_v10 = vadd.f32 1e-05, %v346_v2 }
 0x212   :  { %v431_v11 = vadd.f32 %v813_v18, %v409_v48  ;;  %v385_v15 = vmul.f32 %v526_v40, %v757_v60 }
 0x213   :  { %440 = vst.msk [vmem:[%s931_s5 + $0x8] sm:$0xff] %vm185_vm1, %v424_v4  ;;  %v410_v16 = vmul.f32 %v807_v14, %v388_v7  ;;  %539 = vrsqrt.f32 %v362_v10 }
 0x214   :  { %v528_v17 = vpop.eup %527  ;;  %447 = vst.msk [vmem:[%s931_s5 + $0x40] sm:$0xff] %vm185_vm1, %v431_v11  ;;  %v407_v49 = vmul.f32 %v807_v14, %v385_v15 }
 0x215   :  { %v530_v19 = vpop.eup %529  ;;  %v432_v6 = vadd.f32 %v813_v18, %v410_v16  ;;  %v386_v60 = vmul.f32 %v528_v17, %v754_v55 }
 0x216   :  { %v429_v21 = vadd.f32 %v813_v18, %v407_v49  ;;  %v383_v24 = vmul.f32 %v530_v19, %v768_v61 }
 0x217   :  { %448 = vst.msk [vmem:[%s931_s5 + $0x48] sm:$0xff] %vm185_vm1, %v432_v6  ;;  %v408_v25 = vmul.f32 %v807_v14, %v386_v60 }
 0x218   :  { %v532_v26 = vpop.eup %531  ;;  %445 = vst.msk [vmem:[%s931_s5 + $0x30] sm:$0xff] %vm185_vm1, %v429_v21  ;;  %v405_v27 = vmul.f32 %v807_v14, %v383_v24 }
 0x219   :  { %v534_v55 = vpop.eup %533  ;;  %v430_v28 = vadd.f32 %v813_v18, %v408_v25  ;;  %v384_v61 = vmul.f32 %v532_v26, %v765_v62 }
 0x21a   :  { %v427_v23 = vadd.f32 %v813_v18, %v405_v27  ;;  %v391_v31 = vmul.f32 %v534_v55, %v781_v20 }
 0x21b   :  { %446 = vst.msk [vmem:[%s931_s5 + $0x38] sm:$0xff] %vm185_vm1, %v430_v28  ;;  %v406_v32 = vmul.f32 %v807_v14, %v384_v61 }
 0x21c   :  { %v536_v33 = vpop.eup %535  ;;  %443 = vst.msk [vmem:[%s931_s5 + $0x20] sm:$0xff] %vm185_vm1, %v427_v23  ;;  %v413_v34 = vmul.f32 %v807_v14, %v391_v31 }
 0x21d   :  { %v538_v62 = vpop.eup %537  ;;  %v428_v35 = vadd.f32 %v813_v18, %v406_v32  ;;  %v392_v20 = vmul.f32 %v536_v33, %v778_v5 }
 0x21e   :  { %v435_v36 = vadd.f32 %v813_v18, %v413_v34  ;;  %v393_v37 = vmul.f32 %v538_v62, %v792_v8 }
 0x21f   :  { %444 = vst.msk [vmem:[%s931_s5 + $0x28] sm:$0xff] %vm185_vm1, %v428_v35  ;;  %v414_v13 = vmul.f32 %v807_v14, %v392_v20 }
 0x220   :  { %v540_v12 = vpop.eup %539  ;;  %451 = vst.msk [vmem:[%s931_s5 + $0x60] sm:$0xff] %vm185_vm1, %v435_v36  ;;  %v415_v38 = vmul.f32 %v807_v14, %v393_v37 }
 0x221   :  { %v436_v5 = vadd.f32 %v813_v18, %v414_v13  ;;  %v394_v29 = vmul.f32 %v540_v12, %v789_v9 }
 0x222   :  { %v437_v8 = vadd.f32 %v813_v18, %v415_v38 }
 0x223   :  { %452 = vst.msk [vmem:[%s931_s5 + $0x68] sm:$0xff] %vm185_vm1, %v436_v5  ;;  %v416_v41 = vmul.f32 %v807_v14, %v394_v29 }
 0x224   :  { %453 = vst.msk [vmem:[%s931_s5 + $0x70] sm:$0xff] %vm185_vm1, %v437_v8 }
 0x225   :  { %v438_v22 = vadd.f32 %v813_v18, %v416_v41 }
 0x227   :  { %454 = vst.msk [vmem:[%s931_s5 + $0x78] sm:$0xff] %vm185_vm1, %v438_v22 }

// kernel: swinv2_forward.13
= control target key start
LH: loop header
LB: loop body
LE: loop exit
PB: predicated region body
PF: predicated region fallthrough
CT: control target
= control target key end

     0   :  { %vm64_vm0 = vcmask 261120   ;;  %s1565_s1 = inlined_call_operand.vmem [shape: f32[32,128], index: 1, kind: input, shape index: {}]   ;;  %s1566_s0 = inlined_call_operand.vmem [shape: f32[128,32], index: 0, kind: input, shape index: {}]   ;;  %s1567_s3 = inlined_call_operand.vmem [shape: f32[128,32], index: 3, kind: input, shape index: {}]   ;;  %s1568_s2 = inlined_call_operand.vmem [shape: f32[1,128], index: 2, kind: input, shape index: {}]   ;;  %s1569_s4 = inlined_call_operand.vmem [shape: f32[1,32], index: 4, kind: input, shape index: {}]   ;;  %s1570_s5 = inlined_call_operand.vmem [shape: f32[1,32], index: 5, kind: input, shape index: {}]   ;;  %s1571_s6 = inlined_call_operand.vmem [shape: f32[1,32], index: 6, kind: input, shape index: {}]   ;;  %s1572_s7 = inlined_call_operand.vmem [shape: f32[128,32], index: 7, kind: output, shape index: {}]  }
   0x1   :  { %v45_v0 = vld [vmem:[%s1565_s1 + $0x10] sm:$0xff]  ;;  %v46_v1 = vld [vmem:[%s1565_s1 + $0x18] sm:$0xff]  ;;  %v43_v2 = vld [vmem:[%s1565_s1] sm:$0xff] }
   0x2   :  { %v56_v3 = vpack.c.bf16 %v46_v1, %v45_v0  ;;  %v44_v4 = vld [vmem:[%s1565_s1 + $0x8] sm:$0xff]  ;;  %v27_v5 = vld [vmem:[%s1566_s0] sm:$0xff]  ;;  %v29_v9 = vld [vmem:[%s1566_s0 + $0x10] sm:$0xff] }
   0x3   :  { %v28_v6 = vld [vmem:[%s1566_s0 + $0x8] sm:$0xff]  ;;  %v55_v7 = vpack.c.bf16 %v44_v4, %v43_v2  ;;  %v30_v10 = vld [vmem:[%s1566_s0 + $0x18] sm:$0xff]  ;;  %v31_v11 = vld [vmem:[%s1566_s0 + $0x20] sm:$0xff] }
   0x4   :  { %v47_v8 = vpack.c.bf16 %v28_v6, %v27_v5  ;;  %795 = vmatprep.subr.bf16.mxu0 %v56_v3  ;;  %v32_v12 = vld [vmem:[%s1566_s0 + $0x28] sm:$0xff]  ;;  %v48_v13 = vpack.c.bf16 %v30_v10, %v29_v9  ;;  %v33_v15 = vld [vmem:[%s1566_s0 + $0x30] sm:$0xff]  ;;  %v34_v16 = vld [vmem:[%s1566_s0 + $0x38] sm:$0xff] }
   0x5   :  { %796 = vmatpush3.bf16.msra.mxu0 %v56_v3  ;;  %v49_v14 = vpack.c.bf16 %v32_v12, %v31_v11  ;;  %v35_v17 = vld [vmem:[%s1566_s0 + $0x40] sm:$0xff]  ;;  %v36_v18 = vld [vmem:[%s1566_s0 + $0x48] sm:$0xff]  ;;  %v50_v19 = vpack.c.bf16 %v34_v16, %v33_v15  ;;  %v37_v21 = vld [vmem:[%s1566_s0 + $0x50] sm:$0xff] }
   0x6   :  { %799 = vmatprep.mubr.msk.bf16.mxu0 %vm64_vm0, %v47_v8  ;;  %797 = vmatprep.subr.bf16.mxu0 %v55_v7  ;;  %v51_v20 = vpack.c.bf16 %v36_v18, %v35_v17  ;;  %v38_v22 = vld [vmem:[%s1566_s0 + $0x58] sm:$0xff]  ;;  %v39_v23 = vld [vmem:[%s1566_s0 + $0x60] sm:$0xff]  ;;  %v40_v24 = vld [vmem:[%s1566_s0 + $0x68] sm:$0xff] }
   0x7   :  { %v52_v25 = vpack.c.bf16 %v38_v22, %v37_v21  ;;  %v53_v26 = vpack.c.bf16 %v40_v24, %v39_v23  ;;  %v41_v27 = vld [vmem:[%s1566_s0 + $0x70] sm:$0xff]  ;;  %v42_v28 = vld [vmem:[%s1566_s0 + $0x78] sm:$0xff]  ;;  %v342_v33 = vld [vmem:[%s1567_s3 + $0x60] sm:$0xff] }
   0x8   :  { %v54_v29 = vpack.c.bf16 %v42_v28, %v41_v27  ;;  %v344_v30 = vld [vmem:[%s1567_s3 + $0x70] sm:$0xff]  ;;  %v345_v31 = vld [vmem:[%s1567_s3 + $0x78] sm:$0xff]  ;;  %v343_v34 = vld [vmem:[%s1567_s3 + $0x68] sm:$0xff] }
   0x9   :  { %798 = vmatpush3.bf16.msra.mxu0 %v55_v7  ;;  %v361_v32 = vpack.c.bf16 %v345_v31, %v344_v30  ;;  %v360_v35 = vpack.c.bf16 %v343_v34, %v342_v33  ;;  %v340_v36 = vld [vmem:[%s1567_s3 + $0x50] sm:$0xff]  ;;  %v341_v37 = vld [vmem:[%s1567_s3 + $0x58] sm:$0xff]  ;;  %v338_v39 = vld [vmem:[%s1567_s3 + $0x40] sm:$0xff] }
   0xa   :  { %v359_v38 = vpack.c.bf16 %v341_v37, %v340_v36  ;;  %v339_v40 = vld [vmem:[%s1567_s3 + $0x48] sm:$0xff]  ;;  %v336_v42 = vld [vmem:[%s1567_s3 + $0x30] sm:$0xff]  ;;  %v337_v43 = vld [vmem:[%s1567_s3 + $0x38] sm:$0xff] }
   0xb   :  { %815 = vmatprep.subr.bf16.mxu0 %v361_v32  ;;  %847 = vmatprep.subr.bf16.mxu1 %v361_v32  ;;  %v358_v41 = vpack.c.bf16 %v339_v40, %v338_v39  ;;  %v357_v44 = vpack.c.bf16 %v337_v43, %v336_v42  ;;  %v334_v45 = vld [vmem:[%s1567_s3 + $0x20] sm:$0xff]  ;;  %v335_v46 = vld [vmem:[%s1567_s3 + $0x28] sm:$0xff]  ;;  %v332_v48 = vld [vmem:[%s1567_s3 + $0x10] sm:$0xff] }
   0xc   :  { %800 = vmatmul.mubr.msk.bf16.vlgmr.msra.gmra.mxu0 %vm64_vm0, %v48_v13  ;;  %855 = vmatpush3.bf16.msra.mxu1 %v361_v32  ;;  %v356_v47 = vpack.c.bf16 %v335_v46, %v334_v45  ;;  %v333_v49 = vld [vmem:[%s1567_s3 + $0x18] sm:$0xff]  ;;  %v330_v51 = vld [vmem:[%s1567_s3] sm:$0xff]  ;;  %v331_v52 = vld [vmem:[%s1567_s3 + $0x8] sm:$0xff] }
   0xd   :  { %803 = vmatprep.mubr.msk.bf16.mxu0 %vm64_vm0, %v49_v14  ;;  %816 = vmatpush3.bf16.msra.mxu0 %v361_v32  ;;  %v355_v50 = vpack.c.bf16 %v333_v49, %v332_v48  ;;  %v354_v53 = vpack.c.bf16 %v331_v52, %v330_v51  ;;  %v1102_v54 = vld [vmem:[%s1568_s2] ss:$0 sm:$0xff] }
   0xe   :  { %817 = vmatprep.subr.bf16.mxu0 %v360_v35  ;;  %848 = vmatprep.subr.bf16.mxu1 %v360_v35 }
  0x10   :  { %856 = vmatpush3.bf16.msra.mxu1 %v360_v35 }
  0x11   :  { %818 = vmatpush3.bf16.msra.mxu0 %v360_v35  ;;  %849 = vmatprep.subr.bf16.mxu1 %v359_v38 }
  0x12   :  { %819 = vmatprep.subr.bf16.mxu0 %v359_v38 }
  0x14   :  { %804 = vmatmul.mubr.msk.bf16.gmra.mxu0 %vm64_vm0, %v50_v19  ;;  %857 = vmatpush3.bf16.msra.mxu1 %v359_v38 }
  0x15   :  { %807 = vmatprep.mubr.msk.bf16.mxu0 %vm64_vm0, %v51_v20  ;;  %820 = vmatpush3.bf16.msra.mxu0 %v359_v38 }
  0x16   :  { %821 = vmatprep.subr.bf16.mxu0 %v358_v41  ;;  %850 = vmatprep.subr.bf16.mxu1 %v358_v41 }
  0x18   :  { %858 = vmatpush3.bf16.msra.mxu1 %v358_v41 }
  0x19   :  { %822 = vmatpush3.bf16.msra.mxu0 %v358_v41  ;;  %851 = vmatprep.subr.bf16.mxu1 %v357_v44 }
  0x1a   :  { %823 = vmatprep.subr.bf16.mxu0 %v357_v44 }
  0x1c   :  { %808 = vmatmul.mubr.msk.bf16.gmra.mxu0 %vm64_vm0, %v52_v25  ;;  %859 = vmatpush3.bf16.msra.mxu1 %v357_v44 }
  0x1d   :  { %811 = vmatprep.mubr.msk.bf16.mxu0 %vm64_vm0, %v53_v26  ;;  %824 = vmatpush3.bf16.msra.mxu0 %v357_v44 }
  0x1e   :  { %825 = vmatprep.subr.bf16.mxu0 %v356_v47  ;;  %852 = vmatprep.subr.bf16.mxu1 %v356_v47 }
  0x20   :  { %860 = vmatpush3.bf16.msra.mxu1 %v356_v47 }
  0x21   :  { %826 = vmatpush3.bf16.msra.mxu0 %v356_v47  ;;  %853 = vmatprep.subr.bf16.mxu1 %v355_v50 }
  0x22   :  { %827 = vmatprep.subr.bf16.mxu0 %v355_v50 }
  0x24   :  { %812 = vmatmul.mubr.msk.bf16.gmra.mxu0 %vm64_vm0, %v54_v29  ;;  %861 = vmatpush3.bf16.msra.mxu1 %v355_v50 }
  0x25   :  { %828 = vmatpush3.bf16.msra.mxu0 %v355_v50  ;;  %854 = vmatprep.subr.bf16.mxu1 %v354_v53 }
  0x26   :  { %829 = vmatprep.subr.bf16.mxu0 %v354_v53 }
  0x28   :  { %862 = vmatpush3.bf16.msra.mxu1 %v354_v53 }
  0x29   :  { %830 = vmatpush3.bf16.msra.mxu0 %v354_v53 }
  0xcc   :  { %v801_v55 = vpop.f32.mrf.mxu0 }
  0xcd   :  { %v1105_v56 = vadd.f32 %v801_v55, %v1102_v54 }
  0xce   :  { %v123_v57 = vpop.f32.mrf.mxu0 }
  0xcf   :  { %v188_v58 = vmul.f32 %v1105_v56, %v1105_v56  ;;  %v1110_v59 = vadd.f32 %v1102_v54, %v123_v57 }
  0xd0   :  { %v802_v60 = vpop.f32.mrf.mxu0 }
  0xd1   :  { %v204_v61 = vmul.f32 %v188_v58, %v1105_v56  ;;  %v186_v62 = vmul.f32 %v1110_v59, %v1110_v59  ;;  %v1116_v63 = vadd.f32 %v802_v60, %v1102_v54 }
  0xd2   :  { %v126_v0 = vpop.f32.mrf.mxu0 }
  0xd3   :  { %v220_v1 = vmul.f32 0.044715, %v204_v61  ;;  %v202_v2 = vmul.f32 %v186_v62, %v1110_v59  ;;  %v189_v3 = vmul.f32 %v1116_v63, %v1116_v63  ;;  %v1122_v4 = vadd.f32 %v1102_v54, %v126_v0 }
  0xd4   :  { %v805_v5 = vpop.f32.mrf.mxu0 }
  0xd5   :  { %v236_v6 = vadd.f32 %v220_v1, %v1105_v56  ;;  %v218_v7 = vmul.f32 0.044715, %v202_v2  ;;  %v205_v8 = vmul.f32 %v189_v3, %v1116_v63  ;;  %v187_v9 = vmul.f32 %v1122_v4, %v1122_v4 }
  0xd6   :  { %v1129_v10 = vadd.f32 %v805_v5, %v1102_v54  ;;  %v139_v11 = vpop.f32.mrf.mxu0 }
  0xd7   :  { %v252_v12 = vmul.f32 0.7978846, %v236_v6  ;;  %v234_v13 = vadd.f32 %v218_v7, %v1110_v59  ;;  %v221_v14 = vmul.f32 0.044715, %v205_v8  ;;  %v203_v15 = vmul.f32 %v187_v9, %v1122_v4 }
  0xd8   :  { %v192_v16 = vmul.f32 %v1129_v10, %v1129_v10  ;;  %v1136_v17 = vadd.f32 %v1102_v54, %v139_v11  ;;  %v806_v18 = vpop.f32.mrf.mxu0 }
  0xd9   :  { %863 = vtanh.f32 %v252_v12  ;;  %v250_v19 = vmul.f32 0.7978846, %v234_v13  ;;  %v237_v20 = vadd.f32 %v221_v14, %v1116_v63  ;;  %v219_v21 = vmul.f32 0.044715, %v203_v15 }
  0xda   :  { %v208_v22 = vmul.f32 %v192_v16, %v1129_v10  ;;  %v190_v23 = vmul.f32 %v1136_v17, %v1136_v17  ;;  %v1143_v24 = vadd.f32 %v806_v18, %v1102_v54  ;;  %v142_v25 = vpop.f32.mrf.mxu0 }
  0xdb   :  { %v253_v26 = vmul.f32 0.7978846, %v237_v20  ;;  %v235_v27 = vadd.f32 %v219_v21, %v1122_v4  ;;  %v1147_v28 = vadd.f32 %v1102_v54, %v142_v25  ;;  %865 = vtanh.f32 %v250_v19 }
  0xdc   :  { %v224_v29 = vmul.f32 0.044715, %v208_v22  ;;  %v206_v30 = vmul.f32 %v190_v23, %v1136_v17  ;;  %v193_v31 = vmul.f32 %v1143_v24, %v1143_v24  ;;  %v809_v32 = vpop.f32.mrf.mxu0 }
  0xdd   :  { %867 = vtanh.f32 %v253_v26  ;;  %v251_v33 = vmul.f32 0.7978846, %v235_v27  ;;  %v191_v34 = vmul.f32 %v1147_v28, %v1147_v28  ;;  %v1155_v35 = vadd.f32 %v809_v32, %v1102_v54 }
  0xde   :  { %v240_v36 = vadd.f32 %v224_v29, %v1129_v10  ;;  %v222_v37 = vmul.f32 0.044715, %v206_v30  ;;  %v209_v38 = vmul.f32 %v193_v31, %v1143_v24  ;;  %v155_v39 = vpop.f32.mrf.mxu0 }
  0xdf   :  { %869 = vtanh.f32 %v251_v33  ;;  %v207_v40 = vmul.f32 %v191_v34, %v1147_v28  ;;  %v196_v41 = vmul.f32 %v1155_v35, %v1155_v35  ;;  %v1163_v42 = vadd.f32 %v1102_v54, %v155_v39 }
  0xe0   :  { %v256_v43 = vmul.f32 0.7978846, %v240_v36  ;;  %v238_v44 = vadd.f32 %v222_v37, %v1136_v17  ;;  %v225_v45 = vmul.f32 0.044715, %v209_v38  ;;  %v810_v46 = vpop.f32.mrf.mxu0 }
  0xe1   :  { %v223_v47 = vmul.f32 0.044715, %v207_v40  ;;  %v212_v48 = vmul.f32 %v196_v41, %v1155_v35  ;;  %v194_v49 = vmul.f32 %v1163_v42, %v1163_v42  ;;  %v1170_v50 = vadd.f32 %v810_v46, %v1102_v54 }
  0xe2   :  { %871 = vtanh.f32 %v256_v43  ;;  %v241_v51 = vadd.f32 %v225_v45, %v1143_v24  ;;  %v158_v52 = vpop.f32.mrf.mxu0  ;;  %v254_v53 = vmul.f32 0.7978846, %v238_v44 }
  0xe3   :  { %v239_v55 = vadd.f32 %v223_v47, %v1147_v28  ;;  %v228_v57 = vmul.f32 0.044715, %v212_v48  ;;  %v210_v58 = vmul.f32 %v194_v49, %v1163_v42  ;;  %v197_v60 = vmul.f32 %v1170_v50, %v1170_v50 }
  0xe4   :  { %v257_v61 = vmul.f32 0.7978846, %v241_v51  ;;  %v1178_v62 = vadd.f32 %v1102_v54, %v158_v52  ;;  %v813_v0 = vpop.f32.mrf.mxu0  ;;  %873 = vtanh.f32 %v254_v53 }
  0xe5   :  { %v244_v1 = vadd.f32 %v228_v57, %v1155_v35  ;;  %v226_v2 = vmul.f32 0.044715, %v210_v58  ;;  %v213_v3 = vmul.f32 %v197_v60, %v1170_v50  ;;  %v1183_v5 = vadd.f32 %v813_v0, %v1102_v54 }
  0xe6   :  { %v864_v6 = vpop.eup %863  ;;  %875 = vtanh.f32 %v257_v61  ;;  %v195_v7 = vmul.f32 %v1178_v62, %v1178_v62  ;;  %v171_v8 = vpop.f32.mrf.mxu0  ;;  %v255_v9 = vmul.f32 0.7978846, %v239_v55 }
  0xe7   :  { %v284_v11 = vadd.f32 1.0, %v864_v6  ;;  %v260_v12 = vmul.f32 0.7978846, %v244_v1  ;;  %v242_v13 = vadd.f32 %v226_v2, %v1163_v42  ;;  %v229_v14 = vmul.f32 0.044715, %v213_v3 }
  0xe8   :  { %v211_v15 = vmul.f32 %v195_v7, %v1178_v62  ;;  %v200_v16 = vmul.f32 %v1183_v5, %v1183_v5  ;;  %v1192_v18 = vadd.f32 %v1102_v54, %v171_v8  ;;  %v814_v19 = vpop.f32.mrf.mxu0  ;;  %877 = vtanh.f32 %v255_v9  ;;  %v866_v20 = vpop.eup %865 }
  0xe9   :  { %879 = vtanh.f32 %v260_v12  ;;  %v258_v21 = vmul.f32 0.7978846, %v242_v13  ;;  %v245_v22 = vadd.f32 %v229_v14, %v1170_v50  ;;  %v1199_v29 = vadd.f32 %v814_v19, %v1102_v54 }
  0xea   :  { %v868_v23 = vpop.eup %867  ;;  %v227_v25 = vmul.f32 0.044715, %v211_v15  ;;  %v216_v26 = vmul.f32 %v200_v16, %v1183_v5  ;;  %v198_v27 = vmul.f32 %v1192_v18, %v1192_v18  ;;  %v174_v30 = vpop.f32.mrf.mxu0  ;;  %v300_v31 = vmul.f32 0.5, %v284_v11 }
  0xeb   :  { %v285_v32 = vadd.f32 1.0, %v868_v23  ;;  %881 = vtanh.f32 %v258_v21  ;;  %v261_v33 = vmul.f32 0.7978846, %v245_v22  ;;  %v201_v39 = vmul.f32 %v1199_v29, %v1199_v29 }
  0xec   :  { %v870_v34 = vpop.eup %869  ;;  %v243_v36 = vadd.f32 %v227_v25, %v1178_v62  ;;  %v232_v37 = vmul.f32 0.044715, %v216_v26  ;;  %v214_v38 = vmul.f32 %v198_v27, %v1192_v18  ;;  %v1206_v41 = vadd.f32 %v1102_v54, %v174_v30 }
  0xed   :  { %v301_v40 = vmul.f32 0.5, %v285_v32  ;;  %883 = vtanh.f32 %v261_v33  ;;  %v282_v43 = vadd.f32 1.0, %v866_v20  ;;  %v217_v47 = vmul.f32 %v201_v39, %v1199_v29 }
  0xee   :  { %v259_v44 = vmul.f32 0.7978846, %v243_v36  ;;  %v248_v45 = vadd.f32 %v232_v37, %v1183_v5  ;;  %v230_v46 = vmul.f32 0.044715, %v214_v38  ;;  %v199_v49 = vmul.f32 %v1206_v41, %v1206_v41 }
  0xef   :  { %v872_v48 = vpop.eup %871  ;;  %v283_v51 = vadd.f32 1.0, %v870_v34  ;;  %v298_v52 = vmul.f32 0.5, %v282_v43  ;;  %v233_v57 = vmul.f32 0.044715, %v217_v47  ;;  %v316_v58 = vmul.f32 %v300_v31, %v1105_v56 }
  0xf0   :  { %885 = vtanh.f32 %v259_v44  ;;  %v264_v53 = vmul.f32 0.7978846, %v248_v45  ;;  %v246_v55 = vadd.f32 %v230_v46, %v1192_v18  ;;  %v317_v60 = vmul.f32 %v301_v40, %v1116_v63 }
  0xf1   :  { %v874_v54 = vpop.eup %873  ;;  %v215_v61 = vmul.f32 %v199_v49, %v1206_v41  ;;  %v299_v0 = vmul.f32 0.5, %v283_v51  ;;  %v249_v2 = vadd.f32 %v233_v57, %v1199_v29  ;;  %v314_v3 = vmul.f32 %v298_v52, %v1110_v59 }
  0xf2   :  { %v262_v1 = vmul.f32 0.7978846, %v246_v55  ;;  %v286_v6 = vadd.f32 1.0, %v874_v54  ;;  %887 = vtanh.f32 %v264_v53  ;;  %v288_v11 = vadd.f32 1.0, %v872_v48 }
  0xf3   :  { %v876_v7 = vpop.eup %875  ;;  %v231_v8 = vmul.f32 0.044715, %v215_v61  ;;  %v315_v9 = vmul.f32 %v299_v0, %v1122_v4  ;;  %v265_v12 = vmul.f32 0.7978846, %v249_v2  ;;  %v347_v63 = vpack.c.bf16 %v317_v60, %v316_v58 }
  0xf4   :  { %889 = vtanh.f32 %v262_v1  ;;  %v289_v56 = vadd.f32 1.0, %v876_v7  ;;  %v302_v20 = vmul.f32 0.5, %v286_v6  ;;  %v304_v22 = vmul.f32 0.5, %v288_v11 }
  0xf5   :  { %v878_v13 = vpop.eup %877  ;;  %v247_v14 = vadd.f32 %v231_v8, %v1206_v41  ;;  %v346_v15 = vpack.c.bf16 %v315_v9, %v314_v3  ;;  %891 = vtanh.f32 %v265_v12  ;;  %v766_v3 = vld [vmem:[%s1569_s4] ss:$0 sm:$0xff] }
  0xf6   :  { %v880_v16 = vpop.eup %879  ;;  %v287_v19 = vadd.f32 1.0, %v878_v13  ;;  %v305_v59 = vmul.f32 0.5, %v289_v56  ;;  %v318_v27 = vmul.f32 %v302_v20, %v1136_v17  ;;  %v320_v32 = vmul.f32 %v304_v22, %v1129_v10 }
  0xf7   :  { %v263_v21 = vmul.f32 0.7978846, %v247_v14  ;;  %831 = vmatprep.mubr.bf16.mxu0 %v346_v15  ;;  %v292_v33 = vadd.f32 1.0, %v880_v16 }
  0xf8   :  { %v882_v23 = vpop.eup %881  ;;  %832 = vmatmul.mubr.bf16.vlgmr.msra.gmra.mxu0 %v347_v63  ;;  %v303_v4 = vmul.f32 0.5, %v287_v19  ;;  %v321_v25 = vmul.f32 %v305_v59, %v1143_v24 }
  0xf9   :  { %893 = vtanh.f32 %v263_v21  ;;  %v290_v31 = vadd.f32 1.0, %v882_v23  ;;  %v308_v44 = vmul.f32 0.5, %v292_v33 }
  0xfa   :  { %v884_v26 = vpop.eup %883  ;;  %v319_v30 = vmul.f32 %v303_v4, %v1147_v28  ;;  %v349_v38 = vpack.c.bf16 %v321_v25, %v320_v32 }
  0xfb   :  { %v293_v34 = vadd.f32 1.0, %v884_v26  ;;  %v306_v43 = vmul.f32 0.5, %v290_v31  ;;  %v324_v48 = vmul.f32 %v308_v44, %v1155_v35 }
  0xfc   :  { %v348_v36 = vpack.c.bf16 %v319_v30, %v318_v27 }
  0xfd   :  { %v886_v37 = vpop.eup %885  ;;  %v309_v39 = vmul.f32 0.5, %v293_v34  ;;  %v322_v28 = vmul.f32 %v306_v43, %v1163_v42 }
  0xfe   :  { %835 = vmatprep.mubr.bf16.mxu1 %v348_v36  ;;  %v291_v40 = vadd.f32 1.0, %v886_v37 }
  0xff   :  { %836 = vmatmul.mubr.bf16.vlgmr.msra.gmra.mxu1 %v349_v38  ;;  %v888_v24 = vpop.eup %887  ;;  %v325_v17 = vmul.f32 %v309_v39, %v1170_v50 }
 0x100   :  { %v307_v45 = vmul.f32 0.5, %v291_v40  ;;  %v296_v52 = vadd.f32 1.0, %v888_v24 }
 0x101   :  { %v890_v46 = vpop.eup %889  ;;  %v351_v55 = vpack.c.bf16 %v325_v17, %v324_v48 }
 0x102   :  { %v323_v10 = vmul.f32 %v307_v45, %v1178_v62  ;;  %v892_v47 = vpop.eup %891  ;;  %v294_v49 = vadd.f32 1.0, %v890_v46  ;;  %v312_v61 = vmul.f32 0.5, %v296_v52 }
 0x103   :  { %v297_v53 = vadd.f32 1.0, %v892_v47 }
 0x104   :  { %v350_v51 = vpack.c.bf16 %v323_v10, %v322_v28  ;;  %v310_v60 = vmul.f32 0.5, %v294_v49  ;;  %v328_v35 = vmul.f32 %v312_v61, %v1183_v5 }
 0x105   :  { %v313_v54 = vmul.f32 0.5, %v297_v53 }
 0x106   :  { %v894_v57 = vpop.eup %893  ;;  %839 = vmatprep.mubr.bf16.mxu1 %v350_v51  ;;  %v326_v62 = vmul.f32 %v310_v60, %v1192_v18 }
 0x107   :  { %840 = vmatmul.mubr.bf16.gmra.mxu1 %v351_v55  ;;  %v295_v58 = vadd.f32 1.0, %v894_v57  ;;  %v329_v42 = vmul.f32 %v313_v54, %v1199_v29 }
 0x109   :  { %v311_v50 = vmul.f32 0.5, %v295_v58  ;;  %v353_v2 = vpack.c.bf16 %v329_v42, %v328_v35 }
 0x10b   :  { %v327_v0 = vmul.f32 %v311_v50, %v1206_v41 }
 0x10d   :  { %v352_v1 = vpack.c.bf16 %v327_v0, %v326_v62 }
 0x10f   :  { %843 = vmatprep.mubr.bf16.mxu1 %v352_v1 }
 0x110   :  { %844 = vmatmul.mubr.bf16.gmra.mxu1 %v353_v2 }
 0x1b8   :  { %v833_v6 = vpop.f32.mrf.mxu0 }
 0x1b9   :  { %v1235_v7 = vadd.f32 %v833_v6, %v766_v3 }
 0x1ba   :  { %v403_v8 = vpop.f32.mrf.mxu0 }
 0x1bb   :  { %v1237_v9 = vadd.f32 %v766_v3, %v403_v8  ;;  %v474_v18 = vsel %vm64_vm0, %v1235_v7, 0.0 }
 0x1bc   :  { %475 = vadd.xlane.f32.xlu1 %v474_v18  ;;  %v834_v29 = vpop.f32.mrf.mxu0 }
 0x1bd   :  { %v1241_v5 = vadd.f32 %v834_v29, %v766_v3  ;;  %v468_v41 = vsel %vm64_vm0, %v1237_v9, 0.0 }
 0x1be   :  { %v406_v11 = vpop.f32.mrf.mxu0  ;;  %469 = vadd.xlane.f32.xlu0 %v468_v41 }
 0x1bf   :  { %v1245_v12 = vadd.f32 %v766_v3, %v406_v11  ;;  %v837_v56 = vpop.f32.mrf.mxu1  ;;  %v477_v13 = vsel %vm64_vm0, %v1241_v5, 0.0 }
 0x1c0   :  { %478 = vadd.xlane.f32.xlu1 %v477_v13  ;;  %v1249_v63 = vadd.f32 %v837_v56, %v766_v3 }
 0x1c1   :  { %v419_v14 = vpop.f32.mrf.mxu1  ;;  %v471_v15 = vsel %vm64_vm0, %v1245_v12, 0.0 }
 0x1c2   :  { %472 = vadd.xlane.f32.xlu0 %v471_v15  ;;  %v1255_v20 = vadd.f32 %v766_v3, %v419_v14  ;;  %v486_v21 = vsel %vm64_vm0, %v1249_v63, 0.0 }
 0x1c3   :  { %v838_v16 = vpop.f32.mrf.mxu1 }
 0x1c4   :  { %v1253_v19 = vadd.f32 %v838_v16, %v766_v3  ;;  %v480_v27 = vsel %vm64_vm0, %v1255_v20, 0.0 }
 0x1c5   :  { %v422_v59 = vpop.f32.mrf.mxu1 }
 0x1c6   :  { %v1259_v22 = vadd.f32 %v766_v3, %v422_v59  ;;  %487 = vadd.xlane.f32.xlu0 %v486_v21  ;;  %v489_v23 = vsel %vm64_vm0, %v1253_v19, 0.0 }
 0x1c7   :  { %v841_v4 = vpop.f32.mrf.mxu1  ;;  %490 = vadd.xlane.f32.xlu1 %v489_v23 }
 0x1c8   :  { %v1263_v25 = vadd.f32 %v841_v4, %v766_v3  ;;  %v483_v30 = vsel %vm64_vm0, %v1259_v22, 0.0 }
 0x1c9   :  { %v435_v26 = vpop.f32.mrf.mxu1 }
 0x1ca   :  { %481 = vadd.xlane.f32.xlu0 %v480_v27  ;;  %v1271_v33 = vadd.f32 %v766_v3, %v435_v26  ;;  %v498_v36 = vsel %vm64_vm0, %v1263_v25, 0.0 }
 0x1cb   :  { %v842_v31 = vpop.f32.mrf.mxu1  ;;  %484 = vadd.xlane.f32.xlu1 %v483_v30 }
 0x1cc   :  { %v1269_v32 = vadd.f32 %v842_v31, %v766_v3  ;;  %v492_v40 = vsel %vm64_vm0, %v1271_v33, 0.0 }
 0x1cd   :  { %v438_v34 = vpop.f32.mrf.mxu1 }
 0x1ce   :  { %v1275_v37 = vadd.f32 %v766_v3, %v438_v34  ;;  %499 = vadd.xlane.f32.xlu0 %v498_v36  ;;  %v501_v38 = vsel %vm64_vm0, %v1269_v32, 0.0 }
 0x1cf   :  { %502 = vadd.xlane.f32.xlu1 %v501_v38 }
 0x1d0   :  { %v845_v39 = vpop.f32.mrf.mxu1  ;;  %v495_v44 = vsel %vm64_vm0, %v1275_v37, 0.0 }
 0x1d1   :  { %v1285_v46 = vadd.f32 %v845_v39, %v766_v3 }
 0x1d2   :  { %v451_v43 = vpop.f32.mrf.mxu1  ;;  %493 = vadd.xlane.f32.xlu0 %v492_v40 }
 0x1d3   :  { %v1283_v24 = vadd.f32 %v766_v3, %v451_v43  ;;  %496 = vadd.xlane.f32.xlu1 %v495_v44  ;;  %v510_v49 = vsel %vm64_vm0, %v1285_v46, 0.0 }
 0x1d4   :  { %v846_v45 = vpop.f32.mrf.mxu1 }
 0x1d5   :  { %v504_v17 = vsel %vm64_vm0, %v1283_v24, 0.0  ;;  %v1291_v47 = vadd.f32 %v846_v45, %v766_v3 }
 0x1d6   :  { %v454_v28 = vpop.f32.mrf.mxu1  ;;  %505 = vadd.xlane.f32.xlu0 %v504_v17 }
 0x1d7   :  { %v1289_v10 = vadd.f32 %v766_v3, %v454_v28  ;;  %v513_v51 = vsel %vm64_vm0, %v1291_v47, 0.0 }
 0x1d9   :  { %v507_v48 = vsel %vm64_vm0, %v1289_v10, 0.0 }
 0x1da   :  { %508 = vadd.xlane.f32.xlu1 %v507_v48  ;;  %511 = vadd.xlane.f32.xlu0 %v510_v49 }
 0x1de   :  { %514 = vadd.xlane.f32.xlu1 %v513_v51 }
 0x245   :  { %v476_v52 = vpop.xlane.xlu1 %475 }
 0x246   :  { %v519_v53 = vmul.f32 0.03125, %v476_v52 }
 0x247   :  { %v470_v55 = vpop.xlane.xlu0 %469 }
 0x248   :  { %v1300_v57 = vsub.f32 %v1235_v7, %v519_v53  ;;  %v517_v54 = vmul.f32 0.03125, %v470_v55 }
 0x249   :  { %v479_v58 = vpop.xlane.xlu1 %478 }
 0x24a   :  { %v1303_v60 = vsub.f32 %v1237_v9, %v517_v54  ;;  %v520_v61 = vmul.f32 0.03125, %v479_v58  ;;  %v551_v50 = vmul.f32 %v1300_v57, %v1300_v57 }
 0x24b   :  { %v473_v42 = vpop.xlane.xlu0 %472 }
 0x24c   :  { %v1308_v62 = vsub.f32 %v1241_v5, %v520_v61  ;;  %v518_v0 = vmul.f32 0.03125, %v473_v42  ;;  %v571_v35 = vsel %vm64_vm0, %v551_v50, 0.0  ;;  %v549_v1 = vmul.f32 %v1303_v60, %v1303_v60 }
 0x24d   :  { %572 = vadd.xlane.f32.xlu0 %v571_v35 }
 0x24e   :  { %v1314_v2 = vsub.f32 %v1245_v12, %v518_v0  ;;  %v552_v3 = vmul.f32 %v1308_v62, %v1308_v62  ;;  %v565_v18 = vsel %vm64_vm0, %v549_v1, 0.0 }
 0x24f   :  { %v488_v6 = vpop.xlane.xlu0 %487 }
 0x250   :  { %v523_v7 = vmul.f32 0.03125, %v488_v6  ;;  %v574_v8 = vsel %vm64_vm0, %v552_v3, 0.0  ;;  %v491_v9 = vpop.xlane.xlu1 %490  ;;  %v550_v29 = vmul.f32 %v1314_v2, %v1314_v2 }
 0x251   :  { %575 = vadd.xlane.f32.xlu1 %v574_v8  ;;  %v524_v5 = vmul.f32 0.03125, %v491_v9  ;;  %566 = vadd.xlane.f32.xlu0 %v565_v18 }
 0x252   :  { %v1323_v41 = vsub.f32 %v1249_v63, %v523_v7  ;;  %v568_v14 = vsel %vm64_vm0, %v550_v29, 0.0 }
 0x253   :  { %v1326_v11 = vsub.f32 %v1253_v19, %v524_v5  ;;  %v482_v12 = vpop.xlane.xlu0 %481 }
 0x254   :  { %v521_v56 = vmul.f32 0.03125, %v482_v12  ;;  %v485_v13 = vpop.xlane.xlu1 %484  ;;  %v555_v15 = vmul.f32 %v1323_v41, %v1323_v41 }
 0x255   :  { %v522_v16 = vmul.f32 0.03125, %v485_v13  ;;  %569 = vadd.xlane.f32.xlu1 %v568_v14  ;;  %v556_v59 = vmul.f32 %v1326_v11, %v1326_v11 }
 0x256   :  { %v1334_v21 = vsub.f32 %v1255_v20, %v521_v56  ;;  %v583_v63 = vsel %vm64_vm0, %v555_v15, 0.0 }
 0x257   :  { %v1338_v19 = vsub.f32 %v1259_v22, %v522_v16  ;;  %584 = vadd.xlane.f32.xlu0 %v583_v63  ;;  %v500_v23 = vpop.xlane.xlu0 %499  ;;  %v586_v4 = vsel %vm64_vm0, %v556_v59, 0.0 }
 0x258   :  { %v527_v26 = vmul.f32 0.03125, %v500_v23  ;;  %v503_v27 = vpop.xlane.xlu1 %502  ;;  %v553_v30 = vmul.f32 %v1334_v21, %v1334_v21 }
 0x259   :  { %v528_v31 = vmul.f32 0.03125, %v503_v27  ;;  %587 = vadd.xlane.f32.xlu1 %v586_v4  ;;  %v554_v20 = vmul.f32 %v1338_v19, %v1338_v19 }
 0x25a   :  { %v1346_v34 = vsub.f32 %v1263_v25, %v527_v26  ;;  %v577_v22 = vsel %vm64_vm0, %v553_v30, 0.0 }
 0x25b   :  { %v1350_v36 = vsub.f32 %v1269_v32, %v528_v31  ;;  %578 = vadd.xlane.f32.xlu0 %v577_v22  ;;  %v494_v38 = vpop.xlane.xlu0 %493  ;;  %v580_v39 = vsel %vm64_vm0, %v554_v20, 0.0 }
 0x25c   :  { %v525_v40 = vmul.f32 0.03125, %v494_v38  ;;  %v497_v43 = vpop.xlane.xlu1 %496  ;;  %v559_v44 = vmul.f32 %v1346_v34, %v1346_v34 }
 0x25d   :  { %v526_v45 = vmul.f32 0.03125, %v497_v43  ;;  %581 = vadd.xlane.f32.xlu1 %v580_v39  ;;  %v560_v25 = vmul.f32 %v1350_v36, %v1350_v36 }
 0x25e   :  { %v1358_v17 = vsub.f32 %v1271_v33, %v525_v40  ;;  %v595_v32 = vsel %vm64_vm0, %v559_v44, 0.0 }
 0x25f   :  { %v1362_v28 = vsub.f32 %v1275_v37, %v526_v45  ;;  %596 = vadd.xlane.f32.xlu0 %v595_v32  ;;  %v506_v48 = vpop.xlane.xlu0 %505  ;;  %v598_v49 = vsel %vm64_vm0, %v560_v25, 0.0  ;;  %v1398_v45 = vld [vmem:[%s1570_s5] ss:$0 sm:$0xff] }
 0x260   :  { %v529_v51 = vmul.f32 0.03125, %v506_v48  ;;  %v557_v52 = vmul.f32 %v1358_v17, %v1358_v17 }
 0x261   :  { %599 = vadd.xlane.f32.xlu1 %v598_v49  ;;  %v558_v53 = vmul.f32 %v1362_v28, %v1362_v28 }
 0x262   :  { %v1370_v33 = vsub.f32 %v1283_v24, %v529_v51  ;;  %v589_v55 = vsel %vm64_vm0, %v557_v52, 0.0  ;;  %v1404_v51 = vld [vmem:[%s1571_s6] ss:$0 sm:$0xff] }
 0x263   :  { %v509_v54 = vpop.xlane.xlu1 %508  ;;  %590 = vadd.xlane.f32.xlu0 %v589_v55  ;;  %v512_v37 = vpop.xlane.xlu0 %511  ;;  %v592_v58 = vsel %vm64_vm0, %v558_v53, 0.0 }
 0x264   :  { %v530_v61 = vmul.f32 0.03125, %v509_v54  ;;  %v531_v50 = vmul.f32 0.03125, %v512_v37  ;;  %v561_v42 = vmul.f32 %v1370_v33, %v1370_v33 }
 0x265   :  { %593 = vadd.xlane.f32.xlu1 %v592_v58 }
 0x266   :  { %v1377_v0 = vsub.f32 %v1289_v10, %v530_v61  ;;  %v1380_v35 = vsub.f32 %v1285_v46, %v531_v50  ;;  %v601_v24 = vsel %vm64_vm0, %v561_v42, 0.0 }
 0x267   :  { %v515_v1 = vpop.xlane.xlu1 %514  ;;  %602 = vadd.xlane.f32.xlu0 %v601_v24 }
 0x268   :  { %v532_v3 = vmul.f32 0.03125, %v515_v1  ;;  %v562_v6 = vmul.f32 %v1377_v0, %v1377_v0  ;;  %v563_v7 = vmul.f32 %v1380_v35, %v1380_v35 }
 0x26a   :  { %v1388_v8 = vsub.f32 %v1291_v47, %v532_v3  ;;  %v604_v10 = vsel %vm64_vm0, %v562_v6, 0.0  ;;  %v607_v9 = vsel %vm64_vm0, %v563_v7, 0.0  ;;  %v927_v6 = vld [vmem:[%s1566_s0 + $0x10] sm:$0xff] }
 0x26b   :  { %605 = vadd.xlane.f32.xlu1 %v604_v10  ;;  %608 = vadd.xlane.f32.xlu0 %v607_v9 }
 0x26c   :  { %v564_v46 = vmul.f32 %v1388_v8, %v1388_v8 }
 0x26e   :  { %v610_v18 = vsel %vm64_vm0, %v564_v46, 0.0 }
 0x26f   :  { %611 = vadd.xlane.f32.xlu1 %v610_v18 }
 0x2d6   :  { %v573_v29 = vpop.xlane.xlu0 %572 }
 0x2d7   :  { %v615_v5 = vmul.f32 0.03125, %v573_v29 }
 0x2d9   :  { %v631_v12 = vadd.f32 1e-05, %v615_v5 }
 0x2da   :  { %v576_v56 = vpop.xlane.xlu1 %575  ;;  %v567_v13 = vpop.xlane.xlu0 %566 }
 0x2db   :  { %895 = vrsqrt.f32 %v631_v12  ;;  %v616_v47 = vmul.f32 0.03125, %v576_v56  ;;  %v613_v14 = vmul.f32 0.03125, %v567_v13 }
 0x2dd   :  { %v632_v15 = vadd.f32 1e-05, %v616_v47  ;;  %v629_v16 = vadd.f32 1e-05, %v613_v14  ;;  %v928_v14 = vld [vmem:[%s1566_s0 + $0x18] sm:$0xff] }
 0x2de   :  { %v570_v59 = vpop.xlane.xlu1 %569 }
 0x2df   :  { %897 = vrsqrt.f32 %v632_v15  ;;  %v614_v63 = vmul.f32 0.03125, %v570_v59 }
 0x2e0   :  { %899 = vrsqrt.f32 %v629_v16  ;;  %v585_v23 = vpop.xlane.xlu0 %584 }
 0x2e1   :  { %v630_v4 = vadd.f32 1e-05, %v614_v63  ;;  %v619_v26 = vmul.f32 0.03125, %v585_v23 }
 0x2e2   :  { %v588_v27 = vpop.xlane.xlu1 %587 }
 0x2e3   :  { %901 = vrsqrt.f32 %v630_v4  ;;  %v635_v30 = vadd.f32 1e-05, %v619_v26  ;;  %v620_v31 = vmul.f32 0.03125, %v588_v27 }
 0x2e4   :  { %v579_v20 = vpop.xlane.xlu0 %578 }
 0x2e5   :  { %903 = vrsqrt.f32 %v635_v30  ;;  %v636_v22 = vadd.f32 1e-05, %v620_v31  ;;  %v617_v38 = vmul.f32 0.03125, %v579_v20 }
 0x2e6   :  { %v582_v39 = vpop.xlane.xlu1 %581 }
 0x2e7   :  { %905 = vrsqrt.f32 %v636_v22  ;;  %v633_v40 = vadd.f32 1e-05, %v617_v38  ;;  %v618_v43 = vmul.f32 0.03125, %v582_v39  ;;  %v930_v39 = vld [vmem:[%s1566_s0 + $0x8] sm:$0xff] }
 0x2e8   :  { %v896_v44 = vpop.eup %895  ;;  %v597_v25 = vpop.xlane.xlu0 %596 }
 0x2e9   :  { %v663_v32 = vmul.f32 %v896_v44, %v1300_v57  ;;  %907 = vrsqrt.f32 %v633_v40  ;;  %v634_v48 = vadd.f32 1e-05, %v618_v43  ;;  %v623_v49 = vmul.f32 0.03125, %v597_v25 }
 0x2ea   :  { %v600_v52 = vpop.xlane.xlu1 %599 }
 0x2eb   :  { %v685_v53 = vmul.f32 %v1398_v45, %v663_v32  ;;  %909 = vrsqrt.f32 %v634_v48  ;;  %v639_v55 = vadd.f32 1e-05, %v623_v49  ;;  %v624_v54 = vmul.f32 0.03125, %v600_v52  ;;  %v931_v52 = vld [vmem:[%s1566_s0 + $0x30] sm:$0xff] }
 0x2ec   :  { %v898_v37 = vpop.eup %897  ;;  %v591_v58 = vpop.xlane.xlu0 %590 }
 0x2ed   :  { %v900_v61 = vpop.eup %899  ;;  %v707_v50 = vadd.f32 %v1404_v51, %v685_v53  ;;  %v664_v57 = vmul.f32 %v898_v37, %v1308_v62  ;;  %911 = vrsqrt.f32 %v639_v55  ;;  %v640_v42 = vadd.f32 1e-05, %v624_v54 }
 0x2ee   :  { %v661_v24 = vmul.f32 %v900_v61, %v1303_v60  ;;  %v621_v1 = vmul.f32 0.03125, %v591_v58  ;;  %v594_v3 = vpop.xlane.xlu1 %593  ;;  %v932_v61 = vld [vmem:[%s1566_s0 + $0x38] sm:$0xff] }
 0x2ef   :  { %v723_v7 = vadd.f32 %v927_v6, %v707_v50  ;;  %v686_v10 = vmul.f32 %v1398_v45, %v664_v57  ;;  %913 = vrsqrt.f32 %v640_v42  ;;  %v622_v9 = vmul.f32 0.03125, %v594_v3  ;;  %v933_v3 = vld [vmem:[%s1566_s0 + $0x20] sm:$0xff] }
 0x2f0   :  { %v902_v46 = vpop.eup %901  ;;  %v683_v18 = vmul.f32 %v1398_v45, %v661_v24  ;;  %v637_v29 = vadd.f32 1e-05, %v621_v1  ;;  %v603_v62 = vpop.xlane.xlu0 %602 }
 0x2f1   :  { %739 = vst.msk [vmem:[%s1572_s7 + $0x10] sm:$0xff] %vm64_vm0, %v723_v7  ;;  %v708_v60 = vadd.f32 %v1404_v51, %v686_v10  ;;  %v662_v5 = vmul.f32 %v902_v46, %v1314_v2  ;;  %v638_v12 = vadd.f32 1e-05, %v622_v9  ;;  %v625_v56 = vmul.f32 0.03125, %v603_v62  ;;  %v929_v2 = vld [vmem:[%s1566_s0] sm:$0xff]  ;;  %v934_v46 = vld [vmem:[%s1566_s0 + $0x28] sm:$0xff] }
 0x2f2   :  { %v904_v13 = vpop.eup %903  ;;  %v705_v47 = vadd.f32 %v1404_v51, %v683_v18  ;;  %915 = vrsqrt.f32 %v637_v29 }
 0x2f3   :  { %v724_v15 = vadd.f32 %v928_v14, %v708_v60  ;;  %v684_v16 = vmul.f32 %v1398_v45, %v662_v5  ;;  %v667_v59 = vmul.f32 %v904_v13, %v1323_v41  ;;  %917 = vrsqrt.f32 %v638_v12 }
 0x2f4   :  { %v906_v63 = vpop.eup %905  ;;  %v721_v23 = vadd.f32 %v929_v2, %v705_v47  ;;  %v641_v4 = vadd.f32 1e-05, %v625_v56  ;;  %v606_v26 = vpop.xlane.xlu1 %605  ;;  %v937_v2 = vld [vmem:[%s1566_s0 + $0x40] sm:$0xff] }
 0x2f5   :  { %v609_v27 = vpop.xlane.xlu0 %608  ;;  %740 = vst.msk [vmem:[%s1572_s7 + $0x18] sm:$0xff] %vm64_vm0, %v724_v15  ;;  %v706_v30 = vadd.f32 %v1404_v51, %v684_v16  ;;  %v689_v31 = vmul.f32 %v1398_v45, %v667_v59  ;;  %v668_v41 = vmul.f32 %v906_v63, %v1326_v11  ;;  %v626_v20 = vmul.f32 0.03125, %v606_v26 }
 0x2f6   :  { %v908_v22 = vpop.eup %907  ;;  %737 = vst.msk [vmem:[%s1572_s7] sm:$0xff] %vm64_vm0, %v721_v23  ;;  %919 = vrsqrt.f32 %v641_v4  ;;  %v627_v38 = vmul.f32 0.03125, %v609_v27  ;;  %v938_v27 = vld [vmem:[%s1566_s0 + $0x48] sm:$0xff] }
 0x2f7   :  { %v722_v40 = vadd.f32 %v930_v39, %v706_v30  ;;  %v711_v43 = vadd.f32 %v1404_v51, %v689_v31  ;;  %v690_v44 = vmul.f32 %v1398_v45, %v668_v41  ;;  %v665_v11 = vmul.f32 %v908_v22, %v1334_v21 }
 0x2f8   :  { %v910_v25 = vpop.eup %909  ;;  %v642_v32 = vadd.f32 1e-05, %v626_v20  ;;  %v643_v48 = vadd.f32 1e-05, %v627_v38  ;;  %v612_v49 = vpop.xlane.xlu1 %611  ;;  %v939_v20 = vld [vmem:[%s1566_s0 + $0x60] sm:$0xff] }
 0x2f9   :  { %738 = vst.msk [vmem:[%s1572_s7 + $0x8] sm:$0xff] %vm64_vm0, %v722_v40  ;;  %v727_v53 = vadd.f32 %v931_v52, %v711_v43  ;;  %v712_v55 = vadd.f32 %v1404_v51, %v690_v44  ;;  %v687_v54 = vmul.f32 %v1398_v45, %v665_v11  ;;  %v666_v21 = vmul.f32 %v910_v25, %v1338_v19  ;;  %v940_v11 = vld [vmem:[%s1566_s0 + $0x68] sm:$0xff] }
 0x2fa   :  { %v912_v37 = vpop.eup %911  ;;  %921 = vrsqrt.f32 %v642_v32  ;;  %v628_v58 = vmul.f32 0.03125, %v612_v49 }
 0x2fb   :  { %743 = vst.msk [vmem:[%s1572_s7 + $0x30] sm:$0xff] %vm64_vm0, %v727_v53  ;;  %v728_v50 = vadd.f32 %v932_v61, %v712_v55  ;;  %v709_v57 = vadd.f32 %v1404_v51, %v687_v54  ;;  %v688_v42 = vmul.f32 %v1398_v45, %v666_v21  ;;  %v671_v24 = vmul.f32 %v912_v37, %v1346_v34 }
 0x2fc   :  { %v914_v19 = vpop.eup %913  ;;  %923 = vrsqrt.f32 %v643_v48  ;;  %v644_v1 = vadd.f32 1e-05, %v628_v58  ;;  %v941_v48 = vld [vmem:[%s1566_s0 + $0x70] sm:$0xff] }
 0x2fd   :  { %744 = vst.msk [vmem:[%s1572_s7 + $0x38] sm:$0xff] %vm64_vm0, %v728_v50  ;;  %v725_v6 = vadd.f32 %v933_v3, %v709_v57  ;;  %v710_v7 = vadd.f32 %v1404_v51, %v688_v42  ;;  %v693_v10 = vmul.f32 %v1398_v45, %v671_v24  ;;  %v672_v9 = vmul.f32 %v914_v19, %v1350_v36  ;;  %v935_v36 = vld [vmem:[%s1566_s0 + $0x50] sm:$0xff] }
 0x2fe   :  { %925 = vrsqrt.f32 %v644_v1 }
 0x2ff   :  { %v916_v34 = vpop.eup %915  ;;  %741 = vst.msk [vmem:[%s1572_s7 + $0x20] sm:$0xff] %vm64_vm0, %v725_v6  ;;  %v726_v18 = vadd.f32 %v934_v46, %v710_v7  ;;  %v715_v29 = vadd.f32 %v1404_v51, %v693_v10  ;;  %v694_v62 = vmul.f32 %v1398_v45, %v672_v9 }
 0x300   :  { %v918_v60 = vpop.eup %917  ;;  %v669_v5 = vmul.f32 %v916_v34, %v1358_v17  ;;  %v936_v17 = vld [vmem:[%s1566_s0 + $0x58] sm:$0xff] }
 0x301   :  { %742 = vst.msk [vmem:[%s1572_s7 + $0x28] sm:$0xff] %vm64_vm0, %v726_v18  ;;  %v731_v12 = vadd.f32 %v935_v36, %v715_v29  ;;  %v716_v56 = vadd.f32 %v1404_v51, %v694_v62  ;;  %v670_v13 = vmul.f32 %v918_v60, %v1362_v28 }
 0x302   :  { %v691_v47 = vmul.f32 %v1398_v45, %v669_v5 }
 0x303   :  { %v920_v14 = vpop.eup %919  ;;  %747 = vst.msk [vmem:[%s1572_s7 + $0x50] sm:$0xff] %vm64_vm0, %v731_v12  ;;  %v732_v15 = vadd.f32 %v936_v17, %v716_v56  ;;  %v692_v16 = vmul.f32 %v1398_v45, %v670_v13 }
 0x304   :  { %v713_v59 = vadd.f32 %v1404_v51, %v691_v47  ;;  %v673_v63 = vmul.f32 %v920_v14, %v1370_v33 }
 0x305   :  { %748 = vst.msk [vmem:[%s1572_s7 + $0x58] sm:$0xff] %vm64_vm0, %v732_v15  ;;  %v714_v28 = vadd.f32 %v1404_v51, %v692_v16 }
 0x306   :  { %v729_v23 = vadd.f32 %v937_v2, %v713_v59  ;;  %v695_v4 = vmul.f32 %v1398_v45, %v673_v63 }
 0x307   :  { %v922_v26 = vpop.eup %921  ;;  %v730_v33 = vadd.f32 %v938_v27, %v714_v28 }
 0x308   :  { %745 = vst.msk [vmem:[%s1572_s7 + $0x40] sm:$0xff] %vm64_vm0, %v729_v23  ;;  %v717_v30 = vadd.f32 %v1404_v51, %v695_v4  ;;  %v674_v31 = vmul.f32 %v922_v26, %v1377_v0 }
 0x309   :  { %v924_v41 = vpop.eup %923  ;;  %746 = vst.msk [vmem:[%s1572_s7 + $0x48] sm:$0xff] %vm64_vm0, %v730_v33 }
 0x30a   :  { %v733_v22 = vadd.f32 %v939_v20, %v717_v30  ;;  %v696_v38 = vmul.f32 %v1398_v45, %v674_v31  ;;  %v675_v39 = vmul.f32 %v924_v41, %v1380_v35 }
 0x30b   :  { %v926_v40 = vpop.eup %925 }
 0x30c   :  { %749 = vst.msk [vmem:[%s1572_s7 + $0x60] sm:$0xff] %vm64_vm0, %v733_v22  ;;  %v718_v0 = vadd.f32 %v1404_v51, %v696_v38  ;;  %v697_v43 = vmul.f32 %v1398_v45, %v675_v39  ;;  %v676_v44 = vmul.f32 %v926_v40, %v1388_v8 }
 0x30e   :  { %v734_v25 = vadd.f32 %v940_v11, %v718_v0  ;;  %v719_v32 = vadd.f32 %v1404_v51, %v697_v43  ;;  %v698_v35 = vmul.f32 %v1398_v45, %v676_v44  ;;  %v942_v45 = vld [vmem:[%s1566_s0 + $0x78] sm:$0xff] }
 0x310   :  { %750 = vst.msk [vmem:[%s1572_s7 + $0x68] sm:$0xff] %vm64_vm0, %v734_v25  ;;  %v735_v49 = vadd.f32 %v941_v48, %v719_v32  ;;  %v720_v8 = vadd.f32 %v1404_v51, %v698_v35 }
 0x312   :  { %751 = vst.msk [vmem:[%s1572_s7 + $0x70] sm:$0xff] %vm64_vm0, %v735_v49  ;;  %v736_v52 = vadd.f32 %v942_v45, %v720_v8 }
 0x314   :  { %752 = vst.msk [vmem:[%s1572_s7 + $0x78] sm:$0xff] %vm64_vm0, %v736_v52 }

// kernel: swinv2_forward.12
= control target key start
LH: loop header
LB: loop body
LE: loop exit
PB: predicated region body
PF: predicated region fallthrough
CT: control target
= control target key end

     0   :  { %14 = vsyncpa [#allocation3], 0  ;;  %s1343_s30 = smov 0   ;;  %s1531_s0 = inlined_call_operand.vmem [shape: f32[8,16,32], index: 0, kind: input, shape index: {}]   ;;  %s1532_s1 = inlined_call_operand.vmem [shape: f32[32,96], index: 1, kind: input, shape index: {}]   ;;  %s1533_s2 = inlined_call_operand.vmem [shape: f32[1,96], index: 2, kind: input, shape index: {}]   ;;  %s1534_s3 = inlined_call_operand.vmem [shape: f32[32,32], index: 3, kind: input, shape index: {}]   ;;  %s1535_s4 = inlined_call_operand.vmem [shape: f32[1,32], index: 4, kind: input, shape index: {}]   ;;  %s1536_s5 = inlined_call_operand.vmem [shape: f32[2,16,16], index: 5, kind: input, shape index: {}]   ;;  %s1537_s6 = inlined_call_operand.vmem [shape: f32[2], index: 6, kind: input, shape index: {}]   ;;  %s1538_s7 = inlined_call_operand.vmem [shape: f32[1,32], index: 7, kind: input, shape index: {}]   ;;  %s1539_s8 = inlined_call_operand.vmem [shape: f32[1,32], index: 8, kind: input, shape index: {}]   ;;  %s1540_s9 = inlined_call_operand.vmem [shape: f32[8,16,32], index: 9, kind: output, shape index: {}]  }
   0x1 LB: > { %s1349_s10 = sadd.s32 4294967295, %s1282_s30   ;;  %p1089_p0 = scmp.ge.s32.totalorder %s1282_s30, 1  ;;  %s1282_s30 = sphi %s1343_s30, %s20_s30  }
   0x2   : > { %p245_p1 = scmp.lt.s32.totalorder %s1282_s30, 9  ;;  %s273_s13 = sshll.u32 %s1537_s6, 4  ;;  %s274_s13 = int_to_ptr.vmem [resolvable:$true] %s273_s13 }
   0x3   : > { %p1197_p3 = scmp.eq.s32.totalorder %s1349_s10, 0  ;;  %s1257_s15 = scalar_lea.vmem %s274_s13, 16 }
   0x4   : > { %p1356_p2 = pnand %p1089_p0, %p245_p1  ;;  %p1258_p6 = scmp.ne.s32.totalorder %s274_s13, %s1257_s15 }
   0x5   : > { %p1265_p10 = scmp.lt.s32.totalorder %s274_s13, %s274_s13  ;;  %p1266_p11 = scmp.lt.s32.totalorder %s1257_s15, %s1257_s15 }
   0x6   : > { %p1193_p4 = pneg %p1356_p2 }
   0x7   : > { %p1267_p12 = por %p1266_p11, %p1265_p10 }
   0x8   : > { %p1194_p5 = pnand %p1197_p3, %p1193_p4 }
   0xa   : > { %p1259_p7 = pneg %p1194_p5 }
   0xc   : > { %p1260_p8 = pnand %p1259_p7, %p1258_p6 }
   0xe   : > { %p1261_p9 = pneg %p1260_p8 }
  0x10   : > { %p1268_p13 = pnand %p1267_p12, %p1261_p9 }
  0x12   : > { %1271 = shalt.err (!%p1268_p13)
}
  0x13   : > { %s1284_s16 = smov [#allocation2]   ;;  %300 = sbr.rel (%p1356_p2) target bundleno = 1980 (0x7bc), region = 56 }
  0x14   : > { %1196 = dma.vmem_to_smem (!%p1194_p5), %s274_s13, 16, %s1284_s16, [#allocation3]  }
  0x18   : > { %1277 = dma.done.wait (%p1197_p3), [#allocation3], 16  }
  0x19   : > { %1279 = vsyncadd (%p1197_p3), [#allocation3], 4294967280 }
  0x1a   : > { %306 = sfence }
  0x1b   : > { %v352_v0 = vld [vmem:[%s1532_s1 + $0x10] sm:$0xff]  ;;  %v353_v1 = vld [vmem:[%s1532_s1 + $0x18] sm:$0xff]  ;;  %v350_v2 = vld [vmem:[%s1532_s1] sm:$0xff]  ;;  %p337_p0 = scmp.lt.s32.totalorder %s1349_s10, 7  ;;  %v1285_v3 = vmov 0.0   ;;  %vm1286_vm0 = vmmov 0  }
  0x1c   : > { %1145 = vmatprep.subr.bf16.mxu1 %v1285_v3  ;;  %v356_v4 = vpack.c.bf16 %v353_v1, %v352_v0  ;;  %v351_v5 = vld [vmem:[%s1532_s1 + $0x8] sm:$0xff]  ;;  %1149 = vmatprep.mubr.msk.bf16.mxu1 %vm1286_vm0, %v1285_v3  ;;  %vm364_vm1 = vcmask 261120   ;;  %v1098_v12 = vld [vmem:[%s1533_s2] ss:$0 sm:$0xff]  ;;  %s1287_s12 = smov 80   ;;  %s1288_s13 = smov 96  }
  0x1d   : > { %s1543_s10 = smov (!%p337_p0, %s1349_s10), 7  ;;  %v355_v6 = vpack.c.bf16 %v351_v5, %v350_v2  ;;  %s1289_s14 = smov 112   ;;  %vm411_vm2 = vcmask 130048  }
  0x1e   : > { %1146 = vmatpush3.bf16.msra.mxu1 %v356_v4  ;;  %s1121_s25 = sshll.u32 %s1543_s10, 4  ;;  %s535_s15 = sld [smem:[#allocation2]] }
  0x1f   : > { %1147 = vmatprep.subr.bf16.mxu1 %v1285_v3  ;;  %s341_s28 = scalar_lea.vmem %s1531_s0, %s1121_s25  ;;  %s1110_s16 = sld [smem:[#allocation2 + $0x1]] }
  0x20   : > { %v1397_v7 = vld [vmem:[%s341_s28] sm:$0xff]  ;;  %v1399_v8 = vld [vmem:[%s341_s28 + $0x8] sm:$0xff]  ;;  %s1290_s26 = smov 64   ;;  %s1291_s27 = smov 48  }
  0x21   : > { %v354_v9 = vpack.c.bf16 %v1399_v8, %v1397_v7  ;;  %s1292_s17 = smov 16  }
  0x22   : > { %1148 = vmatpush3.bf16.msra.mxu1 %v355_v6 }
  0x25   : > { %1150 = vmatmul.mubr.msk.bf16.vlgmr.msra.gmra.mxu1 %vm364_vm1, %v354_v9 }
  0xe5   : > { %v402_v10 = vpop.f32.mrf.mxu1 }
  0xe6   : > { %v1409_v16 = vadd.f32 %v1098_v12, %v402_v10  ;;  %v536_v10 = vstv %s535_s15 }
  0xe7   : > { %v1151_v11 = vpop.f32.mrf.mxu1 }
  0xe8   : > { %v409_v18 = vmul.f32 %v1409_v16, %v1409_v16 }
  0xe9   : > { %v405_v13 = vpop.f32.mrf.mxu1 }
  0xea   : > { %v1407_v14 = vadd.f32 %v1098_v12, %v405_v13  ;;  %v412_v31 = vsel %vm411_vm2, %v409_v18, 0.0  ;;  %v540_v12 = vld [vmem:[%s1536_s5 + $0x8] sm:$0xff] }
  0xeb   : > { %v1152_v15 = vpop.f32.mrf.mxu1 }
  0xec   : > { %v410_v17 = vmul.f32 %v1407_v14, %v1407_v14 }
  0xee   : > { %674 = vrot.lane.b32.xlu1 %v410_v17, %s1287_s12  ;;  %428 = vrot.lane.b32.xlu0 %v410_v17, %s1288_s13  ;;  %v415_v32 = vsel %vm411_vm2, %v410_v17, 0.0 }
  0xf2   : > { %672 = vrot.lane.b32.xlu1 %v409_v18, %s1287_s12  ;;  %426 = vrot.lane.b32.xlu0 %v409_v18, %s1288_s13 }
  0xf6   : > { %656 = vrot.lane.b32.xlu1 %v410_v17, %s1289_s14  ;;  %654 = vrot.lane.b32.xlu0 %v409_v18, %s1289_s14  ;;  %v539_v17 = vld [vmem:[%s1536_s5] sm:$0xff] }
 0x160   : > { %v675_v19 = vpop.permute.xlu1 %674  ;;  %v429_v20 = vpop.permute.xlu0 %428 }
 0x161   : > { %v435_v21 = vsel %vm411_vm2, %v429_v20, 0.0  ;;  %v681_v24 = vsel %vm411_vm2, %v675_v19, 0.0 }
 0x162   : > { %436 = vadd.xlane.f32.xlu0 %v435_v21  ;;  %v786_v21 = vstv %s1110_s16 }
 0x164   : > { %v673_v22 = vpop.permute.xlu1 %672  ;;  %v427_v23 = vpop.permute.xlu0 %426 }
 0x165   : > { %v432_v25 = vsel %vm411_vm2, %v427_v23, 0.0  ;;  %v678_v27 = vsel %vm411_vm2, %v673_v22, 0.0 }
 0x166   : > { %682 = vadd.xlane.f32.xlu0 %v681_v24  ;;  %433 = vadd.xlane.f32.xlu1 %v432_v25 }
 0x168   : > { %v655_v26 = vpop.permute.xlu0 %654  ;;  %v657_v29 = vpop.permute.xlu1 %656 }
 0x169   : > { %v660_v28 = vsel %vm411_vm2, %v655_v26, 0.0  ;;  %v663_v30 = vsel %vm411_vm2, %v657_v29, 0.0  ;;  %v1111_v26 = vld [vmem:[%s1536_s5 + $0x10] sm:$0xff]  ;;  %v1112_v29 = vld [vmem:[%s1536_s5 + $0x18] sm:$0xff] }
 0x16a   : > { %679 = vadd.xlane.f32.xlu0 %v678_v27  ;;  %661 = vadd.xlane.f32.xlu1 %v660_v28 }
 0x16e   : > { %664 = vadd.xlane.f32.xlu0 %v663_v30  ;;  %413 = vadd.xlane.f32.xlu1 %v412_v31 }
 0x172   : > { %416 = vadd.xlane.f32.xlu0 %v415_v32 }
 0x1eb   : > { %v437_v33 = vpop.xlane.xlu0 %436 }
 0x1ec   : > { %v439_v34 = vadd.f32 1e-12, %v437_v33 }
 0x1ee   : > { %1221 = vrsqrt.f32 %v439_v34 }
 0x1ef   : > { %v434_v35 = vpop.xlane.xlu1 %433  ;;  %v683_v36 = vpop.xlane.xlu0 %682 }
 0x1f0   : > { %v438_v37 = vadd.f32 1e-12, %v434_v35  ;;  %v685_v38 = vadd.f32 1e-12, %v683_v36 }
 0x1f2   : > { %1223 = vrsqrt.f32 %v438_v37 }
 0x1f3   : > { %1225 = vrsqrt.f32 %v685_v38  ;;  %v662_v39 = vpop.xlane.xlu1 %661  ;;  %v680_v40 = vpop.xlane.xlu0 %679 }
 0x1f4   : > { %v666_v41 = vadd.f32 1e-12, %v662_v39  ;;  %v684_v42 = vadd.f32 1e-12, %v680_v40 }
 0x1f6   : > { %1227 = vrsqrt.f32 %v666_v41 }
 0x1f7   : > { %1229 = vrsqrt.f32 %v684_v42  ;;  %v414_v43 = vpop.xlane.xlu1 %413  ;;  %v665_v44 = vpop.xlane.xlu0 %664 }
 0x1f8   : > { %v418_v45 = vadd.f32 1e-12, %v414_v43  ;;  %v667_v46 = vadd.f32 1e-12, %v665_v44 }
 0x1fa   : > { %1231 = vrsqrt.f32 %v418_v45 }
 0x1fb   : > { %v1222_v47 = vpop.eup %1221  ;;  %1233 = vrsqrt.f32 %v667_v46  ;;  %v417_v61 = vpop.xlane.xlu0 %416 }
 0x1fc   : > { %v443_v48 = vmul.f32 %v1222_v47, %v1407_v14  ;;  %v419_v62 = vadd.f32 1e-12, %v417_v61 }
 0x1fe   : > { %448 = vrot.lane.b32.xlu1 %v443_v48, %s1288_s13  ;;  %1235 = vrsqrt.f32 %v419_v62 }
 0x1ff   : > { %v1224_v49 = vpop.eup %1223 }
 0x200   : > { %v1226_v50 = vpop.eup %1225  ;;  %v442_v51 = vmul.f32 %v1224_v49, %v1409_v16 }
 0x201   : > { %v689_v52 = vmul.f32 %v1226_v50, %v1407_v14 }
 0x202   : > { %446 = vrot.lane.b32.xlu0 %v442_v51, %s1288_s13 }
 0x203   : > { %v1228_v53 = vpop.eup %1227  ;;  %700 = vrot.lane.b32.xlu1 %v689_v52, %s1287_s12 }
 0x204   : > { %v1230_v54 = vpop.eup %1229  ;;  %v670_v55 = vmul.f32 %v1228_v53, %v1409_v16 }
 0x205   : > { %v688_v56 = vmul.f32 %v1230_v54, %v1409_v16 }
 0x206   : > { %692 = vrot.lane.b32.xlu0 %v670_v55, %s1289_s14 }
 0x207   : > { %v1232_v57 = vpop.eup %1231  ;;  %698 = vrot.lane.b32.xlu1 %v688_v56, %s1287_s12 }
 0x208   : > { %v1234_v58 = vpop.eup %1233  ;;  %v422_v59 = vmul.f32 %v1232_v57, %v1409_v16 }
 0x209   : > { %v671_v60 = vmul.f32 %v1234_v58, %v1407_v14 }
 0x20a   : > { %1157 = vmatprep.mubr.msk.f32.mxu1 %vm411_vm2, %v422_v59 }
 0x20b   : > { %694 = vrot.lane.b32.xlu1 %v671_v60, %s1289_s14  ;;  %v1236_v0 = vpop.eup %1235 }
 0x20c   : > { %v423_v4 = vmul.f32 %v1236_v0, %v1407_v14 }
 0x270   : > { %v449_v63 = vpop.permute.xlu1 %448 }
 0x271   : > { %1153 = vmatprep.subr.msk.mxu1 %vm411_vm2, %v449_v63 }
 0x272   : > { %1154 = vmatpush3.xpose.msk.msra.mxu1 %vm411_vm2, %v449_v63 }
 0x274   : > { %v447_v1 = vpop.permute.xlu0 %446 }
 0x275   : > { %v701_v2 = vpop.permute.xlu1 %700  ;;  %1155 = vmatprep.subr.msk.mxu1 %vm411_vm2, %v447_v1 }
 0x276   : > { %1167 = vmatprep.subr.msk.mxu0 %vm411_vm2, %v701_v2  ;;  %1156 = vmatpush3.xpose.msk.msra.mxu1 %vm411_vm2, %v447_v1 }
 0x277   : > { %1168 = vmatpush3.xpose.msk.msra.mxu0 %vm411_vm2, %v701_v2 }
 0x278   : > { %v693_v5 = vpop.permute.xlu0 %692 }
 0x279   : > { %v699_v6 = vpop.permute.xlu1 %698  ;;  %1158 = vmatmul.mubr.msk.f32.vlgmr.msra.gmra.mxu1 %vm411_vm2, %v423_v4  ;;  %1171 = vmatprep.mubr.msk.f32.mxu0 %vm411_vm2, %v693_v5  ;;  %v915_v5 = vld [vmem:[%s1534_s3 + $0x10] sm:$0xff] }
 0x27a   : > { %1169 = vmatprep.subr.msk.mxu0 %vm411_vm2, %v699_v6 }
 0x27b   : > { %1170 = vmatpush3.xpose.msk.msra.mxu0 %vm411_vm2, %v699_v6  ;;  %v916_v6 = vld [vmem:[%s1534_s3 + $0x18] sm:$0xff] }
 0x27c   : > { %1181 = vmatprep.subr.bf16.mxu0 %v1285_v3 }
 0x27d   : > { %v695_v9 = vpop.permute.xlu1 %694 }
 0x27e   : > { %1172 = vmatmul.mubr.msk.f32.vlgmr.msra.gmra.mxu0 %vm411_vm2, %v695_v9  ;;  %v919_v9 = vpack.c.bf16 %v916_v6, %v915_v5 }
 0x27f   : > { %1185 = vmatprep.mubr.msk.bf16.mxu0 %vm1286_vm0, %v1285_v3 }
 0x280   : > { %1182 = vmatpush3.bf16.msra.mxu0 %v919_v9 }
 0x281   : > { %1183 = vmatprep.subr.bf16.mxu0 %v1285_v3 }
 0x339   : > { %v1159_v11 = vpop.f32.mrf.mxu1 }
 0x33a   : > { %v538_v13 = vmul.f32 %v1159_v11, %v536_v10  ;;  %v914_v11 = vld [vmem:[%s1534_s3 + $0x8] sm:$0xff] }
 0x33b   : > { %v526_v15 = vpop.f32.mrf.mxu1 }
 0x33c   : > { %v537_v18 = vmul.f32 %v536_v10, %v526_v15  ;;  %v542_v19 = vadd.f32 %v540_v12, %v538_v13  ;;  %v913_v10 = vld [vmem:[%s1534_s3] sm:$0xff] }
 0x33d   : > { %v918_v12 = vpack.c.bf16 %v914_v11, %v913_v10 }
 0x33e   : > { %v1173_v20 = vpop.f32.mrf.mxu0  ;;  %v546_v22 = vsel %vm411_vm2, %v542_v19, -inf  ;;  %v541_v23 = vadd.f32 %v539_v17, %v537_v18 }
 0x33f   : > { %547 = vmax.xlane.f32.xlu1 %v546_v22  ;;  %v788_v27 = vmul.f32 %v1173_v20, %v786_v21  ;;  %1184 = vmatpush3.bf16.msra.mxu0 %v918_v12 }
 0x340   : > { %v776_v24 = vpop.f32.mrf.mxu0  ;;  %v543_v25 = vsel %vm411_vm2, %v541_v23, -inf }
 0x341   : > { %v787_v28 = vmul.f32 %v786_v21, %v776_v24  ;;  %544 = vmax.xlane.f32.xlu0 %v543_v25  ;;  %v793_v32 = vadd.f32 %v1112_v29, %v788_v27  ;;  %v1115_v25 = vld [vmem:[%s1535_s4] ss:$0 sm:$0xff] }
 0x343   : > { %v792_v30 = vadd.f32 %v1111_v26, %v787_v28  ;;  %v797_v33 = vsel %vm411_vm2, %v793_v32, -inf }
 0x345   : > { %v794_v31 = vsel %vm411_vm2, %v792_v30, -inf }
 0x346   : > { %795 = vmax.xlane.f32.xlu0 %v794_v31 }
 0x34a   : > { %798 = vmax.xlane.f32.xlu0 %v797_v33 }
 0x350   : > { %569 = vrot.lane.b32.xlu1 %v1407_v14, %s1290_s26 }
 0x354   : > { %818 = vrot.lane.b32.xlu1 %v1407_v14, %s1291_s27 }
 0x3c8   : > { %v548_v34 = vpop.xlane.xlu1 %547 }
 0x3c9   : > { %v550_v35 = vsub.f32 %v542_v19, %v548_v34 }
 0x3ca   : > { %v545_v36 = vpop.xlane.xlu0 %544 }
 0x3cb   : > { %v553_v37 = vmul.f32 1.442695, %v550_v35  ;;  %v549_v38 = vsub.f32 %v541_v23, %v545_v36 }
 0x3cc   : > { %v570_v39 = vpop.permute.xlu1 %569 }
 0x3cd   : > { %1237 = vpow2.f32 %v553_v37  ;;  %v551_v40 = vmul.f32 1.442695, %v549_v38  ;;  %1160 = vmatprep.subr.mxu1 %v570_v39 }
 0x3ce   : > { %1161 = vmatpush3.msra.mxu1 %v570_v39 }
 0x3cf   : > { %1239 = vpow2.f32 %v551_v40  ;;  %v796_v41 = vpop.xlane.xlu0 %795 }
 0x3d0   : > { %v800_v42 = vsub.f32 %v792_v30, %v796_v41  ;;  %v819_v54 = vpop.permute.xlu1 %818 }
 0x3d2   : > { %v802_v43 = vmul.f32 1.442695, %v800_v42 }
 0x3d3   : > { %v799_v44 = vpop.xlane.xlu0 %798 }
 0x3d4   : > { %1241 = vpow2.f32 %v802_v43  ;;  %v801_v45 = vsub.f32 %v793_v32, %v799_v44 }
 0x3d6   : > { %v804_v46 = vmul.f32 1.442695, %v801_v45 }
 0x3d8   : > { %1243 = vpow2.f32 %v804_v46 }
 0x3da   : > { %v1238_v14 = vpop.eup %1237 }
 0x3db   : > { %v558_v47 = vsel %vm411_vm2, %v1238_v14, 0.0 }
 0x3dc   : > { %v1240_v48 = vpop.eup %1239  ;;  %559 = vadd.xlane.f32.xlu0 %v558_v47 }
 0x3dd   : > { %v555_v49 = vsel %vm411_vm2, %v1240_v48, 0.0 }
 0x3de   : > { %556 = vadd.xlane.f32.xlu1 %v555_v49 }
 0x3e1   : > { %v1242_v50 = vpop.eup %1241 }
 0x3e2   : > { %v806_v51 = vsel %vm411_vm2, %v1242_v50, 0.0 }
 0x3e3   : > { %807 = vadd.xlane.f32.xlu1 %v806_v51 }
 0x3e5   : > { %v1244_v52 = vpop.eup %1243 }
 0x3e6   : > { %v809_v53 = vsel %vm411_vm2, %v1244_v52, 0.0 }
 0x3e7   : > { %810 = vadd.xlane.f32.xlu0 %v809_v53 }
 0x3f4   : > { %816 = vrot.lane.b32.xlu1 %v1409_v16, %s1291_s27  ;;  %s346_s27 = scalar_lea.vmem %s1540_s9, %s1121_s25 }
 0x3fd   : > { %567 = vrot.lane.b32.xlu0 %v1409_v16, %s1290_s26 }
 0x465   : > { %v560_v55 = vpop.xlane.xlu0 %559 }
 0x466   : > { %1245 = vrcp.f32 %v560_v55 }
 0x467   : > { %v557_v56 = vpop.xlane.xlu1 %556 }
 0x468   : > { %1247 = vrcp.f32 %v557_v56 }
 0x46c   : > { %v808_v57 = vpop.xlane.xlu1 %807 }
 0x46d   : > { %1249 = vrcp.f32 %v808_v57 }
 0x470   : > { %v811_v58 = vpop.xlane.xlu0 %810  ;;  %v817_v0 = vpop.permute.xlu1 %816 }
 0x471   : > { %1251 = vrcp.f32 %v811_v58 }
 0x473   : > { %v1246_v59 = vpop.eup %1245 }
 0x474   : > { %v568_v60 = vpop.permute.xlu0 %567  ;;  %v564_v63 = vmul.f32 %v1246_v59, %v1238_v14 }
 0x475   : > { %v1248_v61 = vpop.eup %1247  ;;  %1162 = vmatprep.subr.mxu1 %v568_v60 }
 0x476   : > { %1163 = vmatpush3.msra.mxu1 %v568_v60  ;;  %v563_v62 = vmul.f32 %v1248_v61, %v1240_v48 }
 0x477   : > { %1174 = vmatprep.subr.mxu1 %v819_v54 }
 0x478   : > { %1164 = vmatprep.mubr.msk.f32.mxu1 %vm411_vm2, %v563_v62 }
 0x479   : > { %1165 = vmatmul.mubr.msk.f32.vlgmr.msra.gmra.mxu1 %vm411_vm2, %v564_v63 }
 0x47a   : > { %v1250_v16 = vpop.eup %1249  ;;  %1175 = vmatpush3.msra.mxu1 %v819_v54 }
 0x47b   : > { %1176 = vmatprep.subr.mxu1 %v817_v0  ;;  %v814_v1 = vmul.f32 %v1250_v16, %v1242_v50  ;;  %v1117_v50 = vld [vmem:[%s1538_s7] ss:$0 sm:$0xff] }
 0x47c   : > { %1177 = vmatpush3.msra.mxu1 %v817_v0 }
 0x47d   : > { %1178 = vmatprep.mubr.msk.f32.mxu1 %vm411_vm2, %v814_v1 }
 0x47e   : > { %v1252_v2 = vpop.eup %1251 }
 0x47f   : > { %v815_v4 = vmul.f32 %v1252_v2, %v1244_v52  ;;  %v1118_v52 = vld [vmem:[%s1539_s8] ss:$0 sm:$0xff] }
 0x481   : > { %1179 = vmatmul.mubr.msk.f32.vlgmr.msra.gmra.mxu1 %vm411_vm2, %v815_v4 }
 0x539   : > { %v1166_v13 = vpop.f32.mrf.mxu1 }
 0x53b   : > { %v645_v15 = vpop.f32.mrf.mxu1 }
 0x541   : > { %v1180_v17 = vpop.f32.mrf.mxu1 }
 0x543   : > { %v894_v18 = vpop.f32.mrf.mxu1 }
 0x544   : > { %v1216_v19 = vpack.i.bf16 %v1180_v17, %v894_v18 }
 0x546   : > { %1217 = vrot.lane.b32.xlu0 %v1216_v19, %s1292_s17 }
 0x5b8   : > { %v1218_v20 = vpop.permute.xlu0 %1217 }
 0x5b9   : > { %v1220_v21 = vunpack.i.h.bf16 %v1218_v20  ;;  %v1219_v3 = vunpack.i.l.bf16 %v1218_v20 }
 0x5bb   : > { %v912_v22 = vsel %vm411_vm2, %v1166_v13, %v1220_v21  ;;  %v911_v23 = vsel %vm411_vm2, %v645_v15, %v1219_v3 }
 0x5bc   : > { %v917_v24 = vpack.c.bf16 %v912_v22, %v911_v23 }
 0x5be   : > { %1186 = vmatmul.mubr.msk.bf16.vlgmr.msra.gmra.mxu0 %vm364_vm1, %v917_v24 }
 0x67e   : > { %v964_v26 = vpop.f32.mrf.mxu0 }
 0x67f   : > { %v965_v27 = vadd.f32 %v1115_v25, %v964_v26 }
 0x680   : > { %v1187_v28 = vpop.f32.mrf.mxu0 }
 0x681   : > { %v973_v29 = vsel %vm364_vm1, %v965_v27, 0.0 }
 0x682   : > { %974 = vadd.xlane.f32.xlu1 %v973_v29  ;;  %v967_v30 = vpop.f32.mrf.mxu0 }
 0x683   : > { %v968_v31 = vadd.f32 %v1115_v25, %v967_v30 }
 0x684   : > { %v1188_v32 = vpop.f32.mrf.mxu0 }
 0x685   : > { %v976_v33 = vsel %vm364_vm1, %v968_v31, 0.0 }
 0x686   : > { %977 = vadd.xlane.f32.xlu0 %v976_v33 }
 0x70b   : > { %v975_v34 = vpop.xlane.xlu1 %974 }
 0x70c   : > { %v980_v35 = vmul.f32 0.03125, %v975_v34 }
 0x70e   : > { %v982_v36 = vsub.f32 %v965_v27, %v980_v35 }
 0x70f   : > { %v978_v37 = vpop.xlane.xlu0 %977 }
 0x710   : > { %v981_v38 = vmul.f32 0.03125, %v978_v37  ;;  %v984_v39 = vmul.f32 %v982_v36, %v982_v36 }
 0x712   : > { %v983_v40 = vsub.f32 %v968_v31, %v981_v38  ;;  %v986_v41 = vsel %vm364_vm1, %v984_v39, 0.0 }
 0x713   : > { %987 = vadd.xlane.f32.xlu0 %v986_v41 }
 0x714   : > { %v985_v42 = vmul.f32 %v983_v40, %v983_v40 }
 0x716   : > { %v989_v43 = vsel %vm364_vm1, %v985_v42, 0.0 }
 0x717   : > { %990 = vadd.xlane.f32.xlu1 %v989_v43 }
 0x79c   : > { %v988_v44 = vpop.xlane.xlu0 %987 }
 0x79d   : > { %v992_v45 = vmul.f32 0.03125, %v988_v44 }
 0x79f   : > { %v994_v46 = vadd.f32 1e-05, %v992_v45 }
 0x7a0   : > { %v991_v14 = vpop.xlane.xlu1 %990 }
 0x7a1   : > { %1253 = vrsqrt.f32 %v994_v46  ;;  %v993_v47 = vmul.f32 0.03125, %v991_v14 }
 0x7a3   : > { %v995_v48 = vadd.f32 1e-05, %v993_v47 }
 0x7a5   : > { %1255 = vrsqrt.f32 %v995_v48 }
 0x7ae   : > { %v1254_v49 = vpop.eup %1253 }
 0x7af   : > { %v998_v51 = vmul.f32 %v1254_v49, %v982_v36 }
 0x7b1   : > { %v1006_v53 = vmul.f32 %v1117_v50, %v998_v51 }
 0x7b2   : > { %v1256_v54 = vpop.eup %1255 }
 0x7b3   : > { %v1014_v55 = vadd.f32 %v1118_v52, %v1006_v53  ;;  %v999_v56 = vmul.f32 %v1256_v54, %v983_v40 }
 0x7b5   : > { %v1016_v57 = vadd.f32 %v1014_v55, %v1397_v7  ;;  %v1007_v58 = vmul.f32 %v1117_v50, %v999_v56 }
 0x7b7   : > { %1018 = vst.msk [vmem:[%s346_s27] sm:$0xff] %vm364_vm1, %v1016_v57  ;;  %v1015_v59 = vadd.f32 %v1118_v52, %v1007_v58 }
 0x7b9   : > { %v1017_v60 = vadd.f32 %v1015_v59, %v1399_v8 }
 0x7bb   : > { %1019 = vst.msk [vmem:[%s346_s27 + $0x8] sm:$0xff] %vm364_vm1, %v1017_v60 }
 0x7bc PF: > { %s20_s30 = sadd.s32 1, %s1282_s30  }
 0x7bd   : > { %p17_p1 = scmp.ge.s32.totalorder %s20_s30, 10  }
 0x7bf   :  { %19 = sbr.rel (!%p17_p1) target bundleno = 1 (0x1), region = 92 }
 0x7c4   :  { %1041 = vsyncpa [#allocation3], 1 }
 0x7c5   :  { %1043 = vsyncpa [#allocation3 + $0x1], 1 }

// kernel: swinv2_forward.14
= control target key start
LH: loop header
LB: loop body
LE: loop exit
PB: predicated region body
PF: predicated region fallthrough
CT: control target
= control target key end

     0   :  { %15 = vsyncpa [#allocation3], 0  ;;  %s1509_s13 = smov 0   ;;  %s1703_s0 = inlined_call_operand.vmem [shape: f32[8,16,32], index: 0, kind: input, shape index: {}]   ;;  %s1704_s1 = inlined_call_operand.vmem [shape: f32[32,96], index: 1, kind: input, shape index: {}]   ;;  %s1705_s2 = inlined_call_operand.vmem [shape: f32[1,96], index: 2, kind: input, shape index: {}]   ;;  %s1706_s3 = inlined_call_operand.vmem [shape: f32[32,32], index: 3, kind: input, shape index: {}]   ;;  %s1707_s4 = inlined_call_operand.vmem [shape: f32[1,32], index: 4, kind: input, shape index: {}]   ;;  %s1708_s5 = inlined_call_operand.vmem [shape: f32[2,16,16], index: 5, kind: input, shape index: {}]   ;;  %s1709_s6 = inlined_call_operand.vmem [shape: f32[4,16,16], index: 6, kind: input, shape index: {}]   ;;  %s1710_s7 = inlined_call_operand.vmem [shape: f32[2], index: 7, kind: input, shape index: {}]   ;;  %s1711_s8 = inlined_call_operand.vmem [shape: f32[1,32], index: 8, kind: input, shape index: {}]   ;;  %s1712_s9 = inlined_call_operand.vmem [shape: f32[1,32], index: 9, kind: input, shape index: {}]   ;;  %s1713_s10 = inlined_call_operand.vmem [shape: f32[8,16,32], index: 10, kind: output, shape index: {}]  }
   0x1 LB: > { %s1515_s14 = sadd.s32 4294967295, %s1443_s13   ;;  %p1244_p0 = scmp.ge.s32.totalorder %s1443_s13, 1  ;;  %s1443_s13 = sphi %s1509_s13, %s21_s13  }
   0x2   : > { %p296_p1 = scmp.lt.s32.totalorder %s1443_s13, 9  ;;  %s324_s17 = sshll.u32 %s1710_s7, 4  ;;  %s325_s17 = int_to_ptr.vmem [resolvable:$true] %s324_s17 }
   0x3   : > { %p1358_p3 = scmp.eq.s32.totalorder %s1515_s14, 0  ;;  %s1418_s19 = scalar_lea.vmem %s325_s17, 16 }
   0x4   : > { %p1522_p2 = pnand %p1244_p0, %p296_p1  ;;  %p1419_p6 = scmp.ne.s32.totalorder %s325_s17, %s1418_s19 }
   0x5   : > { %p1426_p10 = scmp.lt.s32.totalorder %s325_s17, %s325_s17  ;;  %p1427_p11 = scmp.lt.s32.totalorder %s1418_s19, %s1418_s19 }
   0x6   : > { %p1354_p4 = pneg %p1522_p2 }
   0x7   : > { %p1428_p12 = por %p1427_p11, %p1426_p10 }
   0x8   : > { %p1355_p5 = pnand %p1358_p3, %p1354_p4 }
   0xa   : > { %p1420_p7 = pneg %p1355_p5 }
   0xc   : > { %p1421_p8 = pnand %p1420_p7, %p1419_p6 }
   0xe   : > { %p1422_p9 = pneg %p1421_p8 }
  0x10   : > { %p1429_p13 = pnand %p1428_p12, %p1422_p9 }
  0x12   : > { %1432 = shalt.err (!%p1429_p13)
}
  0x13   : > { %s1445_s20 = smov [#allocation2]   ;;  %383 = sbr.rel (%p1522_p2) target bundleno = 1982 (0x7be), region = 60 }
  0x14   : > { %1357 = dma.vmem_to_smem (!%p1355_p5), %s325_s17, 16, %s1445_s20, [#allocation3]  }
  0x18   : > { %1438 = dma.done.wait (%p1358_p3), [#allocation3], 16  }
  0x19   : > { %1440 = vsyncadd (%p1358_p3), [#allocation3], 4294967280 }
  0x1a   : > { %389 = sfence }
  0x1b   : > { %v483_v0 = vld [vmem:[%s1704_s1 + $0x10] sm:$0xff]  ;;  %v484_v1 = vld [vmem:[%s1704_s1 + $0x18] sm:$0xff]  ;;  %v481_v2 = vld [vmem:[%s1704_s1] sm:$0xff]  ;;  %p439_p0 = scmp.lt.s32.totalorder %s1515_s14, 7  ;;  %v1446_v3 = vmov 0.0   ;;  %vm1447_vm0 = vmmov 0  }
  0x1c   : > { %1306 = vmatprep.subr.bf16.mxu1 %v1446_v3  ;;  %v487_v4 = vpack.c.bf16 %v484_v1, %v483_v0  ;;  %v482_v5 = vld [vmem:[%s1704_s1 + $0x8] sm:$0xff]  ;;  %1310 = vmatprep.mubr.msk.bf16.mxu1 %vm1447_vm0, %v1446_v3  ;;  %vm495_vm1 = vcmask 261120   ;;  %v1258_v12 = vld [vmem:[%s1705_s2] ss:$0 sm:$0xff]  ;;  %s1448_s18 = smov 80   ;;  %s1449_s19 = smov 96  }
  0x1d   : > { %s1554_s29 = scalar_select %p439_p0, %s1515_s14, 7  ;;  %v486_v6 = vpack.c.bf16 %v482_v5, %v481_v2  ;;  %vm544_vm2 = vcmask 130048  }
  0x1e   : > { %1307 = vmatpush3.bf16.msra.mxu1 %v487_v4  ;;  %s1450_s20 = smov 112   ;;  %s445_s21 = ssub.s32 0, %s1515_s14 }
  0x1f   : > { %1308 = vmatprep.subr.bf16.mxu1 %v1446_v3  ;;  %s1281_s30 = sshll.u32 %s1554_s29, 4  ;;  %s1251_s22 = smin.u32 %s1515_s14, %s445_s21 }
  0x20   : > { %s443_s15 = scalar_lea.vmem %s1703_s0, %s1281_s30  ;;  %s447_s23 = sand.u32 3, %s1251_s22  }
  0x21   : > { %v1563_v7 = vld [vmem:[%s443_s15] sm:$0xff]  ;;  %v1565_v8 = vld [vmem:[%s443_s15 + $0x8] sm:$0xff]  ;;  %p444_p1 = scmp.lt.s32.totalorder %s1515_s14, 0  ;;  %s448_s24 = ssub.s32 0, %s447_s23 }
  0x22   : > { %1309 = vmatpush3.bf16.msra.mxu1 %v486_v6  ;;  %v485_v9 = vpack.c.bf16 %v1565_v8, %v1563_v7  ;;  %s668_s26 = sld [smem:[#allocation2]]  ;;  %s1453_s17 = smov 16  }
  0x23   : > { %s1716_s24 = smov (!%p444_p1, %s448_s24), %s447_s23  ;;  %s1270_s27 = sld [smem:[#allocation2 + $0x1]] }
  0x24   : > { %p1253_p2 = scmp.lt.s32.totalorder %s1716_s24, 0  ;;  %s454_s25 = sadd.s32 4, %s1716_s24 }
  0x25   : > { %1311 = vmatmul.mubr.msk.bf16.vlgmr.msra.gmra.mxu1 %vm495_vm1, %v485_v9  ;;  %s1451_s23 = smov 64  }
  0x26   : > { %s1718_s25 = smov (!%p1253_p2, %s454_s25), %s1716_s24  ;;  %s1452_s24 = smov 48  }
  0x27   : > { %p456_p3 = scmp.lt.s32.totalorder %s1718_s25, 3 }
  0x29   : > { %s1720_s25 = smov (!%p456_p3, %s1718_s25), 3 }
  0x2a   : > { %s1282_s28 = sshll.u32 %s1720_s25, 4  ;;  %s477_s25 = scalar_lea.vmem %s1713_s10, %s1281_s30 }
  0x2b   : > { %s460_s15 = scalar_lea.vmem %s1709_s6, %s1282_s28 }
  0xe5   : > { %v533_v10 = vpop.f32.mrf.mxu1 }
  0xe6   : > { %v1575_v16 = vadd.f32 %v1258_v12, %v533_v10  ;;  %v669_v10 = vstv %s668_s26 }
  0xe7   : > { %v1312_v11 = vpop.f32.mrf.mxu1 }
  0xe8   : > { %v542_v18 = vmul.f32 %v1575_v16, %v1575_v16 }
  0xe9   : > { %v536_v13 = vpop.f32.mrf.mxu1 }
  0xea   : > { %v1573_v14 = vadd.f32 %v1258_v12, %v536_v13  ;;  %v545_v31 = vsel %vm544_vm2, %v542_v18, 0.0  ;;  %v673_v12 = vld [vmem:[%s1708_s5 + $0x8] sm:$0xff] }
  0xeb   : > { %v1313_v15 = vpop.f32.mrf.mxu1 }
  0xec   : > { %v543_v17 = vmul.f32 %v1573_v14, %v1573_v14 }
  0xee   : > { %809 = vrot.lane.b32.xlu1 %v543_v17, %s1448_s18  ;;  %561 = vrot.lane.b32.xlu0 %v543_v17, %s1449_s19  ;;  %v548_v32 = vsel %vm544_vm2, %v543_v17, 0.0 }
  0xf2   : > { %807 = vrot.lane.b32.xlu1 %v542_v18, %s1448_s18  ;;  %559 = vrot.lane.b32.xlu0 %v542_v18, %s1449_s19 }
  0xf6   : > { %791 = vrot.lane.b32.xlu1 %v543_v17, %s1450_s20  ;;  %789 = vrot.lane.b32.xlu0 %v542_v18, %s1450_s20  ;;  %v672_v17 = vld [vmem:[%s1708_s5] sm:$0xff]  ;;  %v541_v18 = vld [vmem:[%s460_s15 + $0x8] sm:$0xff] }
 0x160   : > { %v810_v19 = vpop.permute.xlu1 %809  ;;  %v562_v20 = vpop.permute.xlu0 %561 }
 0x161   : > { %v568_v21 = vsel %vm544_vm2, %v562_v20, 0.0  ;;  %v816_v24 = vsel %vm544_vm2, %v810_v19, 0.0 }
 0x162   : > { %569 = vadd.xlane.f32.xlu0 %v568_v21  ;;  %v921_v21 = vstv %s1270_s27 }
 0x164   : > { %v808_v22 = vpop.permute.xlu1 %807  ;;  %v560_v23 = vpop.permute.xlu0 %559 }
 0x165   : > { %v565_v25 = vsel %vm544_vm2, %v560_v23, 0.0  ;;  %v813_v27 = vsel %vm544_vm2, %v808_v22, 0.0  ;;  %v540_v22 = vld [vmem:[%s460_s15] sm:$0xff] }
 0x166   : > { %817 = vadd.xlane.f32.xlu0 %v816_v24  ;;  %566 = vadd.xlane.f32.xlu1 %v565_v25 }
 0x168   : > { %v790_v26 = vpop.permute.xlu0 %789  ;;  %v792_v29 = vpop.permute.xlu1 %791 }
 0x169   : > { %v795_v28 = vsel %vm544_vm2, %v790_v26, 0.0  ;;  %v798_v30 = vsel %vm544_vm2, %v792_v29, 0.0  ;;  %v1271_v29 = vld [vmem:[%s1708_s5 + $0x10] sm:$0xff] }
 0x16a   : > { %814 = vadd.xlane.f32.xlu0 %v813_v27  ;;  %796 = vadd.xlane.f32.xlu1 %v795_v28  ;;  %v1272_v27 = vld [vmem:[%s1708_s5 + $0x18] sm:$0xff] }
 0x16e   : > { %799 = vadd.xlane.f32.xlu0 %v798_v30  ;;  %546 = vadd.xlane.f32.xlu1 %v545_v31 }
 0x172   : > { %549 = vadd.xlane.f32.xlu0 %v548_v32 }
 0x1eb   : > { %v570_v33 = vpop.xlane.xlu0 %569 }
 0x1ec   : > { %v572_v34 = vadd.f32 1e-12, %v570_v33 }
 0x1ee   : > { %1382 = vrsqrt.f32 %v572_v34 }
 0x1ef   : > { %v567_v35 = vpop.xlane.xlu1 %566  ;;  %v818_v36 = vpop.xlane.xlu0 %817 }
 0x1f0   : > { %v571_v37 = vadd.f32 1e-12, %v567_v35  ;;  %v820_v38 = vadd.f32 1e-12, %v818_v36 }
 0x1f2   : > { %1384 = vrsqrt.f32 %v571_v37 }
 0x1f3   : > { %1386 = vrsqrt.f32 %v820_v38  ;;  %v797_v39 = vpop.xlane.xlu1 %796  ;;  %v815_v40 = vpop.xlane.xlu0 %814 }
 0x1f4   : > { %v801_v41 = vadd.f32 1e-12, %v797_v39  ;;  %v819_v42 = vadd.f32 1e-12, %v815_v40 }
 0x1f6   : > { %1388 = vrsqrt.f32 %v801_v41 }
 0x1f7   : > { %1390 = vrsqrt.f32 %v819_v42  ;;  %v547_v43 = vpop.xlane.xlu1 %546  ;;  %v800_v44 = vpop.xlane.xlu0 %799 }
 0x1f8   : > { %v551_v45 = vadd.f32 1e-12, %v547_v43  ;;  %v802_v46 = vadd.f32 1e-12, %v800_v44 }
 0x1fa   : > { %1392 = vrsqrt.f32 %v551_v45 }
 0x1fb   : > { %v1383_v47 = vpop.eup %1382  ;;  %1394 = vrsqrt.f32 %v802_v46  ;;  %v550_v61 = vpop.xlane.xlu0 %549 }
 0x1fc   : > { %v576_v48 = vmul.f32 %v1383_v47, %v1573_v14  ;;  %v552_v62 = vadd.f32 1e-12, %v550_v61 }
 0x1fe   : > { %581 = vrot.lane.b32.xlu1 %v576_v48, %s1449_s19  ;;  %1396 = vrsqrt.f32 %v552_v62 }
 0x1ff   : > { %v1385_v49 = vpop.eup %1384 }
 0x200   : > { %v1387_v50 = vpop.eup %1386  ;;  %v575_v51 = vmul.f32 %v1385_v49, %v1575_v16 }
 0x201   : > { %v824_v52 = vmul.f32 %v1387_v50, %v1573_v14 }
 0x202   : > { %579 = vrot.lane.b32.xlu0 %v575_v51, %s1449_s19 }
 0x203   : > { %v1389_v53 = vpop.eup %1388  ;;  %835 = vrot.lane.b32.xlu1 %v824_v52, %s1448_s18 }
 0x204   : > { %v1391_v54 = vpop.eup %1390  ;;  %v805_v55 = vmul.f32 %v1389_v53, %v1575_v16 }
 0x205   : > { %v823_v56 = vmul.f32 %v1391_v54, %v1575_v16 }
 0x206   : > { %827 = vrot.lane.b32.xlu0 %v805_v55, %s1450_s20 }
 0x207   : > { %v1393_v57 = vpop.eup %1392  ;;  %833 = vrot.lane.b32.xlu1 %v823_v56, %s1448_s18 }
 0x208   : > { %v1395_v58 = vpop.eup %1394  ;;  %v555_v59 = vmul.f32 %v1393_v57, %v1575_v16 }
 0x209   : > { %v806_v60 = vmul.f32 %v1395_v58, %v1573_v14 }
 0x20a   : > { %1318 = vmatprep.mubr.msk.f32.mxu1 %vm544_vm2, %v555_v59 }
 0x20b   : > { %829 = vrot.lane.b32.xlu1 %v806_v60, %s1450_s20  ;;  %v1397_v0 = vpop.eup %1396 }
 0x20c   : > { %v556_v4 = vmul.f32 %v1397_v0, %v1573_v14 }
 0x270   : > { %v582_v63 = vpop.permute.xlu1 %581 }
 0x271   : > { %1314 = vmatprep.subr.msk.mxu1 %vm544_vm2, %v582_v63 }
 0x272   : > { %1315 = vmatpush3.xpose.msk.msra.mxu1 %vm544_vm2, %v582_v63 }
 0x274   : > { %v580_v1 = vpop.permute.xlu0 %579 }
 0x275   : > { %v836_v2 = vpop.permute.xlu1 %835  ;;  %1316 = vmatprep.subr.msk.mxu1 %vm544_vm2, %v580_v1 }
 0x276   : > { %1328 = vmatprep.subr.msk.mxu0 %vm544_vm2, %v836_v2  ;;  %1317 = vmatpush3.xpose.msk.msra.mxu1 %vm544_vm2, %v580_v1 }
 0x277   : > { %1329 = vmatpush3.xpose.msk.msra.mxu0 %vm544_vm2, %v836_v2 }
 0x278   : > { %v828_v5 = vpop.permute.xlu0 %827 }
 0x279   : > { %v834_v6 = vpop.permute.xlu1 %833  ;;  %1319 = vmatmul.mubr.msk.f32.vlgmr.msra.gmra.mxu1 %vm544_vm2, %v556_v4  ;;  %1332 = vmatprep.mubr.msk.f32.mxu0 %vm544_vm2, %v828_v5 }
 0x27a   : > { %1330 = vmatprep.subr.msk.mxu0 %vm544_vm2, %v834_v6 }
 0x27b   : > { %1331 = vmatpush3.xpose.msk.msra.mxu0 %vm544_vm2, %v834_v6 }
 0x27c   : > { %1342 = vmatprep.subr.bf16.mxu0 %v1446_v3 }
 0x27d   : > { %v830_v9 = vpop.permute.xlu1 %829 }
 0x27e   : > { %1333 = vmatmul.mubr.msk.f32.vlgmr.msra.gmra.mxu0 %vm544_vm2, %v830_v9 }
 0x27f   : > { %1346 = vmatprep.mubr.msk.bf16.mxu0 %vm1447_vm0, %v1446_v3 }
 0x339   : > { %v1320_v11 = vpop.f32.mrf.mxu1 }
 0x33a   : > { %v671_v13 = vmul.f32 %v1320_v11, %v669_v10 }
 0x33b   : > { %v659_v15 = vpop.f32.mrf.mxu1 }
 0x33c   : > { %v675_v19 = vadd.f32 %v673_v12, %v671_v13  ;;  %v670_v20 = vmul.f32 %v669_v10, %v659_v15  ;;  %v1052_v13 = vld [vmem:[%s1706_s3 + $0x10] sm:$0xff]  ;;  %v1053_v15 = vld [vmem:[%s1706_s3 + $0x18] sm:$0xff] }
 0x33e   : > { %v674_v23 = vadd.f32 %v672_v17, %v670_v20  ;;  %v1334_v24 = vpop.f32.mrf.mxu0  ;;  %v677_v25 = vadd.f32 %v675_v19, %v541_v18  ;;  %v1056_v17 = vpack.c.bf16 %v1053_v15, %v1052_v13  ;;  %v1051_v19 = vld [vmem:[%s1706_s3 + $0x8] sm:$0xff] }
 0x33f   : > { %v923_v26 = vmul.f32 %v1334_v24, %v921_v21 }
 0x340   : > { %v911_v28 = vpop.f32.mrf.mxu0  ;;  %v681_v30 = vsel %vm544_vm2, %v677_v25, -inf  ;;  %v676_v31 = vadd.f32 %v674_v23, %v540_v22  ;;  %1343 = vmatpush3.bf16.msra.mxu0 %v1056_v17 }
 0x341   : > { %v922_v32 = vmul.f32 %v921_v21, %v911_v28  ;;  %682 = vmax.xlane.f32.xlu1 %v681_v30  ;;  %v928_v34 = vadd.f32 %v1272_v27, %v923_v26  ;;  %1344 = vmatprep.subr.bf16.mxu0 %v1446_v3 }
 0x342   : > { %v678_v33 = vsel %vm544_vm2, %v676_v31, -inf }
 0x343   : > { %v927_v35 = vadd.f32 %v1271_v29, %v922_v32  ;;  %679 = vmax.xlane.f32.xlu0 %v678_v33  ;;  %v930_v38 = vadd.f32 %v928_v34, %v541_v18  ;;  %v1050_v18 = vld [vmem:[%s1706_s3] sm:$0xff] }
 0x344   : > { %v1055_v20 = vpack.c.bf16 %v1051_v19, %v1050_v18 }
 0x345   : > { %v929_v36 = vadd.f32 %v927_v35, %v540_v22  ;;  %v934_v39 = vsel %vm544_vm2, %v930_v38, -inf }
 0x346   : > { %1345 = vmatpush3.bf16.msra.mxu0 %v1055_v20 }
 0x347   : > { %v931_v37 = vsel %vm544_vm2, %v929_v36, -inf }
 0x348   : > { %932 = vmax.xlane.f32.xlu0 %v931_v37 }
 0x34c   : > { %935 = vmax.xlane.f32.xlu0 %v934_v39 }
 0x352   : > { %704 = vrot.lane.b32.xlu1 %v1573_v14, %s1451_s23 }
 0x356   : > { %955 = vrot.lane.b32.xlu1 %v1573_v14, %s1452_s24 }
 0x3ca   : > { %v683_v40 = vpop.xlane.xlu1 %682 }
 0x3cb   : > { %v685_v41 = vsub.f32 %v677_v25, %v683_v40 }
 0x3cc   : > { %v680_v42 = vpop.xlane.xlu0 %679 }
 0x3cd   : > { %v688_v43 = vmul.f32 1.442695, %v685_v41  ;;  %v684_v44 = vsub.f32 %v676_v31, %v680_v42  ;;  %v1275_v31 = vld [vmem:[%s1707_s4] ss:$0 sm:$0xff] }
 0x3ce   : > { %v705_v45 = vpop.permute.xlu1 %704 }
 0x3cf   : > { %1398 = vpow2.f32 %v688_v43  ;;  %v686_v46 = vmul.f32 1.442695, %v684_v44  ;;  %1321 = vmatprep.subr.mxu1 %v705_v45 }
 0x3d0   : > { %1322 = vmatpush3.msra.mxu1 %v705_v45 }
 0x3d1   : > { %1400 = vpow2.f32 %v686_v46  ;;  %v933_v47 = vpop.xlane.xlu0 %932 }
 0x3d2   : > { %v937_v48 = vsub.f32 %v929_v36, %v933_v47  ;;  %v956_v60 = vpop.permute.xlu1 %955 }
 0x3d4   : > { %v939_v49 = vmul.f32 1.442695, %v937_v48 }
 0x3d5   : > { %v936_v50 = vpop.xlane.xlu0 %935 }
 0x3d6   : > { %1402 = vpow2.f32 %v939_v49  ;;  %v938_v51 = vsub.f32 %v930_v38, %v936_v50 }
 0x3d8   : > { %v941_v52 = vmul.f32 1.442695, %v938_v51 }
 0x3da   : > { %1404 = vpow2.f32 %v941_v52 }
 0x3dc   : > { %v1399_v14 = vpop.eup %1398 }
 0x3dd   : > { %v693_v53 = vsel %vm544_vm2, %v1399_v14, 0.0 }
 0x3de   : > { %v1401_v54 = vpop.eup %1400  ;;  %694 = vadd.xlane.f32.xlu0 %v693_v53 }
 0x3df   : > { %v690_v55 = vsel %vm544_vm2, %v1401_v54, 0.0 }
 0x3e0   : > { %691 = vadd.xlane.f32.xlu1 %v690_v55 }
 0x3e3   : > { %v1403_v56 = vpop.eup %1402 }
 0x3e4   : > { %v943_v57 = vsel %vm544_vm2, %v1403_v56, 0.0 }
 0x3e5   : > { %944 = vadd.xlane.f32.xlu1 %v943_v57 }
 0x3e7   : > { %v1405_v58 = vpop.eup %1404 }
 0x3e8   : > { %v946_v59 = vsel %vm544_vm2, %v1405_v58, 0.0 }
 0x3e9   : > { %947 = vadd.xlane.f32.xlu0 %v946_v59 }
 0x3f6   : > { %953 = vrot.lane.b32.xlu1 %v1575_v16, %s1452_s24 }
 0x3ff   : > { %702 = vrot.lane.b32.xlu0 %v1575_v16, %s1451_s23 }
 0x467   : > { %v695_v61 = vpop.xlane.xlu0 %694 }
 0x468   : > { %1406 = vrcp.f32 %v695_v61 }
 0x469   : > { %v692_v62 = vpop.xlane.xlu1 %691 }
 0x46a   : > { %1408 = vrcp.f32 %v692_v62 }
 0x46e   : > { %v945_v63 = vpop.xlane.xlu1 %944 }
 0x46f   : > { %1410 = vrcp.f32 %v945_v63 }
 0x472   : > { %v948_v0 = vpop.xlane.xlu0 %947  ;;  %v954_v9 = vpop.permute.xlu1 %953 }
 0x473   : > { %1412 = vrcp.f32 %v948_v0 }
 0x475   : > { %v1407_v1 = vpop.eup %1406 }
 0x476   : > { %v703_v2 = vpop.permute.xlu0 %702  ;;  %v699_v6 = vmul.f32 %v1407_v1, %v1399_v14 }
 0x477   : > { %v1409_v4 = vpop.eup %1408  ;;  %1323 = vmatprep.subr.mxu1 %v703_v2 }
 0x478   : > { %1324 = vmatpush3.msra.mxu1 %v703_v2  ;;  %v698_v5 = vmul.f32 %v1409_v4, %v1401_v54 }
 0x479   : > { %1335 = vmatprep.subr.mxu1 %v956_v60 }
 0x47a   : > { %1325 = vmatprep.mubr.msk.f32.mxu1 %vm544_vm2, %v698_v5 }
 0x47b   : > { %1326 = vmatmul.mubr.msk.f32.vlgmr.msra.gmra.mxu1 %vm544_vm2, %v699_v6 }
 0x47c   : > { %v1411_v16 = vpop.eup %1410  ;;  %1336 = vmatpush3.msra.mxu1 %v956_v60 }
 0x47d   : > { %1337 = vmatprep.subr.mxu1 %v954_v9  ;;  %v951_v10 = vmul.f32 %v1411_v16, %v1403_v56  ;;  %v1277_v56 = vld [vmem:[%s1711_s8] ss:$0 sm:$0xff] }
 0x47e   : > { %1338 = vmatpush3.msra.mxu1 %v954_v9 }
 0x47f   : > { %1339 = vmatprep.mubr.msk.f32.mxu1 %vm544_vm2, %v951_v10 }
 0x480   : > { %v1413_v11 = vpop.eup %1412 }
 0x481   : > { %v952_v12 = vmul.f32 %v1413_v11, %v1405_v58  ;;  %v1278_v58 = vld [vmem:[%s1712_s9] ss:$0 sm:$0xff] }
 0x483   : > { %1340 = vmatmul.mubr.msk.f32.vlgmr.msra.gmra.mxu1 %vm544_vm2, %v952_v12 }
 0x53b   : > { %v1327_v21 = vpop.f32.mrf.mxu1 }
 0x53d   : > { %v780_v22 = vpop.f32.mrf.mxu1 }
 0x543   : > { %v1341_v23 = vpop.f32.mrf.mxu1 }
 0x545   : > { %v1031_v24 = vpop.f32.mrf.mxu1 }
 0x546   : > { %v1377_v25 = vpack.i.bf16 %v1341_v23, %v1031_v24 }
 0x548   : > { %1378 = vrot.lane.b32.xlu0 %v1377_v25, %s1453_s17 }
 0x5ba   : > { %v1379_v26 = vpop.permute.xlu0 %1378 }
 0x5bb   : > { %v1381_v27 = vunpack.i.h.bf16 %v1379_v26  ;;  %v1380_v3 = vunpack.i.l.bf16 %v1379_v26 }
 0x5bd   : > { %v1049_v28 = vsel %vm544_vm2, %v1327_v21, %v1381_v27  ;;  %v1048_v29 = vsel %vm544_vm2, %v780_v22, %v1380_v3 }
 0x5be   : > { %v1054_v30 = vpack.c.bf16 %v1049_v28, %v1048_v29 }
 0x5c0   : > { %1347 = vmatmul.mubr.msk.bf16.vlgmr.msra.gmra.mxu0 %vm495_vm1, %v1054_v30 }
 0x680   : > { %v1101_v32 = vpop.f32.mrf.mxu0 }
 0x681   : > { %v1102_v33 = vadd.f32 %v1275_v31, %v1101_v32 }
 0x682   : > { %v1348_v34 = vpop.f32.mrf.mxu0 }
 0x683   : > { %v1110_v35 = vsel %vm495_vm1, %v1102_v33, 0.0 }
 0x684   : > { %1111 = vadd.xlane.f32.xlu1 %v1110_v35  ;;  %v1104_v36 = vpop.f32.mrf.mxu0 }
 0x685   : > { %v1105_v37 = vadd.f32 %v1275_v31, %v1104_v36 }
 0x686   : > { %v1349_v38 = vpop.f32.mrf.mxu0 }
 0x687   : > { %v1113_v39 = vsel %vm495_vm1, %v1105_v37, 0.0 }
 0x688   : > { %1114 = vadd.xlane.f32.xlu0 %v1113_v39 }
 0x70d   : > { %v1112_v40 = vpop.xlane.xlu1 %1111 }
 0x70e   : > { %v1117_v41 = vmul.f32 0.03125, %v1112_v40 }
 0x710   : > { %v1119_v42 = vsub.f32 %v1102_v33, %v1117_v41 }
 0x711   : > { %v1115_v43 = vpop.xlane.xlu0 %1114 }
 0x712   : > { %v1118_v44 = vmul.f32 0.03125, %v1115_v43  ;;  %v1121_v45 = vmul.f32 %v1119_v42, %v1119_v42 }
 0x714   : > { %v1120_v46 = vsub.f32 %v1105_v37, %v1118_v44  ;;  %v1123_v47 = vsel %vm495_vm1, %v1121_v45, 0.0 }
 0x715   : > { %1124 = vadd.xlane.f32.xlu0 %v1123_v47 }
 0x716   : > { %v1122_v48 = vmul.f32 %v1120_v46, %v1120_v46 }
 0x718   : > { %v1126_v49 = vsel %vm495_vm1, %v1122_v48, 0.0 }
 0x719   : > { %1127 = vadd.xlane.f32.xlu1 %v1126_v49 }
 0x79e   : > { %v1125_v50 = vpop.xlane.xlu0 %1124 }
 0x79f   : > { %v1129_v51 = vmul.f32 0.03125, %v1125_v50 }
 0x7a1   : > { %v1131_v52 = vadd.f32 1e-05, %v1129_v51 }
 0x7a2   : > { %v1128_v14 = vpop.xlane.xlu1 %1127 }
 0x7a3   : > { %1414 = vrsqrt.f32 %v1131_v52  ;;  %v1130_v53 = vmul.f32 0.03125, %v1128_v14 }
 0x7a5   : > { %v1132_v54 = vadd.f32 1e-05, %v1130_v53 }
 0x7a7   : > { %1416 = vrsqrt.f32 %v1132_v54 }
 0x7b0   : > { %v1415_v55 = vpop.eup %1414 }
 0x7b1   : > { %v1135_v57 = vmul.f32 %v1415_v55, %v1119_v42 }
 0x7b3   : > { %v1143_v59 = vmul.f32 %v1277_v56, %v1135_v57 }
 0x7b4   : > { %v1417_v60 = vpop.eup %1416 }
 0x7b5   : > { %v1151_v61 = vadd.f32 %v1278_v58, %v1143_v59  ;;  %v1136_v62 = vmul.f32 %v1417_v60, %v1120_v46 }
 0x7b7   : > { %v1153_v63 = vadd.f32 %v1151_v61, %v1563_v7  ;;  %v1144_v0 = vmul.f32 %v1277_v56, %v1136_v62 }
 0x7b9   : > { %1155 = vst.msk [vmem:[%s477_s25] sm:$0xff] %vm495_vm1, %v1153_v63  ;;  %v1152_v1 = vadd.f32 %v1278_v58, %v1144_v0 }
 0x7bb   : > { %v1154_v2 = vadd.f32 %v1152_v1, %v1565_v8 }
 0x7bd   : > { %1156 = vst.msk [vmem:[%s477_s25 + $0x8] sm:$0xff] %vm495_vm1, %v1154_v2 }
 0x7be PF: > { %s21_s13 = sadd.s32 1, %s1443_s13  }
 0x7bf   : > { %p18_p4 = scmp.ge.s32.totalorder %s21_s13, 10  }
 0x7c1   :  { %20 = sbr.rel (!%p18_p4) target bundleno = 1 (0x1), region = 99 }
 0x7c6   :  { %1178 = vsyncpa [#allocation3], 1 }
 0x7c7   :  { %1180 = vsyncpa [#allocation3 + $0x1], 1 }

// kernel: swinv2_forward.16
= control target key start
LH: loop header
LB: loop body
LE: loop exit
PB: predicated region body
PF: predicated region fallthrough
CT: control target
= control target key end

     0   :  { %vm109_vm0 = vcmask 523264   ;;  %s355_s1 = inlined_call_operand.vmem [shape: f32[128,64], index: 1, kind: input, shape index: {}]   ;;  %s356_s0 = inlined_call_operand.vmem [shape: f32[32,128], index: 0, kind: input, shape index: {}]   ;;  %s357_s2 = inlined_call_operand.vmem [shape: f32[1,64], index: 2, kind: input, shape index: {}]   ;;  %s358_s3 = inlined_call_operand.vmem [shape: f32[1,64], index: 3, kind: input, shape index: {}]   ;;  %s359_s4 = inlined_call_operand.vmem [shape: f32[1,64], index: 4, kind: input, shape index: {}]   ;;  %s360_s5 = inlined_call_operand.vmem [shape: f32[32,64], index: 5, kind: output, shape index: {}]  }
   0x1   :  { %v39_v0 = vld [vmem:[%s355_s1 + $0x70] sm:$0xff]  ;;  %v40_v1 = vld [vmem:[%s355_s1 + $0x78] sm:$0xff]  ;;  %v37_v2 = vld [vmem:[%s355_s1 + $0x60] sm:$0xff] }
   0x2   :  { %v50_v3 = vpack.c.bf16 %v40_v1, %v39_v0  ;;  %v38_v4 = vld [vmem:[%s355_s1 + $0x68] sm:$0xff]  ;;  %v35_v6 = vld [vmem:[%s355_s1 + $0x50] sm:$0xff]  ;;  %v36_v7 = vld [vmem:[%s355_s1 + $0x58] sm:$0xff] }
   0x3   :  { %v49_v5 = vpack.c.bf16 %v38_v4, %v37_v2  ;;  %v48_v8 = vpack.c.bf16 %v36_v7, %v35_v6  ;;  %v21_v9 = vld [vmem:[%s356_s0] sm:$0xff]  ;;  %v22_v10 = vld [vmem:[%s356_s0 + $0x8] sm:$0xff]  ;;  %v31_v15 = vld [vmem:[%s355_s1 + $0x30] sm:$0xff] }
   0x4   :  { %204 = vmatprep.subr.bf16.mxu0 %v50_v3  ;;  %v33_v11 = vld [vmem:[%s355_s1 + $0x40] sm:$0xff]  ;;  %v34_v12 = vld [vmem:[%s355_s1 + $0x48] sm:$0xff]  ;;  %v41_v13 = vpack.c.bf16 %v22_v10, %v21_v9  ;;  %v32_v16 = vld [vmem:[%s355_s1 + $0x38] sm:$0xff] }
   0x5   :  { %205 = vmatpush3.bf16.msra.mxu0 %v50_v3  ;;  %v47_v14 = vpack.c.bf16 %v34_v12, %v33_v11  ;;  %v46_v17 = vpack.c.bf16 %v32_v16, %v31_v15  ;;  %v29_v18 = vld [vmem:[%s355_s1 + $0x20] sm:$0xff]  ;;  %v30_v19 = vld [vmem:[%s355_s1 + $0x28] sm:$0xff]  ;;  %v27_v21 = vld [vmem:[%s355_s1 + $0x10] sm:$0xff] }
   0x6   :  { %206 = vmatprep.subr.bf16.mxu0 %v49_v5  ;;  %220 = vmatprep.mubr.bf16.mxu0 %v41_v13  ;;  %v45_v20 = vpack.c.bf16 %v30_v19, %v29_v18  ;;  %v28_v22 = vld [vmem:[%s355_s1 + $0x18] sm:$0xff]  ;;  %v25_v24 = vld [vmem:[%s355_s1] sm:$0xff]  ;;  %v26_v25 = vld [vmem:[%s355_s1 + $0x8] sm:$0xff] }
   0x7   :  { %v44_v23 = vpack.c.bf16 %v28_v22, %v27_v21  ;;  %v43_v26 = vpack.c.bf16 %v26_v25, %v25_v24  ;;  %v23_v27 = vld [vmem:[%s356_s0 + $0x10] sm:$0xff]  ;;  %v24_v28 = vld [vmem:[%s356_s0 + $0x18] sm:$0xff]  ;;  %v191_v30 = vld [vmem:[%s357_s2] ss:$0 sm:$0xff] }
   0x8   :  { %v42_v29 = vpack.c.bf16 %v24_v28, %v23_v27  ;;  %v192_v12 = vld [vmem:[%s358_s3] ss:$0 sm:$0xff] }
   0x9   :  { %207 = vmatpush3.bf16.msra.mxu0 %v49_v5 }
   0xa   :  { %208 = vmatprep.subr.bf16.mxu0 %v48_v8 }
   0xd   :  { %209 = vmatpush3.bf16.msra.mxu0 %v48_v8 }
   0xe   :  { %210 = vmatprep.subr.bf16.mxu0 %v47_v14 }
  0x11   :  { %211 = vmatpush3.bf16.msra.mxu0 %v47_v14  ;;  %v193_v14 = vld [vmem:[%s359_s4] ss:$0 sm:$0xff] }
  0x12   :  { %212 = vmatprep.subr.bf16.mxu0 %v46_v17 }
  0x15   :  { %213 = vmatpush3.bf16.msra.mxu0 %v46_v17 }
  0x16   :  { %214 = vmatprep.subr.bf16.mxu0 %v45_v20 }
  0x19   :  { %215 = vmatpush3.bf16.msra.mxu0 %v45_v20 }
  0x1a   :  { %216 = vmatprep.subr.bf16.mxu0 %v44_v23 }
  0x1d   :  { %217 = vmatpush3.bf16.msra.mxu0 %v44_v23 }
  0x1e   :  { %218 = vmatprep.subr.bf16.mxu0 %v43_v26 }
  0x21   :  { %219 = vmatpush3.bf16.msra.mxu0 %v43_v26 }
  0x24   :  { %221 = vmatmul.mubr.bf16.vlgmr.msra.gmra.mxu0 %v42_v29 }
  0xe4   :  { %v222_v31 = vpop.f32.mrf.mxu0 }
  0xe5   :  { %v101_v32 = vadd.f32 %v222_v31, %v191_v30 }
  0xe6   :  { %v92_v33 = vpop.f32.mrf.mxu0 }
  0xe7   :  { %v93_v34 = vadd.f32 %v191_v30, %v92_v33  ;;  %v116_v35 = vsel %vm109_vm0, %v101_v32, 0.0 }
  0xe8   :  { %117 = vadd.xlane.f32.xlu1 %v116_v35  ;;  %v223_v36 = vpop.f32.mrf.mxu0 }
  0xe9   :  { %v104_v37 = vadd.f32 %v223_v36, %v191_v30  ;;  %v110_v38 = vsel %vm109_vm0, %v93_v34, 0.0 }
  0xea   :  { %v95_v39 = vpop.f32.mrf.mxu0  ;;  %111 = vadd.xlane.f32.xlu0 %v110_v38 }
  0xeb   :  { %v96_v40 = vadd.f32 %v191_v30, %v95_v39  ;;  %v119_v41 = vsel %vm109_vm0, %v104_v37, 0.0 }
  0xec   :  { %120 = vadd.xlane.f32.xlu1 %v119_v41 }
  0xed   :  { %v113_v42 = vsel %vm109_vm0, %v96_v40, 0.0 }
  0xee   :  { %114 = vadd.xlane.f32.xlu0 %v113_v42 }
 0x171   :  { %v118_v43 = vpop.xlane.xlu1 %117 }
 0x172   :  { %v125_v44 = vmul.f32 0.015625, %v118_v43 }
 0x173   :  { %v112_v45 = vpop.xlane.xlu0 %111 }
 0x174   :  { %v123_v46 = vmul.f32 0.015625, %v112_v45  ;;  %v129_v48 = vsub.f32 %v101_v32, %v125_v44 }
 0x175   :  { %v121_v47 = vpop.xlane.xlu1 %120 }
 0x176   :  { %v127_v49 = vsub.f32 %v93_v34, %v123_v46  ;;  %v126_v50 = vmul.f32 0.015625, %v121_v47  ;;  %v133_v57 = vmul.f32 %v129_v48, %v129_v48 }
 0x177   :  { %v115_v51 = vpop.xlane.xlu0 %114 }
 0x178   :  { %v124_v52 = vmul.f32 0.015625, %v115_v51  ;;  %v131_v53 = vmul.f32 %v127_v49, %v127_v49  ;;  %v130_v54 = vsub.f32 %v104_v37, %v126_v50  ;;  %v141_v59 = vsel %vm109_vm0, %v133_v57, 0.0 }
 0x17a   :  { %v128_v55 = vsub.f32 %v96_v40, %v124_v52  ;;  %v135_v56 = vsel %vm109_vm0, %v131_v53, 0.0  ;;  %v134_v61 = vmul.f32 %v130_v54, %v130_v54 }
 0x17b   :  { %136 = vadd.xlane.f32.xlu0 %v135_v56 }
 0x17c   :  { %v132_v58 = vmul.f32 %v128_v55, %v128_v55  ;;  %v144_v62 = vsel %vm109_vm0, %v134_v61, 0.0 }
 0x17e   :  { %v138_v60 = vsel %vm109_vm0, %v132_v58, 0.0 }
 0x17f   :  { %142 = vadd.xlane.f32.xlu0 %v141_v59  ;;  %139 = vadd.xlane.f32.xlu1 %v138_v60 }
 0x183   :  { %145 = vadd.xlane.f32.xlu1 %v144_v62 }
 0x204   :  { %v137_v63 = vpop.xlane.xlu0 %136 }
 0x205   :  { %v147_v0 = vmul.f32 0.015625, %v137_v63 }
 0x207   :  { %v151_v1 = vadd.f32 1e-05, %v147_v0 }
 0x208   :  { %v140_v2 = vpop.xlane.xlu1 %139  ;;  %v143_v3 = vpop.xlane.xlu0 %142 }
 0x209   :  { %224 = vrsqrt.f32 %v151_v1  ;;  %v148_v4 = vmul.f32 0.015625, %v140_v2  ;;  %v149_v5 = vmul.f32 0.015625, %v143_v3 }
 0x20b   :  { %v152_v6 = vadd.f32 1e-05, %v148_v4  ;;  %v153_v7 = vadd.f32 1e-05, %v149_v5 }
 0x20c   :  { %v146_v8 = vpop.xlane.xlu1 %145 }
 0x20d   :  { %226 = vrsqrt.f32 %v152_v6  ;;  %v150_v9 = vmul.f32 0.015625, %v146_v8 }
 0x20e   :  { %228 = vrsqrt.f32 %v153_v7 }
 0x20f   :  { %v154_v10 = vadd.f32 1e-05, %v150_v9 }
 0x211   :  { %230 = vrsqrt.f32 %v154_v10 }
 0x216   :  { %v225_v11 = vpop.eup %224 }
 0x217   :  { %v159_v13 = vmul.f32 %v225_v11, %v127_v49 }
 0x219   :  { %v169_v15 = vmul.f32 %v192_v12, %v159_v13 }
 0x21a   :  { %v227_v16 = vpop.eup %226 }
 0x21b   :  { %v229_v17 = vpop.eup %228  ;;  %v179_v18 = vadd.f32 %v193_v14, %v169_v15  ;;  %v160_v19 = vmul.f32 %v227_v16, %v128_v55 }
 0x21c   :  { %v161_v20 = vmul.f32 %v229_v17, %v129_v48 }
 0x21d   :  { %183 = vst.msk [vmem:[%s360_s5] sm:$0xff] %vm109_vm0, %v179_v18  ;;  %v170_v21 = vmul.f32 %v192_v12, %v160_v19 }
 0x21e   :  { %v231_v22 = vpop.eup %230  ;;  %v171_v23 = vmul.f32 %v192_v12, %v161_v20 }
 0x21f   :  { %v180_v24 = vadd.f32 %v193_v14, %v170_v21  ;;  %v162_v25 = vmul.f32 %v231_v22, %v130_v54 }
 0x220   :  { %v181_v26 = vadd.f32 %v193_v14, %v171_v23 }
 0x221   :  { %184 = vst.msk [vmem:[%s360_s5 + $0x8] sm:$0xff] %vm109_vm0, %v180_v24  ;;  %v172_v27 = vmul.f32 %v192_v12, %v162_v25 }
 0x222   :  { %185 = vst.msk [vmem:[%s360_s5 + $0x10] sm:$0xff] %vm109_vm0, %v181_v26 }
 0x223   :  { %v182_v28 = vadd.f32 %v193_v14, %v172_v27 }
 0x225   :  { %186 = vst.msk [vmem:[%s360_s5 + $0x18] sm:$0xff] %vm109_vm0, %v182_v28 }

// kernel: swinv2_forward.18
= control target key start
LH: loop header
LB: loop body
LE: loop exit
PB: predicated region body
PF: predicated region fallthrough
CT: control target
= control target key end

     0   :  { %v454_v3 = vmov 0   ;;  %vm69_vm0 = vcmask 523264   ;;  %s754_s1 = inlined_call_operand.vmem [shape: f32[64,256], index: 1, kind: input, shape index: {}]   ;;  %s755_s0 = inlined_call_operand.vmem [shape: f32[32,64], index: 0, kind: input, shape index: {}]   ;;  %s756_s3 = inlined_call_operand.vmem [shape: f32[256,64], index: 3, kind: input, shape index: {}]   ;;  %s757_s2 = inlined_call_operand.vmem [shape: f32[1,256], index: 2, kind: input, shape index: {}]   ;;  %s758_s4 = inlined_call_operand.vmem [shape: f32[1,64], index: 4, kind: input, shape index: {}]   ;;  %s759_s5 = inlined_call_operand.vmem [shape: f32[1,64], index: 5, kind: input, shape index: {}]   ;;  %s760_s6 = inlined_call_operand.vmem [shape: f32[1,64], index: 6, kind: input, shape index: {}]   ;;  %s761_s7 = inlined_call_operand.vmem [shape: f32[32,64], index: 7, kind: output, shape index: {}]  }
   0x1   :  { %v44_v0 = vld [vmem:[%s754_s1 + $0x68] sm:$0xff]  ;;  %v46_v1 = vld [vmem:[%s754_s1 + $0x78] sm:$0xff]  ;;  %v43_v2 = vld [vmem:[%s754_s1 + $0x60] sm:$0xff]  ;;  %108 = vmatprep.mubr.bf16.mxu0 %v454_v3 }
   0x2   :  { %v56_v4 = vpack.c.bf16 %v46_v1, %v44_v0  ;;  %v45_v5 = vld [vmem:[%s754_s1 + $0x70] sm:$0xff]  ;;  %v40_v6 = vld [vmem:[%s754_s1 + $0x48] sm:$0xff]  ;;  %v42_v7 = vld [vmem:[%s754_s1 + $0x58] sm:$0xff] }
   0x3   :  { %v55_v8 = vpack.c.bf16 %v45_v5, %v43_v2  ;;  %v54_v9 = vpack.c.bf16 %v42_v7, %v40_v6  ;;  %v39_v10 = vld [vmem:[%s754_s1 + $0x40] sm:$0xff]  ;;  %v41_v11 = vld [vmem:[%s754_s1 + $0x50] sm:$0xff]  ;;  %v36_v12 = vld [vmem:[%s754_s1 + $0x28] sm:$0xff] }
   0x4   :  { %84 = vmatprep.subr.bf16.mxu0 %v56_v4  ;;  %v38_v13 = vld [vmem:[%s754_s1 + $0x38] sm:$0xff]  ;;  %v53_v14 = vpack.c.bf16 %v41_v11, %v39_v10  ;;  %v35_v16 = vld [vmem:[%s754_s1 + $0x20] sm:$0xff]  ;;  %v37_v17 = vld [vmem:[%s754_s1 + $0x30] sm:$0xff] }
   0x5   :  { %85 = vmatpush1.bf16.msra.mxu0 %v55_v8  ;;  %v52_v15 = vpack.c.bf16 %v38_v13, %v36_v12  ;;  %v32_v18 = vld [vmem:[%s754_s1 + $0x8] sm:$0xff]  ;;  %v34_v19 = vld [vmem:[%s754_s1 + $0x18] sm:$0xff]  ;;  %v51_v20 = vpack.c.bf16 %v37_v17, %v35_v16  ;;  %v31_v22 = vld [vmem:[%s754_s1] sm:$0xff] }
   0x6   :  { %86 = vmatprep.subr.bf16.mxu0 %v54_v9  ;;  %v50_v21 = vpack.c.bf16 %v34_v19, %v32_v18  ;;  %v33_v23 = vld [vmem:[%s754_s1 + $0x10] sm:$0xff]  ;;  %v546_v25 = vld [vmem:[%s755_s0] sm:$0xff]  ;;  %v551_v26 = vld [vmem:[%s755_s0 + $0x8] sm:$0xff] }
   0x7   :  { %v49_v24 = vpack.c.bf16 %v33_v23, %v31_v22  ;;  %v47_v27 = vpack.c.bf16 %v551_v26, %v546_v25  ;;  %v559_v28 = vld [vmem:[%s755_s0 + $0x10] sm:$0xff]  ;;  %v564_v29 = vld [vmem:[%s755_s0 + $0x18] sm:$0xff]  ;;  %v229_v37 = vld [vmem:[%s756_s3 + $0xe0] sm:$0xff] }
   0x8   :  { %v48_v30 = vpack.c.bf16 %v564_v29, %v559_v28  ;;  %v231_v31 = vld [vmem:[%s756_s3 + $0xf0] sm:$0xff]  ;;  %v232_v32 = vld [vmem:[%s756_s3 + $0xf8] sm:$0xff]  ;;  %v230_v38 = vld [vmem:[%s756_s3 + $0xe8] sm:$0xff] }
   0x9   :  { %87 = vmatpush1.bf16.msra.mxu0 %v53_v14  ;;  %v252_v33 = vpack.c.bf16 %v232_v32, %v231_v31  ;;  %v215_v34 = vld [vmem:[%s756_s3 + $0x70] sm:$0xff]  ;;  %v216_v35 = vld [vmem:[%s756_s3 + $0x78] sm:$0xff]  ;;  %v251_v39 = vpack.c.bf16 %v230_v38, %v229_v37  ;;  %v213_v40 = vld [vmem:[%s756_s3 + $0x60] sm:$0xff] }
   0xa   :  { %88 = vmatprep.subr.bf16.mxu0 %v52_v15  ;;  %v244_v36 = vpack.c.bf16 %v216_v35, %v215_v34  ;;  %v214_v41 = vld [vmem:[%s756_s3 + $0x68] sm:$0xff]  ;;  %v227_v43 = vld [vmem:[%s756_s3 + $0xd0] sm:$0xff]  ;;  %v228_v44 = vld [vmem:[%s756_s3 + $0xd8] sm:$0xff]  ;;  %v59_v15 = vlaneseq }
   0xb   :  { %401 = vmatprep.subr.bf16.mxu1 %v252_v33  ;;  %v243_v42 = vpack.c.bf16 %v214_v41, %v213_v40  ;;  %v250_v45 = vpack.c.bf16 %v228_v44, %v227_v43  ;;  %v211_v46 = vld [vmem:[%s756_s3 + $0x50] sm:$0xff]  ;;  %v212_v47 = vld [vmem:[%s756_s3 + $0x58] sm:$0xff]  ;;  %v225_v49 = vld [vmem:[%s756_s3 + $0xc0] sm:$0xff] }
   0xc   :  { %402 = vmatpush3.bf16.msra.mxu1 %v244_v36  ;;  %v242_v48 = vpack.c.bf16 %v212_v47, %v211_v46  ;;  %v226_v50 = vld [vmem:[%s756_s3 + $0xc8] sm:$0xff]  ;;  %v209_v52 = vld [vmem:[%s756_s3 + $0x40] sm:$0xff]  ;;  %v223_v55 = vld [vmem:[%s756_s3 + $0xb0] sm:$0xff]  ;;  %v60_v16 = vshrl.u32 %v59_v15, 7 }
   0xd   :  { %89 = vmatpush1.bf16.msra.mxu0 %v51_v20  ;;  %403 = vmatprep.subr.bf16.mxu1 %v251_v39  ;;  %v249_v51 = vpack.c.bf16 %v226_v50, %v225_v49  ;;  %v210_v53 = vld [vmem:[%s756_s3 + $0x48] sm:$0xff]  ;;  %v224_v56 = vld [vmem:[%s756_s3 + $0xb8] sm:$0xff]  ;;  %v207_v58 = vld [vmem:[%s756_s3 + $0x30] sm:$0xff] }
   0xe   :  { %90 = vmatprep.subr.bf16.mxu0 %v50_v21  ;;  %v241_v54 = vpack.c.bf16 %v210_v53, %v209_v52  ;;  %v248_v57 = vpack.c.bf16 %v224_v56, %v223_v55  ;;  %v208_v59 = vld [vmem:[%s756_s3 + $0x38] sm:$0xff]  ;;  %v221_v61 = vld [vmem:[%s756_s3 + $0xa0] sm:$0xff]  ;;  %v222_v62 = vld [vmem:[%s756_s3 + $0xa8] sm:$0xff]  ;;  %v61_v17 = vsub.s32 0, %v60_v16  ;;  %v65_v19 = vsub.s32 1, %v60_v16 }
   0xf   :  { %v240_v60 = vpack.c.bf16 %v208_v59, %v207_v58  ;;  %v205_v63 = vld [vmem:[%s756_s3 + $0x20] sm:$0xff]  ;;  %v247_v0 = vpack.c.bf16 %v222_v62, %v221_v61  ;;  %v206_v1 = vld [vmem:[%s756_s3 + $0x28] sm:$0xff]  ;;  %v219_v2 = vld [vmem:[%s756_s3 + $0x90] sm:$0xff] }
  0x10   :  { %404 = vmatpush3.bf16.msra.mxu1 %v243_v42  ;;  %v239_v4 = vpack.c.bf16 %v206_v1, %v205_v63  ;;  %v203_v6 = vld [vmem:[%s756_s3 + $0x10] sm:$0xff]  ;;  %v204_v7 = vld [vmem:[%s756_s3 + $0x18] sm:$0xff]  ;;  %v217_v8 = vld [vmem:[%s756_s3 + $0x80] sm:$0xff] }
  0x11   :  { %91 = vmatpush1.bf16.msra.mxu0 %v49_v24  ;;  %405 = vmatprep.subr.bf16.mxu1 %v250_v45  ;;  %v218_v9 = vld [vmem:[%s756_s3 + $0x88] sm:$0xff]  ;;  %v238_v10 = vpack.c.bf16 %v204_v7, %v203_v6  ;;  %v201_v12 = vld [vmem:[%s756_s3] sm:$0xff] }
  0x12   :  { %v245_v11 = vpack.c.bf16 %v218_v9, %v217_v8  ;;  %v202_v13 = vld [vmem:[%s756_s3 + $0x8] sm:$0xff]  ;;  %v57_v18 = vld [vmem:[%s757_s2] sm:$0x3] }
  0x13   :  { %v237_v14 = vpack.c.bf16 %v202_v13, %v201_v12  ;;  %v62_v20 = vrot.slane %v57_v18, %v61_v17  ;;  %v66_v21 = vrot.slane %v57_v18, %v65_v19 }
  0x14   :  { %396 = vmatmul.mubr.msk.bf16.vlgmr.msra.gmra.mxu0 %vm69_vm0, %v47_v27  ;;  %406 = vmatpush3.bf16.msra.mxu1 %v242_v48 }
  0x15   :  { %118 = vmatprep.mubr.bf16.mxu0 %v454_v3  ;;  %407 = vmatprep.subr.bf16.mxu1 %v249_v51  ;;  %v220_v3 = vld [vmem:[%s756_s3 + $0x98] sm:$0xff] }
  0x16   :  { %v246_v5 = vpack.c.bf16 %v220_v3, %v219_v2 }
  0x18   :  { %408 = vmatpush3.bf16.msra.mxu1 %v241_v54 }
  0x19   :  { %409 = vmatprep.subr.bf16.mxu1 %v248_v57 }
  0x1c   :  { %397 = vmatmul.mubr.msk.bf16.gmra.mxu0 %vm69_vm0, %v48_v30  ;;  %410 = vmatpush3.bf16.msra.mxu1 %v240_v60 }
  0x1d   :  { %411 = vmatprep.subr.bf16.mxu1 %v247_v0 }
  0x20   :  { %412 = vmatpush3.bf16.msra.mxu1 %v239_v4 }
  0x21   :  { %413 = vmatprep.subr.bf16.mxu1 %v246_v5 }
  0x24   :  { %414 = vmatpush3.bf16.msra.mxu1 %v238_v10 }
  0x25   :  { %415 = vmatprep.subr.bf16.mxu1 %v245_v11 }
  0x28   :  { %416 = vmatpush3.bf16.msra.mxu1 %v237_v14 }
  0xd4   :  { %v110_v22 = vpop.f32.mrf.mxu0 }
  0xd5   :  { %v668_v23 = vadd.f32 %v110_v22, %v62_v20 }
  0xd6   :  { %v112_v24 = vpop.f32.mrf.mxu0 }
  0xd7   :  { %v129_v27 = vmul.f32 %v668_v23, %v668_v23  ;;  %v672_v30 = vadd.f32 %v112_v24, %v66_v21 }
  0xd8   :  { %v114_v31 = vpop.f32.mrf.mxu0 }
  0xd9   :  { %v137_v32 = vmul.f32 %v129_v27, %v668_v23  ;;  %v130_v33 = vmul.f32 %v672_v30, %v672_v30  ;;  %v677_v34 = vadd.f32 %v114_v31, %v62_v20 }
  0xda   :  { %v116_v35 = vpop.f32.mrf.mxu0 }
  0xdb   :  { %v145_v36 = vmul.f32 0.044715, %v137_v32  ;;  %v138_v37 = vmul.f32 %v130_v33, %v672_v30  ;;  %v131_v38 = vmul.f32 %v677_v34, %v677_v34  ;;  %v682_v39 = vadd.f32 %v116_v35, %v66_v21 }
  0xdc   :  { %v120_v40 = vpop.f32.mrf.mxu0 }
  0xdd   :  { %v153_v41 = vadd.f32 %v145_v36, %v668_v23  ;;  %v146_v42 = vmul.f32 0.044715, %v138_v37  ;;  %v139_v43 = vmul.f32 %v131_v38, %v677_v34  ;;  %v132_v44 = vmul.f32 %v682_v39, %v682_v39 }
  0xde   :  { %v688_v45 = vadd.f32 %v120_v40, %v62_v20  ;;  %v122_v46 = vpop.f32.mrf.mxu0 }
  0xdf   :  { %v161_v47 = vmul.f32 0.7978846, %v153_v41  ;;  %v154_v48 = vadd.f32 %v146_v42, %v672_v30  ;;  %v147_v49 = vmul.f32 0.044715, %v139_v43  ;;  %v140_v50 = vmul.f32 %v132_v44, %v682_v39 }
  0xe0   :  { %v133_v51 = vmul.f32 %v688_v45, %v688_v45  ;;  %v694_v52 = vadd.f32 %v122_v46, %v66_v21  ;;  %v124_v53 = vpop.f32.mrf.mxu0 }
  0xe1   :  { %v155_v54 = vadd.f32 %v147_v49, %v677_v34  ;;  %v148_v55 = vmul.f32 0.044715, %v140_v50  ;;  %v697_v56 = vadd.f32 %v124_v53, %v62_v20  ;;  %430 = vtanh.f32 %v161_v47 }
  0xe2   :  { %v141_v57 = vmul.f32 %v133_v51, %v688_v45  ;;  %v134_v58 = vmul.f32 %v694_v52, %v694_v52  ;;  %v126_v59 = vpop.f32.mrf.mxu0  ;;  %v162_v60 = vmul.f32 0.7978846, %v154_v48 }
  0xe3   :  { %v163_v61 = vmul.f32 0.7978846, %v155_v54  ;;  %v156_v62 = vadd.f32 %v148_v55, %v682_v39  ;;  %v135_v63 = vmul.f32 %v697_v56, %v697_v56  ;;  %v127_v0 = vadd.f32 %v126_v59, %v66_v21 }
  0xe4   :  { %v149_v1 = vmul.f32 0.044715, %v141_v57  ;;  %v142_v2 = vmul.f32 %v134_v58, %v694_v52  ;;  %432 = vtanh.f32 %v162_v60 }
  0xe5   :  { %434 = vtanh.f32 %v163_v61  ;;  %v143_v3 = vmul.f32 %v135_v63, %v697_v56  ;;  %v136_v4 = vmul.f32 %v127_v0, %v127_v0  ;;  %v164_v5 = vmul.f32 0.7978846, %v156_v62  ;;  %v398_v63 = vld [vmem:[%s758_s4] ss:$0 sm:$0xff] }
  0xe6   :  { %v157_v6 = vadd.f32 %v149_v1, %v688_v45  ;;  %v150_v7 = vmul.f32 0.044715, %v142_v2 }
  0xe7   :  { %v151_v8 = vmul.f32 0.044715, %v143_v3  ;;  %v144_v9 = vmul.f32 %v136_v4, %v127_v0  ;;  %436 = vtanh.f32 %v164_v5 }
  0xe8   :  { %v165_v10 = vmul.f32 0.7978846, %v157_v6  ;;  %v158_v11 = vadd.f32 %v150_v7, %v694_v52 }
  0xe9   :  { %v159_v12 = vadd.f32 %v151_v8, %v697_v56  ;;  %v152_v13 = vmul.f32 0.044715, %v144_v9 }
  0xea   :  { %438 = vtanh.f32 %v165_v10  ;;  %v166_v14 = vmul.f32 0.7978846, %v158_v11 }
  0xeb   :  { %v167_v15 = vmul.f32 0.7978846, %v159_v12  ;;  %v160_v16 = vadd.f32 %v152_v13, %v127_v0 }
  0xec   :  { %440 = vtanh.f32 %v166_v14 }
  0xed   :  { %442 = vtanh.f32 %v167_v15  ;;  %v168_v17 = vmul.f32 0.7978846, %v160_v16 }
  0xee   :  { %v431_v18 = vpop.eup %430 }
  0xef   :  { %444 = vtanh.f32 %v168_v17  ;;  %v177_v22 = vadd.f32 1.0, %v431_v18 }
  0xf1   :  { %v433_v19 = vpop.eup %432  ;;  %v185_v35 = vmul.f32 0.5, %v177_v22 }
  0xf2   :  { %v435_v20 = vpop.eup %434  ;;  %v178_v21 = vadd.f32 1.0, %v433_v19 }
  0xf3   :  { %v179_v24 = vadd.f32 1.0, %v435_v20  ;;  %v193_v44 = vmul.f32 %v185_v35, %v668_v23 }
  0xf4   :  { %v437_v27 = vpop.eup %436  ;;  %v186_v32 = vmul.f32 0.5, %v178_v21 }
  0xf5   :  { %v180_v31 = vadd.f32 1.0, %v437_v27  ;;  %v187_v33 = vmul.f32 0.5, %v179_v24 }
  0xf6   :  { %v194_v41 = vmul.f32 %v186_v32, %v672_v30 }
  0xf7   :  { %v439_v36 = vpop.eup %438  ;;  %v188_v37 = vmul.f32 0.5, %v180_v31  ;;  %v195_v38 = vmul.f32 %v187_v33, %v677_v34 }
  0xf8   :  { %v181_v47 = vadd.f32 1.0, %v439_v36 }
  0xf9   :  { %v441_v40 = vpop.eup %440  ;;  %v196_v42 = vmul.f32 %v188_v37, %v682_v39  ;;  %v233_v51 = vpack.c.bf16 %v195_v38, %v193_v44 }
  0xfa   :  { %v443_v43 = vpop.eup %442  ;;  %v182_v46 = vadd.f32 1.0, %v441_v40  ;;  %v189_v34 = vmul.f32 0.5, %v181_v47 }
  0xfb   :  { %v234_v48 = vpack.c.bf16 %v196_v42, %v194_v41  ;;  %v183_v49 = vadd.f32 1.0, %v443_v43 }
  0xfc   :  { %v445_v50 = vpop.eup %444  ;;  %v190_v54 = vmul.f32 0.5, %v182_v46  ;;  %v197_v23 = vmul.f32 %v189_v34, %v688_v45 }
  0xfd   :  { %292 = vmatprep.mubr.bf16.mxu1 %v234_v48  ;;  %v184_v53 = vadd.f32 1.0, %v445_v50  ;;  %v191_v55 = vmul.f32 0.5, %v183_v49 }
  0xfe   :  { %293 = vmatmul.mubr.bf16.vlgmr.msra.gmra.mxu1 %v233_v51  ;;  %v198_v39 = vmul.f32 %v190_v54, %v694_v52 }
  0xff   :  { %v192_v57 = vmul.f32 0.5, %v184_v53  ;;  %v199_v30 = vmul.f32 %v191_v55, %v697_v56 }
 0x101   :  { %v200_v58 = vmul.f32 %v192_v57, %v127_v0  ;;  %v235_v60 = vpack.c.bf16 %v199_v30, %v197_v23  ;;  %v399_v30 = vld [vmem:[%s759_s5] ss:$0 sm:$0xff] }
 0x103   :  { %v236_v59 = vpack.c.bf16 %v200_v58, %v198_v39  ;;  %v400_v58 = vld [vmem:[%s760_s6] ss:$0 sm:$0xff] }
 0x105   :  { %300 = vmatprep.mubr.bf16.mxu1 %v236_v59 }
 0x106   :  { %301 = vmatmul.mubr.bf16.gmra.mxu1 %v235_v60 }
 0x1be   :  { %v417_v61 = vpop.f32.mrf.mxu1 }
 0x1c0   :  { %v418_v62 = vpop.f32.mrf.mxu1 }
 0x1c1   :  { %v419_v1 = vadd.f32 %v418_v62, %v417_v61 }
 0x1c2   :  { %v420_v2 = vpop.f32.mrf.mxu1 }
 0x1c3   :  { %v295_v3 = vadd.f32 %v419_v1, %v398_v63 }
 0x1c4   :  { %v421_v4 = vpop.f32.mrf.mxu1 }
 0x1c5   :  { %v422_v56 = vadd.f32 %v421_v4, %v420_v2  ;;  %v311_v52 = vsel %vm69_vm0, %v295_v3, 0.0 }
 0x1c6   :  { %v423_v0 = vpop.f32.mrf.mxu1  ;;  %312 = vadd.xlane.f32.xlu0 %v311_v52 }
 0x1c7   :  { %v298_v45 = vadd.f32 %v422_v56, %v398_v63 }
 0x1c8   :  { %v424_v5 = vpop.f32.mrf.mxu1 }
 0x1c9   :  { %v425_v6 = vadd.f32 %v424_v5, %v423_v0  ;;  %v314_v7 = vsel %vm69_vm0, %v298_v45, 0.0 }
 0x1ca   :  { %v426_v8 = vpop.f32.mrf.mxu1  ;;  %315 = vadd.xlane.f32.xlu0 %v314_v7 }
 0x1cb   :  { %v303_v9 = vadd.f32 %v425_v6, %v398_v63 }
 0x1cc   :  { %v427_v10 = vpop.f32.mrf.mxu1 }
 0x1cd   :  { %v428_v11 = vadd.f32 %v427_v10, %v426_v8  ;;  %v317_v12 = vsel %vm69_vm0, %v303_v9, 0.0 }
 0x1ce   :  { %318 = vadd.xlane.f32.xlu1 %v317_v12 }
 0x1cf   :  { %v306_v13 = vadd.f32 %v428_v11, %v398_v63 }
 0x1d1   :  { %v320_v14 = vsel %vm69_vm0, %v306_v13, 0.0 }
 0x1d2   :  { %321 = vadd.xlane.f32.xlu1 %v320_v14 }
 0x24f   :  { %v313_v15 = vpop.xlane.xlu0 %312 }
 0x250   :  { %v324_v16 = vmul.f32 0.015625, %v313_v15 }
 0x252   :  { %v328_v17 = vsub.f32 %v295_v3, %v324_v16 }
 0x253   :  { %v316_v18 = vpop.xlane.xlu0 %315 }
 0x254   :  { %v325_v19 = vmul.f32 0.015625, %v316_v18  ;;  %v332_v20 = vmul.f32 %v328_v17, %v328_v17 }
 0x256   :  { %v329_v21 = vsub.f32 %v298_v45, %v325_v19  ;;  %v336_v22 = vsel %vm69_vm0, %v332_v20, 0.0 }
 0x257   :  { %v319_v24 = vpop.xlane.xlu1 %318  ;;  %337 = vadd.xlane.f32.xlu0 %v336_v22 }
 0x258   :  { %v326_v27 = vmul.f32 0.015625, %v319_v24  ;;  %v333_v31 = vmul.f32 %v329_v21, %v329_v21 }
 0x25a   :  { %v330_v32 = vsub.f32 %v303_v9, %v326_v27  ;;  %v339_v33 = vsel %vm69_vm0, %v333_v31, 0.0 }
 0x25b   :  { %v322_v35 = vpop.xlane.xlu1 %321  ;;  %340 = vadd.xlane.f32.xlu1 %v339_v33 }
 0x25c   :  { %v327_v36 = vmul.f32 0.015625, %v322_v35  ;;  %v334_v37 = vmul.f32 %v330_v32, %v330_v32 }
 0x25e   :  { %v331_v38 = vsub.f32 %v306_v13, %v327_v36  ;;  %v342_v40 = vsel %vm69_vm0, %v334_v37, 0.0 }
 0x25f   :  { %343 = vadd.xlane.f32.xlu0 %v342_v40 }
 0x260   :  { %v335_v41 = vmul.f32 %v331_v38, %v331_v38 }
 0x262   :  { %v345_v42 = vsel %vm69_vm0, %v335_v41, 0.0 }
 0x263   :  { %346 = vadd.xlane.f32.xlu1 %v345_v42 }
 0x2e0   :  { %v338_v43 = vpop.xlane.xlu0 %337 }
 0x2e1   :  { %v348_v44 = vmul.f32 0.015625, %v338_v43 }
 0x2e3   :  { %v352_v46 = vadd.f32 1e-05, %v348_v44 }
 0x2e4   :  { %v341_v47 = vpop.xlane.xlu1 %340 }
 0x2e5   :  { %446 = vrsqrt.f32 %v352_v46  ;;  %v349_v48 = vmul.f32 0.015625, %v341_v47 }
 0x2e7   :  { %v353_v49 = vadd.f32 1e-05, %v349_v48 }
 0x2e8   :  { %v344_v50 = vpop.xlane.xlu0 %343 }
 0x2e9   :  { %448 = vrsqrt.f32 %v353_v49  ;;  %v350_v51 = vmul.f32 0.015625, %v344_v50 }
 0x2eb   :  { %v354_v53 = vadd.f32 1e-05, %v350_v51 }
 0x2ec   :  { %v347_v54 = vpop.xlane.xlu1 %346 }
 0x2ed   :  { %450 = vrsqrt.f32 %v354_v53  ;;  %v351_v55 = vmul.f32 0.015625, %v347_v54 }
 0x2ef   :  { %v355_v34 = vadd.f32 1e-05, %v351_v55 }
 0x2f1   :  { %452 = vrsqrt.f32 %v355_v34 }
 0x2f2   :  { %v447_v57 = vpop.eup %446 }
 0x2f3   :  { %v360_v39 = vmul.f32 %v447_v57, %v328_v17 }
 0x2f5   :  { %v370_v23 = vmul.f32 %v399_v30, %v360_v39 }
 0x2f6   :  { %v449_v59 = vpop.eup %448 }
 0x2f7   :  { %v380_v60 = vadd.f32 %v400_v58, %v370_v23  ;;  %v361_v61 = vmul.f32 %v449_v59, %v329_v21 }
 0x2f9   :  { %v384_v62 = vadd.f32 %v380_v60, %v546_v25  ;;  %v371_v63 = vmul.f32 %v399_v30, %v361_v61 }
 0x2fa   :  { %v451_v1 = vpop.eup %450 }
 0x2fb   :  { %388 = vst.msk [vmem:[%s761_s7] sm:$0xff] %vm69_vm0, %v384_v62  ;;  %v381_v2 = vadd.f32 %v400_v58, %v371_v63  ;;  %v362_v3 = vmul.f32 %v451_v1, %v330_v32 }
 0x2fd   :  { %v385_v4 = vadd.f32 %v381_v2, %v551_v26  ;;  %v372_v56 = vmul.f32 %v399_v30, %v362_v3 }
 0x2fe   :  { %v453_v52 = vpop.eup %452 }
 0x2ff   :  { %389 = vst.msk [vmem:[%s761_s7 + $0x8] sm:$0xff] %vm69_vm0, %v385_v4  ;;  %v382_v0 = vadd.f32 %v400_v58, %v372_v56  ;;  %v363_v25 = vmul.f32 %v453_v52, %v331_v38 }
 0x301   :  { %v386_v45 = vadd.f32 %v382_v0, %v559_v28  ;;  %v373_v5 = vmul.f32 %v399_v30, %v363_v25 }
 0x303   :  { %390 = vst.msk [vmem:[%s761_s7 + $0x10] sm:$0xff] %vm69_vm0, %v386_v45  ;;  %v383_v6 = vadd.f32 %v400_v58, %v373_v5 }
 0x305   :  { %v387_v26 = vadd.f32 %v383_v6, %v564_v29 }
 0x307   :  { %391 = vst.msk [vmem:[%s761_s7 + $0x18] sm:$0xff] %vm69_vm0, %v387_v26 }

// kernel: swinv2_forward.21
= control target key start
LH: loop header
LB: loop body
LE: loop exit
PB: predicated region body
PF: predicated region fallthrough
CT: control target
= control target key end

     0   :  { %vm27_vm0 = vcmask 523264   ;;  %s402_s0 = inlined_call_operand.vmem [shape: f32[32,64], index: 0, kind: input, shape index: {}]   ;;  %s403_s1 = inlined_call_operand.vmem [shape: f32[1,64], index: 1, kind: input, shape index: {}]   ;;  %s404_s2 = inlined_call_operand.vmem [shape: f32[1,64], index: 2, kind: input, shape index: {}]   ;;  %s405_s3 = inlined_call_operand.vmem [shape: f32[64,31], index: 3, kind: input, shape index: {}]   ;;  %s406_s4 = inlined_call_operand.vmem [shape: f32[1,31], index: 4, kind: input, shape index: {}]   ;;  %s407_s5 = inlined_call_operand.hbm [shape: f32[2,31], index: 5, kind: output, shape index: {}]  }
   0x1   :  { %v21_v0 = vld [vmem:[%s402_s0] sm:$0xff]  ;;  %v23_v1 = vld [vmem:[%s402_s0 + $0x10] sm:$0xff]  ;;  %v22_v2 = vld [vmem:[%s402_s0 + $0x8] sm:$0xff] }
   0x2   :  { %v28_v3 = vsel %vm27_vm0, %v21_v0, 0.0  ;;  %v34_v4 = vsel %vm27_vm0, %v23_v1, 0.0  ;;  %v24_v5 = vld [vmem:[%s402_s0 + $0x18] sm:$0xff] }
   0x3   :  { %10 = vsyncpa [#allocation3], 0  ;;  %29 = vadd.xlane.f32.xlu0 %v28_v3  ;;  %35 = vadd.xlane.f32.xlu1 %v34_v4  ;;  %v31_v6 = vsel %vm27_vm0, %v22_v2, 0.0  ;;  %v37_v7 = vsel %vm27_vm0, %v24_v5, 0.0  ;;  %v131_v28 = vld [vmem:[%s405_s3 + $0x38] sm:$0xff]  ;;  %v293_v29 = vmov 0.0  }
   0x4   :  { %241 = vmatprep.subr.mxu0 %v293_v29  ;;  %v130_v30 = vld [vmem:[%s405_s3 + $0x30] sm:$0xff]  ;;  %vm294_vm1 = vmmov 0   ;;  %v129_v31 = vld [vmem:[%s405_s3 + $0x28] sm:$0xff]  ;;  %v128_v32 = vld [vmem:[%s405_s3 + $0x20] sm:$0xff]  ;;  %vm122_vm2 = vcmask 1040384   ;;  %s295_s19 = smov [#allocation2]  }
   0x5   :  { %257 = vmatprep.mubr.msk.f32.mxu0 %vm294_vm1, %v293_v29  ;;  %242 = vmatpush3.msra.mxu0 %v131_v28  ;;  %v127_v33 = vld [vmem:[%s405_s3 + $0x18] sm:$0xff]  ;;  %v126_v34 = vld [vmem:[%s405_s3 + $0x10] sm:$0xff]  ;;  %v125_v35 = vld [vmem:[%s405_s3 + $0x8] sm:$0xff]  ;;  %s220_s20 = sshll.u32 %s295_s19, 4  ;;  %vm212_vm3 = vcmask 246784   ;;  %s221_s20 = int_to_ptr.vmem [resolvable:$true] %s220_s20 }
   0x6   :  { %243 = vmatprep.subr.mxu0 %v293_v29  ;;  %v124_v36 = vld [vmem:[%s405_s3] sm:$0xff]  ;;  %s271_s21 = scalar_lea.vmem %s221_s20, 32  ;;  %p276_p1 = scmp.lt.s32.totalorder %s221_s20, %s221_s20 }
   0x7   :  { %32 = vadd.xlane.f32.xlu0 %v31_v6  ;;  %38 = vadd.xlane.f32.xlu1 %v37_v7  ;;  %v228_v50 = vld [vmem:[%s403_s1] ss:$0 sm:$0xff]  ;;  %p272_p0 = scmp.ne.s32.totalorder %s221_s20, %s271_s21  ;;  %p277_p2 = scmp.lt.s32.totalorder %s271_s21, %s271_s21 }
   0x8   :  { %244 = vmatpush3.msra.mxu0 %v130_v30  ;;  %v229_v54 = vld [vmem:[%s404_s2] ss:$0 sm:$0xff] }
   0x9   :  { %245 = vmatprep.subr.mxu0 %v293_v29  ;;  %p278_p3 = por %p277_p2, %p276_p1 }
   0xa   :  { %246 = vmatpush3.msra.mxu0 %v129_v31 }
   0xb   :  { %247 = vmatprep.subr.mxu0 %v293_v29  ;;  %p279_p4 = pnand %p278_p3, %p272_p0 }
   0xc   :  { %248 = vmatpush3.msra.mxu0 %v128_v32 }
   0xd   :  { %249 = vmatprep.subr.mxu0 %v293_v29 }
   0xe   :  { %250 = vmatpush3.msra.mxu0 %v127_v33 }
   0xf   :  { %251 = vmatprep.subr.mxu0 %v293_v29 }
  0x10   :  { %252 = vmatpush3.msra.mxu0 %v126_v34 }
  0x11   :  { %253 = vmatprep.subr.mxu0 %v293_v29 }
  0x12   :  { %254 = vmatpush3.msra.mxu0 %v125_v35 }
  0x13   :  { %255 = vmatprep.subr.mxu0 %v293_v29 }
  0x14   :  { %256 = vmatpush3.msra.mxu0 %v124_v36 }
  0x8c   :  { %v30_v8 = vpop.xlane.xlu0 %29  ;;  %v36_v9 = vpop.xlane.xlu1 %35 }
  0x8d   :  { %v41_v10 = vmul.f32 0.015625, %v30_v8  ;;  %v43_v11 = vmul.f32 0.015625, %v36_v9 }
  0x8f   :  { %v342_v12 = vsub.f32 %v21_v0, %v41_v10  ;;  %v344_v13 = vsub.f32 %v23_v1, %v43_v11 }
  0x90   :  { %v33_v14 = vpop.xlane.xlu0 %32  ;;  %v39_v15 = vpop.xlane.xlu1 %38 }
  0x91   :  { %v42_v16 = vmul.f32 0.015625, %v33_v14  ;;  %v44_v17 = vmul.f32 0.015625, %v39_v15  ;;  %v49_v18 = vmul.f32 %v342_v12, %v342_v12  ;;  %v51_v19 = vmul.f32 %v344_v13, %v344_v13 }
  0x93   :  { %v46_v20 = vsub.f32 %v22_v2, %v42_v16  ;;  %v350_v21 = vsub.f32 %v24_v5, %v44_v17  ;;  %v53_v22 = vsel %vm27_vm0, %v49_v18, 0.0  ;;  %v59_v23 = vsel %vm27_vm0, %v51_v19, 0.0 }
  0x94   :  { %54 = vadd.xlane.f32.xlu0 %v53_v22 }
  0x95   :  { %v50_v24 = vmul.f32 %v46_v20, %v46_v20  ;;  %v52_v25 = vmul.f32 %v350_v21, %v350_v21 }
  0x97   :  { %v56_v26 = vsel %vm27_vm0, %v50_v24, 0.0  ;;  %v62_v27 = vsel %vm27_vm0, %v52_v25, 0.0  ;;  %v230_v24 = vld [vmem:[%s406_s4] ss:$0 sm:$0xff] }
  0x98   :  { %60 = vadd.xlane.f32.xlu0 %v59_v23  ;;  %57 = vadd.xlane.f32.xlu1 %v56_v26 }
  0x9c   :  { %63 = vadd.xlane.f32.xlu1 %v62_v27 }
 0x11d   :  { %v55_v37 = vpop.xlane.xlu0 %54 }
 0x11e   :  { %v65_v38 = vmul.f32 0.015625, %v55_v37 }
 0x120   :  { %v69_v39 = vadd.f32 1e-05, %v65_v38 }
 0x121   :  { %v58_v40 = vpop.xlane.xlu1 %57  ;;  %v61_v41 = vpop.xlane.xlu0 %60 }
 0x122   :  { %263 = vrsqrt.f32 %v69_v39  ;;  %v66_v42 = vmul.f32 0.015625, %v58_v40  ;;  %v67_v43 = vmul.f32 0.015625, %v61_v41 }
 0x124   :  { %v70_v44 = vadd.f32 1e-05, %v66_v42  ;;  %v71_v45 = vadd.f32 1e-05, %v67_v43 }
 0x125   :  { %v64_v46 = vpop.xlane.xlu1 %63 }
 0x126   :  { %265 = vrsqrt.f32 %v70_v44  ;;  %v68_v47 = vmul.f32 0.015625, %v64_v46 }
 0x127   :  { %267 = vrsqrt.f32 %v71_v45 }
 0x128   :  { %v72_v48 = vadd.f32 1e-05, %v68_v47 }
 0x12a   :  { %269 = vrsqrt.f32 %v72_v48 }
 0x12f   :  { %v264_v49 = vpop.eup %263 }
 0x130   :  { %v77_v51 = vmul.f32 %v264_v49, %v342_v12 }
 0x132   :  { %v87_v52 = vmul.f32 %v228_v50, %v77_v51 }
 0x133   :  { %v266_v53 = vpop.eup %265 }
 0x134   :  { %v268_v55 = vpop.eup %267  ;;  %v78_v56 = vmul.f32 %v266_v53, %v46_v20  ;;  %v97_v59 = vadd.f32 %v229_v54, %v87_v52 }
 0x135   :  { %v79_v57 = vmul.f32 %v268_v55, %v344_v13 }
 0x136   :  { %v88_v58 = vmul.f32 %v228_v50, %v78_v56  ;;  %v101_v2 = vsel %vm27_vm0, %v97_v59, 0.0 }
 0x137   :  { %v270_v60 = vpop.eup %269  ;;  %v89_v61 = vmul.f32 %v228_v50, %v79_v57 }
 0x138   :  { %v80_v62 = vmul.f32 %v270_v60, %v350_v21  ;;  %v98_v63 = vadd.f32 %v229_v54, %v88_v58 }
 0x139   :  { %v99_v1 = vadd.f32 %v229_v54, %v89_v61 }
 0x13a   :  { %v90_v0 = vmul.f32 %v228_v50, %v80_v62  ;;  %v102_v3 = vsel %vm27_vm0, %v98_v63, 0.0 }
 0x13b   :  { %v103_v4 = vadd.f32 %v102_v3, %v101_v2  ;;  %v112_v7 = vsel %vm27_vm0, %v99_v1, 0.0 }
 0x13c   :  { %v100_v5 = vadd.f32 %v229_v54, %v90_v0 }
 0x13d   :  { %v104_v6 = vrot.slane %v103_v4, 4 }
 0x13e   :  { %v113_v8 = vsel %vm27_vm0, %v100_v5, 0.0 }
 0x13f   :  { %v105_v9 = vadd.f32 %v104_v6, %v103_v4  ;;  %v114_v10 = vadd.f32 %v113_v8, %v112_v7 }
 0x141   :  { %v106_v11 = vrot.slane %v105_v9, 2  ;;  %v115_v12 = vrot.slane %v114_v10, 4 }
 0x143   :  { %v107_v13 = vadd.f32 %v106_v11, %v105_v9  ;;  %v116_v14 = vadd.f32 %v115_v12, %v114_v10 }
 0x145   :  { %v108_v15 = vrot.slane %v107_v13, 1  ;;  %v117_v16 = vrot.slane %v116_v14, 2 }
 0x147   :  { %v118_v17 = vadd.f32 %v117_v16, %v116_v14  ;;  %v109_v18 = vadd.f32 %v108_v15, %v107_v13 }
 0x149   :  { %v119_v19 = vrot.slane %v118_v17, 1  ;;  %v111_v21 = vmul.f32 0.0625, %v109_v18 }
 0x14b   :  { %v120_v20 = vadd.f32 %v119_v19, %v118_v17 }
 0x14d   :  { %v121_v22 = vmul.f32 0.0625, %v120_v20 }
 0x14f   :  { %v123_v23 = vsel %vm122_vm2, %v111_v21, %v121_v22 }
 0x150   :  { %258 = vmatmul.mubr.msk.f32.vlgmr.msra.gmra.mxu0 %vm27_vm0, %v123_v23 }
 0x210   :  { %v208_v25 = vpop.f32.mrf.mxu0 }
 0x211   :  { %v209_v26 = vadd.f32 %v230_v24, %v208_v25 }
 0x212   :  { %v259_v27 = vpop.f32.mrf.mxu0 }
 0x213   :  { %213 = vst.msk [vmem:[#allocation2] sm:$0x3] %vm212_vm3, %v209_v26 }
 0x214   :  { %282 = shalt.err (!%p279_p4)
}
 0x215   :  { %223 = dma.vmem_to_hbm [thread:$0]  %s221_s20, 32, %s407_s5, [#allocation3]  }
 0x216   :  { %291 = dma.done.wait [#allocation3], 32  }
 0x217   :  { %292 = vsyncadd [#allocation3], 4294967264 }
 0x218   :  { %227 = vsyncpa [#allocation3], 1 }

// kernel: swinv2_forward.17
= control target key start
LH: loop header
LB: loop body
LE: loop exit
PB: predicated region body
PF: predicated region fallthrough
CT: control target
= control target key end

     0   :  { %14 = vsyncpa [#allocation3], 0  ;;  %s1990_s30 = smov 0   ;;  %s2331_s0 = inlined_call_operand.vmem [shape: f32[2,16,64], index: 0, kind: input, shape index: {}]   ;;  %s2332_s1 = inlined_call_operand.vmem [shape: f32[64,192], index: 1, kind: input, shape index: {}]   ;;  %s2333_s2 = inlined_call_operand.vmem [shape: f32[1,192], index: 2, kind: input, shape index: {}]   ;;  %s2334_s3 = inlined_call_operand.vmem [shape: f32[64,64], index: 3, kind: input, shape index: {}]   ;;  %s2335_s4 = inlined_call_operand.vmem [shape: f32[1,64], index: 4, kind: input, shape index: {}]   ;;  %s2336_s5 = inlined_call_operand.vmem [shape: f32[4,16,16], index: 5, kind: input, shape index: {}]   ;;  %s2337_s6 = inlined_call_operand.vmem [shape: f32[4], index: 6, kind: input, shape index: {}]   ;;  %s2338_s7 = inlined_call_operand.vmem [shape: f32[1,64], index: 7, kind: input, shape index: {}]   ;;  %s2339_s8 = inlined_call_operand.vmem [shape: f32[1,64], index: 8, kind: input, shape index: {}]   ;;  %s2340_s9 = inlined_call_operand.vmem [shape: f32[2,16,64], index: 9, kind: output, shape index: {}]  }
   0x1 LB: > { %s1996_s10 = sadd.s32 4294967295, %s1927_s30   ;;  %p1634_p0 = scmp.ge.s32.totalorder %s1927_s30, 1  ;;  %s1927_s30 = sphi %s1990_s30, %s20_s30  }
   0x2   : > { %p245_p1 = scmp.lt.s32.totalorder %s1927_s30, 3  ;;  %s273_s13 = sshll.u32 %s2337_s6, 4  ;;  %s274_s13 = int_to_ptr.vmem [resolvable:$true] %s273_s13 }
   0x3   : > { %p1798_p3 = scmp.eq.s32.totalorder %s1996_s10, 0  ;;  %s1902_s15 = scalar_lea.vmem %s274_s13, 16 }
   0x4   : > { %p2003_p2 = pnand %p1634_p0, %p245_p1  ;;  %p1903_p6 = scmp.ne.s32.totalorder %s274_s13, %s1902_s15 }
   0x5   : > { %p1910_p10 = scmp.lt.s32.totalorder %s274_s13, %s274_s13  ;;  %p1911_p11 = scmp.lt.s32.totalorder %s1902_s15, %s1902_s15 }
   0x6   : > { %p1794_p4 = pneg %p2003_p2 }
   0x7   : > { %p1912_p12 = por %p1911_p11, %p1910_p10 }
   0x8   : > { %p1795_p5 = pnand %p1798_p3, %p1794_p4 }
   0xa   : > { %p1904_p7 = pneg %p1795_p5 }
   0xc   : > { %p1905_p8 = pnand %p1904_p7, %p1903_p6 }
   0xe   : > { %p1906_p9 = pneg %p1905_p8 }
  0x10   : > { %p1913_p13 = pnand %p1912_p12, %p1906_p9 }
  0x12   : > { %1916 = shalt.err (!%p1913_p13)
}
  0x13   : > { %s1929_s16 = smov [#allocation2]   ;;  %300 = sbr.rel (%p2003_p2) target bundleno = 3119 (0xc2f), region = 56 }
  0x14   : > { %1797 = dma.vmem_to_smem (!%p1795_p5), %s274_s13, 16, %s1929_s16, [#allocation3]  }
  0x18   : > { %1922 = dma.done.wait (%p1798_p3), [#allocation3], 16  }
  0x19   : > { %1924 = vsyncadd (%p1798_p3), [#allocation3], 4294967280 }
  0x1a   : > { %306 = sfence }
  0x1b   : > { %v363_v0 = vld [vmem:[%s2332_s1 + $0x68] sm:$0xff]  ;;  %v365_v1 = vld [vmem:[%s2332_s1 + $0x78] sm:$0xff]  ;;  %v362_v2 = vld [vmem:[%s2332_s1 + $0x60] sm:$0xff]  ;;  %p337_p0 = scmp.lt.s32.totalorder %s1996_s10, 1  ;;  %v1930_v7 = vmov 0   ;;  %vm387_vm0 = vcmask 523264   ;;  %v377_v28 = vlaneseq }
  0x1c   : > { %v374_v3 = vpack.c.bf16 %v365_v1, %v363_v0  ;;  %v364_v4 = vld [vmem:[%s2332_s1 + $0x70] sm:$0xff]  ;;  %v359_v5 = vld [vmem:[%s2332_s1 + $0x48] sm:$0xff]  ;;  %v361_v6 = vld [vmem:[%s2332_s1 + $0x58] sm:$0xff]  ;;  %423 = vmatprep.mubr.bf16.mxu0 %v1930_v7  ;;  %s1931_s17 = smov 64   ;;  %vm436_vm1 = vcmask 130048   ;;  %s1932_s18 = smov 112  }
  0x1d   : > { %v373_v8 = vpack.c.bf16 %v364_v4, %v362_v2  ;;  %v372_v9 = vpack.c.bf16 %v361_v6, %v359_v5  ;;  %v358_v10 = vld [vmem:[%s2332_s1 + $0x40] sm:$0xff]  ;;  %v360_v11 = vld [vmem:[%s2332_s1 + $0x50] sm:$0xff]  ;;  %v355_v12 = vld [vmem:[%s2332_s1 + $0x28] sm:$0xff]  ;;  %s2343_s10 = smov (!%p337_p0, %s1996_s10), 1  ;;  %v378_v29 = vshrl.u32 %v377_v28, 7  ;;  %s1933_s19 = smov 48  }
  0x1e   : > { %399 = vmatprep.subr.bf16.mxu0 %v374_v3  ;;  %v357_v13 = vld [vmem:[%s2332_s1 + $0x38] sm:$0xff]  ;;  %v371_v14 = vpack.c.bf16 %v360_v11, %v358_v10  ;;  %v354_v16 = vld [vmem:[%s2332_s1 + $0x20] sm:$0xff]  ;;  %v356_v17 = vld [vmem:[%s2332_s1 + $0x30] sm:$0xff]  ;;  %s1683_s26 = sshll.u32 %s2343_s10, 4  ;;  %s1934_s20 = smov 32   ;;  %vm1939_vm2 = vmmov 0  }
  0x1f   : > { %400 = vmatpush1.bf16.msra.mxu0 %v373_v8  ;;  %v370_v15 = vpack.c.bf16 %v357_v13, %v355_v12  ;;  %v351_v18 = vld [vmem:[%s2332_s1 + $0x8] sm:$0xff]  ;;  %v353_v19 = vld [vmem:[%s2332_s1 + $0x18] sm:$0xff]  ;;  %v369_v20 = vpack.c.bf16 %v356_v17, %v354_v16  ;;  %v350_v22 = vld [vmem:[%s2332_s1] sm:$0xff]  ;;  %s341_s14 = scalar_lea.vmem %s2331_s0, %s1683_s26  ;;  %v379_v30 = vsub.s32 0, %v378_v29  ;;  %v383_v33 = vsub.s32 1, %v378_v29  ;;  %s1935_s21 = smov 96  }
  0x20   : > { %401 = vmatprep.subr.bf16.mxu0 %v372_v9  ;;  %v368_v21 = vpack.c.bf16 %v353_v19, %v351_v18  ;;  %v352_v23 = vld [vmem:[%s2332_s1 + $0x10] sm:$0xff]  ;;  %v2076_v25 = vld [vmem:[%s341_s14] sm:$0xff]  ;;  %v2078_v26 = vld [vmem:[%s341_s14 + $0x8] sm:$0xff]  ;;  %s560_s22 = sld [smem:[#allocation2]]  ;;  %s1936_s28 = smov 16   ;;  %vm1446_vm3 = vcmask 261120  }
  0x21   : > { %v367_v24 = vpack.c.bf16 %v352_v23, %v350_v22  ;;  %v366_v27 = vpack.c.bf16 %v2078_v26, %v2076_v25  ;;  %v375_v31 = vld [vmem:[%s2333_s2] sm:$0x3]  ;;  %v565_v10 = vld [vmem:[%s2336_s5 + $0x8] sm:$0xff]  ;;  %s1937_s29 = smov 80   ;;  %s1654_s11 = sld [smem:[#allocation2 + $0x1]]  ;;  %vm1449_vm4 = vcmask 392192  }
  0x22   : > { %v380_v35 = vrot.slane %v375_v31, %v379_v30  ;;  %v384_v37 = vrot.slane %v375_v31, %v383_v33  ;;  %s1663_s14 = sld [smem:[#allocation2 + $0x2]]  ;;  %s346_s15 = scalar_lea.vmem %s2340_s9, %s1683_s26 }
  0x23   : > { %402 = vmatpush1.bf16.msra.mxu0 %v371_v14  ;;  %v564_v14 = vld [vmem:[%s2336_s5] sm:$0xff] }
  0x24   : > { %403 = vmatprep.subr.bf16.mxu0 %v370_v15 }
  0x26   : > { %v561_v8 = vstv %s560_s22 }
  0x27   : > { %404 = vmatpush1.bf16.msra.mxu0 %v369_v20 }
  0x28   : > { %405 = vmatprep.subr.bf16.mxu0 %v368_v21 }
  0x2b   : > { %406 = vmatpush1.bf16.msra.mxu0 %v367_v24 }
  0x2e   : > { %1643 = vmatmul.mubr.msk.bf16.vlgmr.msra.gmra.mxu0 %vm387_vm0, %v366_v27 }
  0xee   : > { %v425_v32 = vpop.f32.mrf.mxu0 }
  0xef   : > { %v2088_v40 = vadd.f32 %v425_v32, %v380_v35 }
  0xf0   : > { %v427_v34 = vpop.f32.mrf.mxu0 }
  0xf1   : > { %v2096_v43 = vadd.f32 %v427_v34, %v384_v37  ;;  %v2105_v44 = vmul.f32 %v2088_v40, %v2088_v40 }
  0xf2   : > { %v429_v36 = vpop.f32.mrf.mxu0 }
  0xf3   : > { %v2086_v38 = vadd.f32 %v429_v36, %v380_v35  ;;  %v437_v45 = vsel %vm436_vm1, %v2105_v44, 0.0 }
  0xf4   : > { %v431_v39 = vpop.f32.mrf.mxu0 }
  0xf5   : > { %v2090_v41 = vadd.f32 %v431_v39, %v384_v37  ;;  %v2094_v42 = vmul.f32 %v2086_v38, %v2086_v38 }
  0xf7   : > { %1729 = vmatprep.subr.mxu1 %v2090_v41  ;;  %453 = vrot.lane.b32.xlu0 %v2094_v42, %s1931_s17  ;;  %v440_v50 = vsel %vm436_vm1, %v2094_v42, 0.0 }
  0xf8   : > { %1730 = vmatpush3.msra.mxu1 %v2090_v41 }
  0xf9   : > { %1731 = vmatprep.subr.mxu1 %v2096_v43 }
  0xfa   : > { %1732 = vmatpush3.msra.mxu1 %v2096_v43 }
  0xfb   : > { %451 = vrot.lane.b32.xlu0 %v2105_v44, %s1931_s17 }
 0x11a   : > { %438 = vadd.xlane.f32.xlu0 %v437_v45 }
 0x130   : > { %671 = vrot.lane.b32.xlu0 %v2105_v44, %s1932_s18 }
 0x169   : > { %v454_v46 = vpop.permute.xlu0 %453 }
 0x16a   : > { %v460_v47 = vsel %vm436_vm1, %v454_v46, 0.0 }
 0x16b   : > { %461 = vadd.xlane.f32.xlu1 %v460_v47 }
 0x16d   : > { %v452_v48 = vpop.permute.xlu0 %451 }
 0x16e   : > { %v457_v49 = vsel %vm436_vm1, %v452_v48, 0.0 }
 0x16f   : > { %458 = vadd.xlane.f32.xlu1 %v457_v49 }
 0x173   : > { %441 = vadd.xlane.f32.xlu1 %v440_v50 }
 0x1a3   : > { %v439_v51 = vpop.xlane.xlu0 %438 }
 0x1a4   : > { %v443_v52 = vadd.f32 1e-12, %v439_v51 }
 0x1a6   : > { %1834 = vrsqrt.f32 %v443_v52 }
 0x1a7   : > { %v672_v19 = vpop.permute.xlu0 %671 }
 0x1a8   : > { %v677_v22 = vsel %vm436_vm1, %v672_v19, 0.0 }
 0x1b3   : > { %v1835_v53 = vpop.eup %1834 }
 0x1b4   : > { %v447_v54 = vmul.f32 %v1835_v53, %v2088_v40 }
 0x1b6   : > { %1726 = vmatprep.mubr.msk.f32.mxu0 %vm436_vm1, %v447_v54 }
 0x1f4   : > { %v462_v55 = vpop.xlane.xlu1 %461 }
 0x1f5   : > { %v464_v56 = vadd.f32 1e-12, %v462_v55 }
 0x1f7   : > { %1836 = vrsqrt.f32 %v464_v56 }
 0x1f8   : > { %v459_v57 = vpop.xlane.xlu1 %458 }
 0x1f9   : > { %v463_v58 = vadd.f32 1e-12, %v459_v57 }
 0x1fb   : > { %1838 = vrsqrt.f32 %v463_v58 }
 0x1fc   : > { %v442_v63 = vpop.xlane.xlu1 %441 }
 0x1fd   : > { %v444_v0 = vadd.f32 1e-12, %v442_v63 }
 0x1ff   : > { %1840 = vrsqrt.f32 %v444_v0 }
 0x204   : > { %v1837_v59 = vpop.eup %1836 }
 0x205   : > { %v468_v60 = vmul.f32 %v1837_v59, %v2086_v38 }
 0x207   : > { %473 = vrot.lane.b32.xlu1 %v468_v60, %s1931_s17 }
 0x208   : > { %v1839_v61 = vpop.eup %1838 }
 0x209   : > { %v467_v62 = vmul.f32 %v1839_v61, %v2088_v40 }
 0x20b   : > { %471 = vrot.lane.b32.xlu1 %v467_v62, %s1931_s17 }
 0x20c   : > { %v1841_v2 = vpop.eup %1840 }
 0x20d   : > { %v448_v4 = vmul.f32 %v1841_v2, %v2086_v38 }
 0x20f   : > { %691 = vrot.lane.b32.xlu1 %v2094_v42, %s1933_s19 }
 0x213   : > { %689 = vrot.lane.b32.xlu1 %v2105_v44, %s1933_s19 }
 0x217   : > { %942 = vrot.lane.b32.xlu1 %v2094_v42, %s1934_s20 }
 0x21b   : > { %673 = vrot.lane.b32.xlu1 %v2094_v42, %s1932_s18 }
 0x21f   : > { %940 = vrot.lane.b32.xlu1 %v2105_v44, %s1934_s20 }
 0x223   : > { %922 = vrot.lane.b32.xlu1 %v2105_v44, %s1935_s21 }
 0x227   : > { %924 = vrot.lane.b32.xlu1 %v2094_v42, %s1935_s21 }
 0x279   : > { %v474_v1 = vpop.permute.xlu1 %473 }
 0x27a   : > { %1722 = vmatprep.subr.msk.mxu0 %vm436_vm1, %v474_v1 }
 0x27b   : > { %1723 = vmatpush3.xpose.msk.msra.mxu0 %vm436_vm1, %v474_v1 }
 0x27d   : > { %v472_v3 = vpop.permute.xlu1 %471 }
 0x27e   : > { %1724 = vmatprep.subr.msk.mxu0 %vm436_vm1, %v472_v3 }
 0x27f   : > { %1725 = vmatpush3.xpose.msk.msra.mxu0 %vm436_vm1, %v472_v3 }
 0x281   : > { %v692_v5 = vpop.permute.xlu1 %691 }
 0x282   : > { %1727 = vmatmul.mubr.msk.f32.vlgmr.msra.gmra.mxu0 %vm436_vm1, %v448_v4  ;;  %v698_v23 = vsel %vm436_vm1, %v692_v5, 0.0 }
 0x285   : > { %v690_v6 = vpop.permute.xlu1 %689 }
 0x286   : > { %v695_v28 = vsel %vm436_vm1, %v690_v6, 0.0 }
 0x289   : > { %v943_v7 = vpop.permute.xlu1 %942 }
 0x28a   : > { %v949_v30 = vsel %vm436_vm1, %v943_v7, 0.0 }
 0x28d   : > { %v674_v12 = vpop.permute.xlu1 %673 }
 0x28e   : > { %v680_v24 = vsel %vm436_vm1, %v674_v12, 0.0 }
 0x291   : > { %v941_v21 = vpop.permute.xlu1 %940 }
 0x292   : > { %v946_v31 = vsel %vm436_vm1, %v941_v21, 0.0 }
 0x295   : > { %v923_v27 = vpop.permute.xlu1 %922 }
 0x296   : > { %v928_v29 = vsel %vm436_vm1, %v923_v27, 0.0 }
 0x299   : > { %v925_v32 = vpop.permute.xlu1 %924 }
 0x29a   : > { %v931_v33 = vsel %vm436_vm1, %v925_v32, 0.0 }
 0x342   : > { %v1728_v9 = vpop.f32.mrf.mxu0 }
 0x343   : > { %v563_v11 = vmul.f32 %v1728_v9, %v561_v8 }
 0x344   : > { %v551_v13 = vpop.f32.mrf.mxu0 }
 0x345   : > { %v562_v15 = vmul.f32 %v561_v8, %v551_v13  ;;  %v567_v16 = vadd.f32 %v565_v10, %v563_v11 }
 0x347   : > { %v571_v17 = vsel %vm436_vm1, %v567_v16, -inf  ;;  %v566_v18 = vadd.f32 %v564_v14, %v562_v15 }
 0x348   : > { %572 = vmax.xlane.f32.xlu1 %v571_v17 }
 0x349   : > { %v568_v20 = vsel %vm436_vm1, %v566_v18, -inf }
 0x34a   : > { %569 = vmax.xlane.f32.xlu0 %v568_v20 }
 0x34c   : > { %678 = vadd.xlane.f32.xlu1 %v677_v22 }
 0x34e   : > { %699 = vadd.xlane.f32.xlu0 %v698_v23 }
 0x350   : > { %681 = vadd.xlane.f32.xlu1 %v680_v24 }
 0x352   : > { %696 = vadd.xlane.f32.xlu0 %v695_v28 }
 0x354   : > { %929 = vadd.xlane.f32.xlu1 %v928_v29 }
 0x356   : > { %950 = vadd.xlane.f32.xlu0 %v949_v30 }
 0x35a   : > { %947 = vadd.xlane.f32.xlu0 %v946_v31 }
 0x35e   : > { %932 = vadd.xlane.f32.xlu0 %v931_v33 }
 0x3d1   : > { %v573_v34 = vpop.xlane.xlu1 %572 }
 0x3d2   : > { %v575_v35 = vsub.f32 %v567_v16, %v573_v34  ;;  %v803_v34 = vstv %s1654_s11 }
 0x3d3   : > { %v570_v36 = vpop.xlane.xlu0 %569 }
 0x3d4   : > { %v578_v37 = vmul.f32 1.442695, %v575_v35  ;;  %v574_v61 = vsub.f32 %v566_v18, %v570_v36  ;;  %v1656_v36 = vld [vmem:[%s2336_s5 + $0x18] sm:$0xff] }
 0x3d5   : > { %v679_v39 = vpop.xlane.xlu1 %678 }
 0x3d6   : > { %1842 = vpow2.f32 %v578_v37  ;;  %v683_v46 = vadd.f32 1e-12, %v679_v39  ;;  %v576_v0 = vmul.f32 1.442695, %v574_v61 }
 0x3d7   : > { %v700_v45 = vpop.xlane.xlu0 %699 }
 0x3d8   : > { %v702_v47 = vadd.f32 1e-12, %v700_v45  ;;  %v1655_v45 = vld [vmem:[%s2336_s5 + $0x10] sm:$0xff] }
 0x3d9   : > { %v682_v50 = vpop.xlane.xlu1 %681 }
 0x3da   : > { %1844 = vrsqrt.f32 %v702_v47  ;;  %v684_v56 = vadd.f32 1e-12, %v682_v50 }
 0x3db   : > { %1846 = vrsqrt.f32 %v683_v46  ;;  %v697_v48 = vpop.xlane.xlu0 %696 }
 0x3dc   : > { %v701_v52 = vadd.f32 1e-12, %v697_v48 }
 0x3dd   : > { %v930_v57 = vpop.xlane.xlu1 %929 }
 0x3de   : > { %1848 = vrsqrt.f32 %v701_v52  ;;  %v934_v59 = vadd.f32 1e-12, %v930_v57  ;;  %v1664_v57 = vld [vmem:[%s2336_s5 + $0x20] sm:$0xff] }
 0x3df   : > { %1850 = vrsqrt.f32 %v684_v56  ;;  %v951_v4 = vpop.xlane.xlu0 %950 }
 0x3e0   : > { %1852 = vrsqrt.f32 %v934_v59  ;;  %v953_v6 = vadd.f32 1e-12, %v951_v4 }
 0x3e1   : > { %1854 = vpow2.f32 %v576_v0 }
 0x3e2   : > { %1856 = vrsqrt.f32 %v953_v6 }
 0x3e3   : > { %v2160_v49 = vpop.eup %1842  ;;  %v948_v5 = vpop.xlane.xlu0 %947 }
 0x3e4   : > { %v583_v51 = vsel %vm436_vm1, %v2160_v49, 0.0  ;;  %v952_v8 = vadd.f32 1e-12, %v948_v5 }
 0x3e5   : > { %584 = vadd.xlane.f32.xlu0 %v583_v51 }
 0x3e6   : > { %1858 = vrsqrt.f32 %v952_v8 }
 0x3e7   : > { %v1845_v53 = vpop.eup %1844  ;;  %v933_v10 = vpop.xlane.xlu0 %932 }
 0x3e8   : > { %v706_v54 = vmul.f32 %v1845_v53, %v2086_v38  ;;  %v1847_v55 = vpop.eup %1846  ;;  %v935_v11 = vadd.f32 1e-12, %v933_v10  ;;  %v1054_v53 = vstv %s1663_s14 }
 0x3e9   : > { %v687_v58 = vmul.f32 %v1847_v55, %v2088_v40 }
 0x3ea   : > { %717 = vrot.lane.b32.xlu1 %v706_v54, %s1933_s19  ;;  %1860 = vrsqrt.f32 %v935_v11 }
 0x3eb   : > { %v1849_v60 = vpop.eup %1848 }
 0x3ec   : > { %v705_v62 = vmul.f32 %v1849_v60, %v2088_v40  ;;  %v1851_v63 = vpop.eup %1850  ;;  %v1665_v60 = vld [vmem:[%s2336_s5 + $0x28] sm:$0xff] }
 0x3ed   : > { %v688_v1 = vmul.f32 %v1851_v63, %v2086_v38  ;;  %v1853_v2 = vpop.eup %1852 }
 0x3ee   : > { %709 = vrot.lane.b32.xlu1 %v687_v58, %s1932_s18  ;;  %v938_v3 = vmul.f32 %v1853_v2, %v2088_v40  ;;  %v1855_v7 = vpop.eup %1854 }
 0x3ef   : > { %v580_v9 = vsel %vm436_vm1, %v1855_v7, 0.0  ;;  %v1857_v12 = vpop.eup %1856 }
 0x3f0   : > { %v957_v13 = vmul.f32 %v1857_v12, %v2086_v38 }
 0x3f3   : > { %v1859_v14 = vpop.eup %1858 }
 0x3f4   : > { %v956_v15 = vmul.f32 %v1859_v14, %v2088_v40 }
 0x3f7   : > { %v1861_v16 = vpop.eup %1860 }
 0x3f8   : > { %v939_v17 = vmul.f32 %v1861_v16, %v2086_v38 }
 0x3fb   : > { %715 = vrot.lane.b32.xlu0 %v705_v62, %s1933_s19 }
 0x3ff   : > { %711 = vrot.lane.b32.xlu0 %v688_v1, %s1932_s18 }
 0x403   : > { %960 = vrot.lane.b32.xlu0 %v938_v3, %s1935_s21 }
 0x407   : > { %1191 = vrot.lane.b32.xlu0 %v2094_v42, %s1936_s28 }
 0x40b   : > { %1171 = vrot.lane.b32.xlu0 %v2105_v44, %s1937_s29 }
 0x412   : > { %581 = vadd.xlane.f32.xlu1 %v580_v9 }
 0x423   : > { %968 = vrot.lane.b32.xlu1 %v957_v13, %s1934_s20 }
 0x427   : > { %966 = vrot.lane.b32.xlu1 %v956_v15, %s1934_s20 }
 0x42b   : > { %962 = vrot.lane.b32.xlu1 %v939_v17, %s1935_s21 }
 0x42f   : > { %1189 = vrot.lane.b32.xlu1 %v2105_v44, %s1936_s28 }
 0x433   : > { %1173 = vrot.lane.b32.xlu1 %v2094_v42, %s1937_s29 }
 0x45c   : > { %v718_v18 = vpop.permute.xlu1 %717 }
 0x45d   : > { %1736 = vmatprep.subr.msk.mxu1 %vm436_vm1, %v718_v18 }
 0x460   : > { %v710_v19 = vpop.permute.xlu1 %709 }
 0x46e   : > { %v585_v20 = vpop.xlane.xlu0 %584 }
 0x46f   : > { %1862 = vrcp.f32 %v585_v20 }
 0x472   : > { %v716_v24 = vpop.permute.xlu0 %715 }
 0x476   : > { %v712_v42 = vpop.permute.xlu0 %711 }
 0x47a   : > { %v961_v29 = vpop.permute.xlu0 %960 }
 0x47c   : > { %v1863_v22 = vpop.eup %1862 }
 0x47d   : > { %v589_v28 = vmul.f32 %v1863_v22, %v2160_v49 }
 0x47e   : > { %v1192_v48 = vpop.permute.xlu0 %1191 }
 0x47f   : > { %v1198_v54 = vsel %vm436_vm1, %v1192_v48, 0.0 }
 0x482   : > { %v1172_v55 = vpop.permute.xlu0 %1171 }
 0x483   : > { %v1177_v61 = vsel %vm436_vm1, %v1172_v55, 0.0 }
 0x49b   : > { %v582_v21 = vpop.xlane.xlu1 %581 }
 0x49c   : > { %1864 = vrcp.f32 %v582_v21 }
 0x49f   : > { %v969_v44 = vpop.permute.xlu1 %968 }
 0x4a3   : > { %v967_v30 = vpop.permute.xlu1 %966 }
 0x4a7   : > { %v963_v31 = vpop.permute.xlu1 %962 }
 0x4a9   : > { %v1865_v23 = vpop.eup %1864 }
 0x4aa   : > { %v588_v27 = vmul.f32 %v1865_v23, %v1855_v7 }
 0x4ab   : > { %v1190_v1 = vpop.permute.xlu1 %1189 }
 0x4ac   : > { %1733 = vmatprep.mubr.msk.f32.mxu1 %vm436_vm1, %v588_v27  ;;  %v1195_v3 = vsel %vm436_vm1, %v1190_v1, 0.0 }
 0x4ad   : > { %1734 = vmatmul.mubr.msk.f32.vlgmr.msra.gmra.mxu1 %vm436_vm1, %v589_v28 }
 0x4ae   : > { %1737 = vmatpush3.xpose.msk.msra.mxu1 %vm436_vm1, %v718_v18  ;;  %1740 = vmatprep.mubr.msk.f32.mxu1 %vm436_vm1, %v710_v19 }
 0x4af   : > { %1738 = vmatprep.subr.msk.mxu1 %vm436_vm1, %v716_v24  ;;  %v1174_v4 = vpop.permute.xlu1 %1173 }
 0x4b0   : > { %v1180_v5 = vsel %vm436_vm1, %v1174_v4, 0.0 }
 0x4b2   : > { %1739 = vmatpush3.xpose.msk.msra.mxu1 %vm436_vm1, %v716_v24 }
 0x4b3   : > { %1750 = vmatprep.subr.msk.mxu1 %vm436_vm1, %v969_v44 }
 0x4b5   : > { %1741 = vmatmul.mubr.msk.f32.vlgmr.msra.gmra.mxu1 %vm436_vm1, %v712_v42 }
 0x4b6   : > { %1751 = vmatpush3.xpose.msk.msra.mxu1 %vm436_vm1, %v969_v44  ;;  %1754 = vmatprep.mubr.msk.f32.mxu1 %vm436_vm1, %v961_v29 }
 0x4b7   : > { %1752 = vmatprep.subr.msk.mxu1 %vm436_vm1, %v967_v30 }
 0x4ba   : > { %1753 = vmatpush3.xpose.msk.msra.mxu1 %vm436_vm1, %v967_v30 }
 0x4bd   : > { %1755 = vmatmul.mubr.msk.f32.vlgmr.msra.gmra.mxu1 %vm436_vm1, %v963_v31 }
 0x56d   : > { %v2204_v32 = vpop.f32.mrf.mxu1 }
 0x56f   : > { %v2206_v33 = vpop.f32.mrf.mxu1 }
 0x575   : > { %v1742_v35 = vpop.f32.mrf.mxu1 }
 0x576   : > { %v805_v37 = vmul.f32 %v1742_v35, %v803_v34 }
 0x577   : > { %v793_v39 = vpop.f32.mrf.mxu1 }
 0x578   : > { %v804_v46 = vmul.f32 %v803_v34, %v793_v39  ;;  %v810_v47 = vadd.f32 %v1656_v36, %v805_v37 }
 0x57a   : > { %v814_v49 = vsel %vm436_vm1, %v810_v47, -inf  ;;  %v809_v50 = vadd.f32 %v1655_v45, %v804_v46 }
 0x57b   : > { %815 = vmax.xlane.f32.xlu1 %v814_v49 }
 0x57c   : > { %v811_v51 = vsel %vm436_vm1, %v809_v50, -inf }
 0x57d   : > { %812 = vmax.xlane.f32.xlu0 %v811_v51  ;;  %v1756_v52 = vpop.f32.mrf.mxu1 }
 0x57e   : > { %v1056_v58 = vmul.f32 %v1756_v52, %v1054_v53 }
 0x57f   : > { %v1044_v56 = vpop.f32.mrf.mxu1  ;;  %1199 = vadd.xlane.f32.xlu1 %v1198_v54 }
 0x580   : > { %v1055_v59 = vmul.f32 %v1054_v53, %v1044_v56  ;;  %v1061_v0 = vadd.f32 %v1665_v60, %v1056_v58 }
 0x582   : > { %v1060_v62 = vadd.f32 %v1664_v57, %v1055_v59  ;;  %v1065_v2 = vsel %vm436_vm1, %v1061_v0, -inf }
 0x583   : > { %1178 = vadd.xlane.f32.xlu1 %v1177_v61 }
 0x584   : > { %v1062_v63 = vsel %vm436_vm1, %v1060_v62, -inf }
 0x585   : > { %1063 = vmax.xlane.f32.xlu0 %v1062_v63 }
 0x589   : > { %1066 = vmax.xlane.f32.xlu0 %v1065_v2 }
 0x58d   : > { %1196 = vadd.xlane.f32.xlu0 %v1195_v3 }
 0x591   : > { %1181 = vadd.xlane.f32.xlu0 %v1180_v5 }
 0x594   : > { %837 = vrot.lane.b32.xlu1 %v2090_v41, %s1932_s18 }
 0x598   : > { %1086 = vrot.lane.b32.xlu1 %v2090_v41, %s1935_s21 }
 0x59c   : > { %1084 = vrot.lane.b32.xlu1 %v2096_v43, %s1935_s21 }
 0x5a7   : > { %835 = vrot.lane.b32.xlu0 %v2096_v43, %s1932_s18  ;;  %s1672_s18 = sld [smem:[#allocation2 + $0x3]] }
 0x604   : > { %v816_v6 = vpop.xlane.xlu1 %815 }
 0x605   : > { %v818_v7 = vsub.f32 %v810_v47, %v816_v6 }
 0x606   : > { %v813_v8 = vpop.xlane.xlu0 %812 }
 0x607   : > { %v821_v9 = vmul.f32 1.442695, %v818_v7  ;;  %v817_v10 = vsub.f32 %v809_v50, %v813_v8  ;;  %v1303_v8 = vstv %s1672_s18 }
 0x608   : > { %v1200_v11 = vpop.xlane.xlu1 %1199 }
 0x609   : > { %1866 = vpow2.f32 %v821_v9  ;;  %v819_v12 = vmul.f32 1.442695, %v817_v10  ;;  %v1202_v31 = vadd.f32 1e-12, %v1200_v11  ;;  %v1674_v10 = vld [vmem:[%s2336_s5 + $0x38] sm:$0xff] }
 0x60b   : > { %1868 = vpow2.f32 %v819_v12 }
 0x60c   : > { %v1179_v13 = vpop.xlane.xlu1 %1178 }
 0x60d   : > { %v1183_v35 = vadd.f32 1e-12, %v1179_v13  ;;  %v1673_v13 = vld [vmem:[%s2336_s5 + $0x30] sm:$0xff] }
 0x60e   : > { %v1064_v14 = vpop.xlane.xlu0 %1063 }
 0x60f   : > { %v1068_v36 = vsub.f32 %v1060_v62, %v1064_v14 }
 0x610   : > { %v838_v15 = vpop.permute.xlu1 %837 }
 0x611   : > { %1743 = vmatprep.subr.mxu0 %v838_v15  ;;  %v1070_v39 = vmul.f32 1.442695, %v1068_v36 }
 0x612   : > { %1744 = vmatpush3.msra.mxu0 %v838_v15  ;;  %v1067_v16 = vpop.xlane.xlu0 %1066 }
 0x613   : > { %v1069_v17 = vsub.f32 %v1061_v0, %v1067_v16 }
 0x614   : > { %v1087_v42 = vpop.permute.xlu1 %1086 }
 0x615   : > { %v1072_v18 = vmul.f32 1.442695, %v1069_v17 }
 0x616   : > { %v1867_v19 = vpop.eup %1866  ;;  %v1197_v20 = vpop.xlane.xlu0 %1196 }
 0x617   : > { %1870 = vpow2.f32 %v1072_v18  ;;  %v1201_v21 = vadd.f32 1e-12, %v1197_v20  ;;  %v826_v22 = vsel %vm436_vm1, %v1867_v19, 0.0 }
 0x618   : > { %v1869_v23 = vpop.eup %1868  ;;  %827 = vadd.xlane.f32.xlu0 %v826_v22  ;;  %v1085_v53 = vpop.permute.xlu1 %1084 }
 0x619   : > { %1872 = vrsqrt.f32 %v1201_v21  ;;  %v823_v24 = vsel %vm436_vm1, %v1869_v23, 0.0 }
 0x61a   : > { %824 = vadd.xlane.f32.xlu1 %v823_v24  ;;  %v1182_v27 = vpop.xlane.xlu0 %1181  ;;  %1874 = vrsqrt.f32 %v1202_v31 }
 0x61b   : > { %1876 = vrsqrt.f32 %v1183_v35  ;;  %v1184_v48 = vadd.f32 1e-12, %v1182_v27 }
 0x61c   : > { %1878 = vpow2.f32 %v1070_v39 }
 0x61d   : > { %1880 = vrsqrt.f32 %v1184_v48  ;;  %v1938_v48 = vmov 0.0  }
 0x61e   : > { %v836_v28 = vpop.permute.xlu0 %835 }
 0x61f   : > { %1745 = vmatprep.subr.mxu0 %v836_v28 }
 0x620   : > { %1746 = vmatpush3.msra.mxu0 %v836_v28 }
 0x621   : > { %1757 = vmatprep.subr.mxu0 %v1087_v42 }
 0x624   : > { %v1871_v44 = vpop.eup %1870 }
 0x625   : > { %v1077_v29 = vsel %vm436_vm1, %v1871_v44, 0.0 }
 0x626   : > { %v1873_v30 = vpop.eup %1872  ;;  %1078 = vadd.xlane.f32.xlu0 %v1077_v29 }
 0x627   : > { %v1205_v34 = vmul.f32 %v1873_v30, %v2088_v40  ;;  %v1875_v37 = vpop.eup %1874 }
 0x628   : > { %v1206_v45 = vmul.f32 %v1875_v37, %v2086_v38  ;;  %v1877_v46 = vpop.eup %1876 }
 0x629   : > { %v1187_v47 = vmul.f32 %v1877_v46, %v2088_v40  ;;  %v1879_v49 = vpop.eup %1878  ;;  %v1458_v46 = vld [vmem:[%s2334_s3 + $0x30] sm:$0xff] }
 0x62a   : > { %v1074_v50 = vsel %vm436_vm1, %v1879_v49, 0.0  ;;  %v1881_v51 = vpop.eup %1880 }
 0x62b   : > { %1215 = vrot.lane.b32.xlu1 %v1205_v34, %s1936_s28  ;;  %v1188_v52 = vmul.f32 %v1881_v51, %v2086_v38 }
 0x63c   : > { %1217 = vrot.lane.b32.xlu0 %v1206_v45, %s1936_s28 }
 0x640   : > { %1209 = vrot.lane.b32.xlu0 %v1187_v47, %s1937_s29  ;;  %v1456_v47 = vld [vmem:[%s2334_s3 + $0x20] sm:$0xff] }
 0x64f   : > { %1075 = vadd.xlane.f32.xlu1 %v1074_v50  ;;  %v1457_v50 = vld [vmem:[%s2334_s3 + $0x28] sm:$0xff] }
 0x650   : > { %v1463_v51 = vpack.c.bf16 %v1457_v50, %v1456_v47 }
 0x660   : > { %1211 = vrot.lane.b32.xlu1 %v1188_v52, %s1937_s29  ;;  %v1454_v52 = vld [vmem:[%s2334_s3 + $0x10] sm:$0xff] }
 0x6a1   : > { %v828_v54 = vpop.xlane.xlu0 %827 }
 0x6a2   : > { %1882 = vrcp.f32 %v828_v54 }
 0x6a3   : > { %v825_v55 = vpop.xlane.xlu1 %824 }
 0x6a4   : > { %1884 = vrcp.f32 %v825_v55  ;;  %v1452_v55 = vld [vmem:[%s2334_s3] sm:$0xff] }
 0x6a7   : > { %v1216_v38 = vpop.permute.xlu1 %1215 }
 0x6af   : > { %v1883_v56 = vpop.eup %1882  ;;  %v1079_v57 = vpop.xlane.xlu0 %1078 }
 0x6b0   : > { %v832_v59 = vmul.f32 %v1883_v56, %v1867_v19  ;;  %1886 = vrcp.f32 %v1079_v57  ;;  %v1453_v56 = vld [vmem:[%s2334_s3 + $0x8] sm:$0xff] }
 0x6b1   : > { %v1885_v40 = vpop.eup %1884 }
 0x6b2   : > { %v831_v58 = vmul.f32 %v1885_v40, %v1869_v23  ;;  %v1461_v40 = vpack.c.bf16 %v1453_v56, %v1452_v55 }
 0x6b3   : > { %v1218_v60 = vpop.permute.xlu0 %1217 }
 0x6b4   : > { %1747 = vmatprep.mubr.msk.f32.mxu0 %vm436_vm1, %v831_v58 }
 0x6b5   : > { %1748 = vmatmul.mubr.msk.f32.vlgmr.msra.gmra.mxu0 %vm436_vm1, %v832_v59 }
 0x6b6   : > { %1758 = vmatpush3.msra.mxu0 %v1087_v42 }
 0x6b7   : > { %1759 = vmatprep.subr.mxu0 %v1085_v53  ;;  %v1210_v2 = vpop.permute.xlu0 %1209 }
 0x6b8   : > { %1760 = vmatpush3.msra.mxu0 %v1085_v53  ;;  %v1455_v53 = vld [vmem:[%s2334_s3 + $0x18] sm:$0xff] }
 0x6b9   : > { %1764 = vmatprep.subr.msk.mxu0 %vm436_vm1, %v1218_v60  ;;  %v1462_v54 = vpack.c.bf16 %v1455_v53, %v1454_v52 }
 0x6bd   : > { %v1887_v62 = vpop.eup %1886 }
 0x6be   : > { %v1083_v1 = vmul.f32 %v1887_v62, %v1871_v44 }
 0x6d8   : > { %v1076_v61 = vpop.xlane.xlu1 %1075 }
 0x6d9   : > { %1888 = vrcp.f32 %v1076_v61 }
 0x6dc   : > { %v1212_v3 = vpop.permute.xlu1 %1211 }
 0x6e6   : > { %v1889_v63 = vpop.eup %1888 }
 0x6e7   : > { %v1082_v0 = vmul.f32 %v1889_v63, %v1879_v49 }
 0x6e9   : > { %1761 = vmatprep.mubr.msk.f32.mxu0 %vm436_vm1, %v1082_v0 }
 0x6ea   : > { %1762 = vmatmul.mubr.msk.f32.vlgmr.msra.gmra.mxu0 %vm436_vm1, %v1083_v1 }
 0x6eb   : > { %1765 = vmatpush3.xpose.msk.msra.mxu0 %vm436_vm1, %v1218_v60  ;;  %1768 = vmatprep.mubr.msk.f32.mxu0 %vm436_vm1, %v1210_v2 }
 0x6ec   : > { %1766 = vmatprep.subr.msk.mxu0 %vm436_vm1, %v1216_v38 }
 0x6ef   : > { %1767 = vmatpush3.xpose.msk.msra.mxu0 %vm436_vm1, %v1216_v38 }
 0x6f2   : > { %1769 = vmatmul.mubr.msk.f32.vlgmr.msra.gmra.mxu0 %vm436_vm1, %v1212_v3 }
 0x775   : > { %v1749_v4 = vpop.f32.mrf.mxu0 }
 0x777   : > { %v913_v5 = vpop.f32.mrf.mxu0 }
 0x778   : > { %v1819_v19 = vpack.i.bf16 %v1749_v4, %v913_v5 }
 0x7aa   : > { %v1763_v6 = vpop.f32.mrf.mxu0 }
 0x7ac   : > { %v1162_v7 = vpop.f32.mrf.mxu0 }
 0x7ad   : > { %v1824_v20 = vpack.i.bf16 %v1763_v6, %v1162_v7 }
 0x7b2   : > { %v1770_v9 = vpop.f32.mrf.mxu0 }
 0x7b3   : > { %v1305_v11 = vmul.f32 %v1770_v9, %v1303_v8 }
 0x7b4   : > { %v1293_v12 = vpop.f32.mrf.mxu0 }
 0x7b5   : > { %v1304_v14 = vmul.f32 %v1303_v8, %v1293_v12  ;;  %v1310_v15 = vadd.f32 %v1674_v10, %v1305_v11  ;;  %v1677_v11 = vld [vmem:[%s2335_s4] ss:$0 sm:$0xff] }
 0x7b7   : > { %v1314_v16 = vsel %vm436_vm1, %v1310_v15, -inf  ;;  %v1309_v17 = vadd.f32 %v1673_v13, %v1304_v14 }
 0x7b8   : > { %1315 = vmax.xlane.f32.xlu1 %v1314_v16 }
 0x7b9   : > { %v1311_v18 = vsel %vm436_vm1, %v1309_v17, -inf }
 0x7ba   : > { %1312 = vmax.xlane.f32.xlu0 %v1311_v18 }
 0x7c9   : > { %1335 = vrot.lane.b32.xlu1 %v2090_v41, %s1937_s29 }
 0x7cd   : > { %1820 = vrot.lane.b32.xlu1 %v1819_v19, %s1936_s28 }
 0x7d1   : > { %1825 = vrot.lane.b32.xlu1 %v1824_v20, %s1934_s20 }
 0x841   : > { %v1316_v21 = vpop.xlane.xlu1 %1315 }
 0x842   : > { %v1318_v22 = vsub.f32 %v1310_v15, %v1316_v21 }
 0x843   : > { %v1313_v23 = vpop.xlane.xlu0 %1312 }
 0x844   : > { %v1321_v24 = vmul.f32 1.442695, %v1318_v22  ;;  %v1317_v27 = vsub.f32 %v1309_v17, %v1313_v23 }
 0x845   : > { %v1336_v28 = vpop.permute.xlu1 %1335 }
 0x846   : > { %1890 = vpow2.f32 %v1321_v24  ;;  %v1319_v42 = vmul.f32 1.442695, %v1317_v27  ;;  %1771 = vmatprep.subr.mxu1 %v1336_v28 }
 0x847   : > { %1772 = vmatpush3.msra.mxu1 %v1336_v28 }
 0x848   : > { %1892 = vpow2.f32 %v1319_v42 }
 0x849   : > { %v1821_v60 = vpop.permute.xlu1 %1820 }
 0x84a   : > { %v1823_v61 = vunpack.i.h.bf16 %v1821_v60  ;;  %v1822_v62 = vunpack.i.l.bf16 %v1821_v60 }
 0x84c   : > { %v1445_v2 = vsel %vm436_vm1, %v2204_v32, %v1823_v61  ;;  %v1444_v3 = vsel %vm436_vm1, %v2206_v33, %v1822_v62 }
 0x84d   : > { %v1826_v38 = vpop.permute.xlu1 %1825 }
 0x84e   : > { %v1828_v63 = vunpack.i.h.bf16 %v1826_v38  ;;  %v1827_v0 = vunpack.i.l.bf16 %v1826_v38 }
 0x850   : > { %v1447_v6 = vsel %vm1446_vm3, %v1444_v3, %v1827_v0  ;;  %v1448_v7 = vsel %vm1446_vm3, %v1445_v2, %v1828_v63 }
 0x853   : > { %v1891_v44 = vpop.eup %1890 }
 0x854   : > { %v1326_v41 = vsel %vm436_vm1, %v1891_v44, 0.0 }
 0x855   : > { %v1893_v29 = vpop.eup %1892  ;;  %1327 = vadd.xlane.f32.xlu0 %v1326_v41 }
 0x856   : > { %v1323_v30 = vsel %vm436_vm1, %v1893_v29, 0.0 }
 0x859   : > { %1324 = vadd.xlane.f32.xlu0 %v1323_v30 }
 0x86f   : > { %1333 = vrot.lane.b32.xlu0 %v2096_v43, %s1937_s29  ;;  %v1459_v43 = vld [vmem:[%s2334_s3 + $0x38] sm:$0xff] }
 0x870   : > { %v1464_v49 = vpack.c.bf16 %v1459_v43, %v1458_v46 }
 0x8de   : > { %v1328_v31 = vpop.xlane.xlu0 %1327 }
 0x8df   : > { %1894 = vrcp.f32 %v1328_v31 }
 0x8e2   : > { %v1325_v34 = vpop.xlane.xlu0 %1324 }
 0x8e3   : > { %1896 = vrcp.f32 %v1325_v34 }
 0x8e6   : > { %v1334_v35 = vpop.permute.xlu0 %1333 }
 0x8e7   : > { %1773 = vmatprep.subr.mxu1 %v1334_v35 }
 0x8e8   : > { %1774 = vmatpush3.msra.mxu1 %v1334_v35 }
 0x8e9   : > { %1778 = vmatprep.subr.bf16.mxu1 %v1938_v48 }
 0x8ec   : > { %v1895_v36 = vpop.eup %1894 }
 0x8ed   : > { %v1332_v45 = vmul.f32 %v1895_v36, %v1891_v44  ;;  %v1679_v36 = vld [vmem:[%s2338_s7] ss:$0 sm:$0xff] }
 0x8f0   : > { %v1897_v37 = vpop.eup %1896 }
 0x8f1   : > { %v1331_v39 = vmul.f32 %v1897_v37, %v1893_v29 }
 0x8f3   : > { %1775 = vmatprep.mubr.msk.f32.mxu1 %vm436_vm1, %v1331_v39  ;;  %v1680_v39 = vld [vmem:[%s2339_s8] ss:$0 sm:$0xff] }
 0x8f4   : > { %1776 = vmatmul.mubr.msk.f32.vlgmr.msra.gmra.mxu1 %vm436_vm1, %v1332_v45 }
 0x8f5   : > { %1779 = vmatpush3.bf16.msra.mxu1 %v1464_v49  ;;  %1786 = vmatprep.mubr.msk.bf16.mxu1 %vm1939_vm2, %v1938_v48 }
 0x8f6   : > { %1780 = vmatprep.subr.bf16.mxu1 %v1938_v48 }
 0x8f9   : > { %1781 = vmatpush3.bf16.msra.mxu1 %v1463_v51 }
 0x8fa   : > { %1782 = vmatprep.subr.bf16.mxu1 %v1938_v48 }
 0x8fd   : > { %1783 = vmatpush3.bf16.msra.mxu1 %v1462_v54 }
 0x8fe   : > { %1784 = vmatprep.subr.bf16.mxu1 %v1938_v48 }
 0x901   : > { %1785 = vmatpush3.bf16.msra.mxu1 %v1461_v40 }
 0x9b4   : > { %v1777_v57 = vpop.f32.mrf.mxu1 }
 0x9b6   : > { %v1411_v58 = vpop.f32.mrf.mxu1 }
 0x9b7   : > { %v1829_v59 = vpack.i.bf16 %v1777_v57, %v1411_v58 }
 0x9b9   : > { %1830 = vrot.lane.b32.xlu0 %v1829_v59, %s1933_s19 }
 0xa2b   : > { %v1831_v1 = vpop.permute.xlu0 %1830 }
 0xa2c   : > { %v1833_v4 = vunpack.i.h.bf16 %v1831_v1  ;;  %v1832_v5 = vunpack.i.l.bf16 %v1831_v1 }
 0xa2e   : > { %v1451_v8 = vsel %vm1449_vm4, %v1448_v7, %v1833_v4  ;;  %v1450_v9 = vsel %vm1449_vm4, %v1447_v6, %v1832_v5 }
 0xa2f   : > { %v1460_v10 = vpack.c.bf16 %v1451_v8, %v1450_v9 }
 0xa31   : > { %1787 = vmatmul.mubr.msk.bf16.vlgmr.msra.gmra.mxu1 %vm387_vm0, %v1460_v10 }
 0xaf1   : > { %v1509_v12 = vpop.f32.mrf.mxu1 }
 0xaf2   : > { %v1510_v13 = vadd.f32 %v1677_v11, %v1509_v12 }
 0xaf3   : > { %v1788_v14 = vpop.f32.mrf.mxu1 }
 0xaf4   : > { %v1518_v32 = vsel %vm387_vm0, %v1510_v13, 0.0 }
 0xaf5   : > { %1519 = vadd.xlane.f32.xlu1 %v1518_v32  ;;  %v1512_v33 = vpop.f32.mrf.mxu1 }
 0xaf6   : > { %v1513_v15 = vadd.f32 %v1677_v11, %v1512_v33 }
 0xaf7   : > { %v1789_v16 = vpop.f32.mrf.mxu1 }
 0xaf8   : > { %v1521_v17 = vsel %vm387_vm0, %v1513_v15, 0.0 }
 0xaf9   : > { %1522 = vadd.xlane.f32.xlu0 %v1521_v17 }
 0xb7e   : > { %v1520_v18 = vpop.xlane.xlu1 %1519 }
 0xb7f   : > { %v1525_v19 = vmul.f32 0.015625, %v1520_v18 }
 0xb81   : > { %v1527_v20 = vsub.f32 %v1510_v13, %v1525_v19 }
 0xb82   : > { %v1523_v21 = vpop.xlane.xlu0 %1522 }
 0xb83   : > { %v1526_v22 = vmul.f32 0.015625, %v1523_v21  ;;  %v1529_v23 = vmul.f32 %v1527_v20, %v1527_v20 }
 0xb85   : > { %v1528_v24 = vsub.f32 %v1513_v15, %v1526_v22  ;;  %v1531_v27 = vsel %vm387_vm0, %v1529_v23, 0.0 }
 0xb86   : > { %1532 = vadd.xlane.f32.xlu0 %v1531_v27 }
 0xb87   : > { %v1530_v28 = vmul.f32 %v1528_v24, %v1528_v24 }
 0xb89   : > { %v1534_v42 = vsel %vm387_vm0, %v1530_v28, 0.0 }
 0xb8a   : > { %1535 = vadd.xlane.f32.xlu1 %v1534_v42 }
 0xc0f   : > { %v1533_v44 = vpop.xlane.xlu0 %1532 }
 0xc10   : > { %v1537_v41 = vmul.f32 0.015625, %v1533_v44 }
 0xc12   : > { %v1539_v29 = vadd.f32 1e-05, %v1537_v41 }
 0xc13   : > { %v1536_v30 = vpop.xlane.xlu1 %1535 }
 0xc14   : > { %1898 = vrsqrt.f32 %v1539_v29  ;;  %v1538_v31 = vmul.f32 0.015625, %v1536_v30 }
 0xc16   : > { %v1540_v34 = vadd.f32 1e-05, %v1538_v31 }
 0xc18   : > { %1900 = vrsqrt.f32 %v1540_v34 }
 0xc21   : > { %v1899_v35 = vpop.eup %1898 }
 0xc22   : > { %v1543_v37 = vmul.f32 %v1899_v35, %v1527_v20 }
 0xc24   : > { %v1551_v45 = vmul.f32 %v1679_v36, %v1543_v37 }
 0xc25   : > { %v1901_v46 = vpop.eup %1900 }
 0xc26   : > { %v1559_v43 = vadd.f32 %v1680_v39, %v1551_v45  ;;  %v1544_v47 = vmul.f32 %v1901_v46, %v1528_v24 }
 0xc28   : > { %v1561_v48 = vadd.f32 %v1559_v43, %v2076_v25  ;;  %v1552_v49 = vmul.f32 %v1679_v36, %v1544_v47 }
 0xc2a   : > { %1563 = vst.msk [vmem:[%s346_s15] sm:$0xff] %vm387_vm0, %v1561_v48  ;;  %v1560_v50 = vadd.f32 %v1680_v39, %v1552_v49 }
 0xc2c   : > { %v1562_v51 = vadd.f32 %v1560_v50, %v2078_v26 }
 0xc2e   : > { %1564 = vst.msk [vmem:[%s346_s15 + $0x8] sm:$0xff] %vm387_vm0, %v1562_v51 }
 0xc2f PF: > { %s20_s30 = sadd.s32 1, %s1927_s30  }
 0xc30   : > { %p17_p1 = scmp.ge.s32.totalorder %s20_s30, 4  }
 0xc32   :  { %19 = sbr.rel (!%p17_p1) target bundleno = 1 (0x1), region = 94 }
 0xc37   :  { %1586 = vsyncpa [#allocation3], 1 }
 0xc38   :  { %1588 = vsyncpa [#allocation3 + $0x1], 1 }

</bundles_post_ra>
